<compile_context>
chip_gen: v7x
topology: tpu7x:2x2x1
jax: 0.10.0
libtpu: 0.0.40
codegen_flags: <defaults>
</compile_context>

<pallas_src>
import functools
import math

import numpy as np
import jax
import jax.numpy as jnp
from jax.experimental import pallas as pl
from jax.experimental.pallas import tpu as pltpu


def _round_up(x, m):
    return ((x + m - 1) // m) * m


# Below this output size a GEMM is sub-tile work: run it in plain XLA instead
# (review feedback: padding M/K to 128/256 wastes >90% of the MXU there).
_MIN_PALLAS_OUT = 128 * 128


def _apply_act(y, act, scale):
    """f32 epilogue shared by the Pallas kernels and the XLA fallback paths."""
    if act == "relu":
        return jnp.maximum(y, 0.0)
    if act == "elu":
        return jnp.where(y > 0.0, y, jnp.exp(jnp.minimum(y, 0.0)) - 1.0)
    if act == "sigmoid_scale":
        return scale * jax.nn.sigmoid(y)
    return y


# ----------------------------- Pallas kernels -------------------------------

def _gemm_kernel(*refs, act, scale, has_res, nk):
    """Tiled GEMM, bias folded into acc init, fused activation (+residual)."""
    if has_res:
        x_ref, w_ref, b_ref, r_ref, o_ref, acc_ref = refs
    else:
        x_ref, w_ref, b_ref, o_ref, acc_ref = refs
        r_ref = None
    k = pl.program_id(2)

    @pl.when(k == 0)
    def _init():
        acc_ref[...] = jnp.zeros_like(acc_ref) + b_ref[...]

    acc = acc_ref[...] + jnp.dot(x_ref[...], w_ref[...],
                                 preferred_element_type=jnp.float32)
    acc_ref[...] = acc

    @pl.when(k == nk - 1)
    def _finish():
        y = acc
        if has_res:
            y = y + r_ref[...].astype(jnp.float32)
        y = _apply_act(y, act, scale)
        o_ref[...] = y.astype(o_ref.dtype)


def _conv3_kernel(r0_ref, r1_ref, r2_ref, w_ref, b_ref, o_ref, acc_ref, *,
                  wo, act, scale, nk):
    """Direct 3x3 / stride-1 conv: nine taps accumulated from shifted rows."""
    k = pl.program_id(3)

    @pl.when(k == 0)
    def _init():
        acc_ref[...] = jnp.zeros_like(acc_ref) + b_ref[...]

    acc = acc_ref[...]
    rows = (r0_ref, r1_ref, r2_ref)
    for di in range(3):
        for dj in range(3):
            patch = rows[di][0, 0, pl.ds(dj, wo), :]          # (wo, tc) bf16
            acc = acc + jnp.dot(patch, w_ref[3 * di + dj],
                                preferred_element_type=jnp.float32)
    acc_ref[...] = acc

    @pl.when(k == nk - 1)
    def _finish():
        y = _apply_act(acc, act, scale)
        o_ref[0, 0] = y.astype(o_ref.dtype)


# ----------------------------- tile selection --------------------------------

def _pick_tm(M):
    """Adaptive M tile: never pad small M up to 128."""
    if M < 128:
        Mp = _round_up(M, 8)
        return Mp, Mp
    if M % 128 == 0:
        tm = 256 if (M % 256 == 0 and M >= 1024) else 128
        return tm, M
    return 128, _round_up(M, 128)


def _pick_last(n, cap):
    """Largest legal lane-dim tile (<= cap, multiple of 128 or the full dim)."""
    if n <= cap:
        return n
    for t in (cap, 256, 128):
        if t <= cap and n % t == 0:
            return t
    return n                      # full dim is always a legal (last-dim) block


def _pick_ck(cin_p):
    if cin_p <= 512:
        return cin_p
    for t in (512, 256, 128):
        if cin_p % t == 0:
            return t
    return cin_p


# ----------------------------- kernel builders --------------------------------

@functools.lru_cache(maxsize=None)
def _build_gemm(Mp, K, N, tm, tk, tn, has_res, act, scale, out_dtype):
    nk = K // tk
    kernel = functools.partial(_gemm_kernel, act=act, scale=scale,
                               has_res=has_res, nk=nk)
    in_specs = [
        pl.BlockSpec((tm, tk), lambda i, j, k: (i, k)),
        pl.BlockSpec((tk, tn), lambda i, j, k: (k, j)),
        pl.BlockSpec((1, tn), lambda i, j, k: (0, j)),
    ]
    if has_res:
        in_specs.append(pl.BlockSpec((tm, tn), lambda i, j, k: (i, j)))
    return pl.pallas_call(
        kernel,
        out_shape=jax.ShapeDtypeStruct((Mp, N), out_dtype),
        grid=(Mp // tm, N // tn, nk),
        in_specs=in_specs,
        out_specs=pl.BlockSpec((tm, tn), lambda i, j, k: (i, j)),
        scratch_shapes=[pltpu.VMEM((tm, tn), jnp.float32)],
        compiler_params=pltpu.CompilerParams(
            dimension_semantics=("parallel", "parallel", "arbitrary")),
    )


@functools.lru_cache(maxsize=None)
def _build_conv3(B, Hp, Wp, cin_p, cout, Ho, Wo, tc, tn, act, scale, out_dtype):
    del Hp  # part of the cache key only
    nk = cin_p // tc
    kernel = functools.partial(_conv3_kernel, wo=Wo, act=act, scale=scale, nk=nk)

    def row_spec(di):
        # Block size 1 along H -> block index == element index, so the
        # index_map can express the +di tap shift directly (no im2col).
        return pl.BlockSpec((1, 1, Wp, tc),
                            lambda b, j, h, k, di=di: (b, h + di, 0, k))

    return pl.pallas_call(
        kernel,
        out_shape=jax.ShapeDtypeStruct((B, Ho, Wo, cout), out_dtype),
        grid=(B, cout // tn, Ho, nk),
        in_specs=[row_spec(0), row_spec(1), row_spec(2),
                  pl.BlockSpec((9, tc, tn), lambda b, j, h, k: (0, k, j)),
                  pl.BlockSpec((1, tn), lambda b, j, h, k: (0, j))],
        out_specs=pl.BlockSpec((1, 1, Wo, tn), lambda b, j, h, k: (b, h, 0, j)),
        scratch_shapes=[pltpu.VMEM((Wo, tn), jnp.float32)],
        compiler_params=pltpu.CompilerParams(
            dimension_semantics=("parallel", "parallel", "parallel",
                                 "arbitrary")),
    )


# ----------------------------- conv wrappers ---------------------------------

def _gemm_pallas(xm, w, bias, rm, act, scale, out_dtype):
    M, K = xm.shape
    _, N = w.shape
    tm, Mp = _pick_tm(M)
    tk = _pick_last(K, 512)
    tn = _pick_last(N, 256)
    if Mp != M:
        xm = jnp.pad(xm, ((0, Mp - M), (0, 0)))
        if rm is not None:
            rm = jnp.pad(rm, ((0, Mp - M), (0, 0)))
    fn = _build_gemm(Mp, K, N, tm, tk, tn, rm is not None, act, float(scale),
                     out_dtype)
    args = (xm, w, bias) if rm is None else (xm, w, bias, rm)
    return fn(*args)[:M]


def _conv3_pallas(xpad, w, bias, Ho, Wo, act, scale, out_dtype):
    B, _, Wp, cin_p = xpad.shape
    cout = w.shape[2]
    tc = _pick_ck(cin_p)
    tn = _pick_last(cout, 256)
    fn = _build_conv3(B, xpad.shape[1], Wp, cin_p, cout, Ho, Wo, tc, tn,
                      act, float(scale), out_dtype)
    return fn(xpad, xpad, xpad, w, bias)


def _conv3_jnp(xpad, w, bias, stride, Ho, Wo, act, scale):
    """XLA fallback for tiny / stride-2 3x3 convs (fused inside the outer jit)."""
    acc = None
    for di in range(3):
        for dj in range(3):
            xs = xpad[:, di:di + stride * (Ho - 1) + 1:stride,
                      dj:dj + stride * (Wo - 1) + 1:stride, :]
            t = jnp.einsum("bhwc,co->bhwo", xs, w[3 * di + dj],
                           preferred_element_type=jnp.float32)
            acc = t if acc is None else acc + t
    return _apply_act(acc + bias[0], act, scale)


def conv_op(x, p, stride=1, act="linear", scale=1.0, residual=None,
            out_dtype=jnp.bfloat16):
    """PyTorch-style conv (k in {1,3}, padding=k//2) in NHWC, fused bias+act."""
    w, bias = p["w"], p["b"]
    x = x.astype(jnp.bfloat16)
    B, H, W, cin = x.shape

    if w.ndim == 2:                                          # 1x1 convolution
        if stride != 1:
            x = x[:, ::stride, ::stride, :]
        _, Ho, Wo, _ = x.shape
        K, N = w.shape
        M = B * Ho * Wo
        xm = x.reshape(M, K)
        rm = None
        if residual is not None:
            rm = residual.astype(jnp.bfloat16).reshape(M, N)
        if M * N < _MIN_PALLAS_OUT:
            y = jnp.dot(xm, w, preferred_element_type=jnp.float32) + bias
            if rm is not None:
                y = y + rm.astype(jnp.float32)
            y = _apply_act(y, act, scale).astype(out_dtype)
        else:
            y = _gemm_pallas(xm, w, bias, rm, act, scale, out_dtype)
        return y.reshape(B, Ho, Wo, N)

    # 3x3 convolution, padding=1 (all 3x3 convs in DSRnet use this).
    _, cin_p, N = w.shape
    Ho = (H + 2 - 3) // stride + 1
    Wo = (W + 2 - 3) // stride + 1
    xpad = jnp.pad(x, ((0, 0), (1, 1), (1, 1), (0, cin_p - cin)))
    if stride != 1 or B * Ho * Wo * N < _MIN_PALLAS_OUT:
        # TODO(synk): add an even/odd-column Pallas path for the few stride-2
        # 3x3 convs (pre convs + first bottleneck of each layer).
        return _conv3_jnp(xpad, w, bias, stride, Ho, Wo, act, scale).astype(
            out_dtype)
    return _conv3_pallas(xpad, w, bias, Ho, Wo, act, scale, out_dtype)


# ----------------------------- non-conv glue ----------------------------------

def _maxpool3x3s2p1(x):
    """3x3/s2/p1 max-pool as fused shifted strided slices (no 9x HBM stack)."""
    B, H, W, C = x.shape
    xp = jnp.pad(x, ((0, 0), (1, 1), (1, 1), (0, 0)), constant_values=-1e30)
    Ho = (H + 2 - 3) // 2 + 1
    Wo = (W + 2 - 3) // 2 + 1
    out = None
    for di in range(3):
        for dj in range(3):
            s = xp[:, di:di + 2 * (Ho - 1) + 1:2, dj:dj + 2 * (Wo - 1) + 1:2, :]
            out = s if out is None else jnp.maximum(out, s)
    return out


@functools.lru_cache(maxsize=None)
def _bilinear_matrix(n_in, n_out):
    # align_corners=True linear interpolation matrix (n_out, n_in), as in the
    # reference F.interpolate(..., mode='bilinear', align_corners=True).
    m = np.zeros((n_out, n_in), dtype=np.float32)
    if n_in == 1:
        m[:, 0] = 1.0
        return m
    src = np.arange(n_out, dtype=np.float64) * (n_in - 1) / (n_out - 1)
    lo = np.minimum(np.floor(src).astype(np.int64), n_in - 2)
    frac = (src - lo).astype(np.float32)
    rows = np.arange(n_out)
    m[rows, lo] += 1.0 - frac
    m[rows, lo + 1] += frac
    return m


def _bilinear_up2(x):
    """x2 bilinear upsample of a tiny NHWC disparity map (plain jnp in-jit)."""
    B, H, W, C = x.shape
    mh = jnp.asarray(_bilinear_matrix(H, 2 * H))
    mw = jnp.asarray(_bilinear_matrix(W, 2 * W))
    y = jnp.einsum("oh,bhwc->bowc", mh, x.astype(jnp.float32))
    y = jnp.einsum("pw,bowc->bopc", mw, y)
    return y


def _nearest_up2(x):
    return jnp.repeat(jnp.repeat(x, 2, axis=1), 2, axis=2)


def _upconv(x, p):
    return conv_op(_nearest_up2(x), p, stride=1, act="elu")


def _get_disp(x, p, max_disp):
    return conv_op(x, p, stride=1, act="sigmoid_scale", scale=max_disp,
                   out_dtype=jnp.float32)


# ------------------------------ parameters ------------------------------------

class _KeyGen:
    def __init__(self, seed):
        self._key = jax.random.PRNGKey(seed)

    def next(self):
        self._key, sub = jax.random.split(self._key)
        return sub


def _init_conv(kg, cout, cin, k):
    fan_in = cin * k * k
    w = jax.random.normal(kg.next(), (cout, cin, k, k),
                          jnp.float32) * math.sqrt(2.0 / fan_in)
    b = jnp.zeros((cout,), jnp.float32)
    return {"w": w, "b": b}


def _make_layer(kg, inplanes, planes, blocks):
    expansion = 4
    layer = []
    for i in range(blocks):
        stride = 2 if i == 0 else 1
        inc = inplanes if i == 0 else planes * expansion
        blk = {"c1": _init_conv(kg, planes, inc, 1),
               "c2": _init_conv(kg, planes, planes, 3),
               "c3": _init_conv(kg, planes * expansion, planes, 1)}
        if stride != 1 or inc != planes * expansion:
            blk["ds"] = _init_conv(kg, planes * expansion, inc, 1)
        layer.append(blk)
    return layer


def init_dsrnet_params(seed=42):
    kg = _KeyGen(seed)
    return {
        "pre_img": _init_conv(kg, 64, 3, 3),
        "pre_disp": _init_conv(kg, 64, 1, 3),
        # ResNet-50 style encoder, layers = [3, 4, 6, 3]
        "enc": [
            _make_layer(kg, 64, 64, 3),
            _make_layer(kg, 256, 128, 4),
            _make_layer(kg, 512, 256, 6),
            _make_layer(kg, 1024, 512, 3),
        ],
        "up6": _init_conv(kg, 512, 2048, 3),
        "up5": _init_conv(kg, 256, 1536, 3),
        "up4": _init_conv(kg, 128, 768, 3),
        "up3": _init_conv(kg, 64, 384, 3),
        "up2": _init_conv(kg, 32, 128, 3),
        "up1": _init_conv(kg, 32, 96, 3),
        "disp4": _init_conv(kg, 1, 128, 3),
        "disp3": _init_conv(kg, 1, 65, 3),
        "disp2": _init_conv(kg, 1, 33, 3),
        "disp1": _init_conv(kg, 1, 33, 3),
    }


def _prep_conv(w, b):
    """Torch-layout conv -> GEMM-ready bf16 weights (done once, outside jit)."""
    cout, cin, kh, kw = w.shape
    if kh == 1:
        wm = jnp.transpose(w.reshape(cout, cin))                 # (cin, cout)
    else:
        cin_p = _round_up(cin, 8)
        wm = jnp.transpose(w, (2, 3, 1, 0)).reshape(kh * kw, cin, cout)
        if cin_p != cin:
            wm = jnp.pad(wm, ((0, 0), (0, cin_p - cin), (0, 0)))
    return {"w": wm.astype(jnp.bfloat16),
            "b": b.reshape(1, cout).astype(jnp.float32)}


def prepare_params(raw):
    p = {"pre_img": _prep_conv(**raw["pre_img"]),
         "pre_disp": _prep_conv(**raw["pre_disp"]),
         "enc": [[{k: _prep_conv(**c) for k, c in blk.items()} for blk in layer]
                 for layer in raw["enc"]]}
    for name in ("up6", "up5", "up4", "up3", "up2", "up1",
                 "disp4", "disp3", "disp2", "disp1"):
        p[name] = _prep_conv(**raw[name])
    return p


# ------------------------------ forward pass -----------------------------------

def _bottleneck(x, blk, stride):
    out = conv_op(x, blk["c1"], act="relu")
    out = conv_op(out, blk["c2"], stride=stride, act="relu")
    if "ds" in blk:
        idn = conv_op(x, blk["ds"], stride=stride, act="linear")
    else:
        idn = x
    # residual add + ReLU fused into the conv3 GEMM epilogue
    return conv_op(out, blk["c3"], act="relu", residual=idn)


def _feature_extraction(x, enc):
    f0 = x                               # 64  @ H/2
    f1 = _maxpool3x3s2p1(f0)             # 64  @ H/4
    feats = [f0, f1]
    cur = f1
    for layer in enc:                    # 256/512/1024/2048 @ H/8..H/64
        for bi, blk in enumerate(layer):
            cur = _bottleneck(cur, blk, stride=2 if bi == 0 else 1)
        feats.append(cur)
    return feats


def dsrnet_forward(image, lr, params, max_disp):
    # External NCHW -> internal NHWC bf16.
    img = jnp.transpose(image, (0, 2, 3, 1)).astype(jnp.bfloat16)
    dsp = jnp.transpose(lr, (0, 2, 3, 1)).astype(jnp.bfloat16)
    # TODO(synk): scale_pyramid(lr) is computed in the reference but unused.

    img_pre = conv_op(img, params["pre_img"], stride=2, act="relu")
    disp_pre = conv_op(dsp, params["pre_disp"], stride=2, act="relu")
    imf = _feature_extraction(img_pre, params["enc"])
    dpf = _feature_extraction(disp_pre, params["enc"])
    s = [imf[i] + dpf[i] for i in range(6)]        # fused by XLA into consumers
    cat = lambda *xs: jnp.concatenate(xs, axis=-1)

    iconv6 = _upconv(s[5], params["up6"])
    iconv5 = _upconv(cat(iconv6, s[4]), params["up5"])
    iconv4 = _upconv(cat(s[3], iconv5), params["up4"])
    disp4 = _get_disp(iconv4, params["disp4"], max_disp)
    up_disp4 = _bilinear_up2(disp4)
    iconv3 = _upconv(cat(s[2], iconv4), params["up3"])
    disp3 = _get_disp(cat(iconv3, up_disp4.astype(jnp.bfloat16)),
                      params["disp3"], max_disp)
    up_disp3 = _bilinear_up2(disp3)
    iconv2 = _upconv(cat(s[1], iconv3), params["up2"])
    disp2 = _get_disp(cat(iconv2, up_disp3.astype(jnp.bfloat16)),
                      params["disp2"], max_disp)
    up_disp2 = _bilinear_up2(disp2)
    iconv1 = _upconv(cat(s[0], iconv2), params["up1"])
    disp1 = _get_disp(cat(iconv1, up_disp2.astype(jnp.bfloat16)),
                      params["disp1"], max_disp)

    to_nchw = lambda d: jnp.transpose(d, (0, 3, 1, 2)).astype(jnp.float32)
    return to_nchw(disp1), to_nchw(disp2), to_nchw(disp3), to_nchw(disp4)


# ----------------------------------- main --------------------------------------

if __name__ == "__main__":
    key = jax.random.PRNGKey(0)
    k1, k2 = jax.random.split(key)
    B, H, W = 1, 64, 64            # smallest size supporting the 6 halvings
    image = jax.random.normal(k1, (B, 3, H, W), jnp.float32)
    lr = jax.random.normal(k2, (B, 1, H, W), jnp.float32)

    params = prepare_params(init_dsrnet_params(seed=42))
    max_disp = 192.0

    fwd = jax.jit(functools.partial(dsrnet_forward, max_disp=max_disp))
    outs = jax.block_until_ready(fwd(image, lr, params))

    assert outs[0].shape == (B, 1, H, W)
    assert outs[1].shape == (B, 1, H // 2, W // 2)
    assert outs[2].shape == (B, 1, H // 4, W // 4)
    assert outs[3].shape == (B, 1, H // 8, W // 8)
    assert all(bool(jnp.all(jnp.isfinite(o))) for o in outs)
    print("KERNEL_OK")
</pallas_src>

<mosaic_0001>
module attributes {stable_mosaic.version = 11 : i64} {
  func.func @_gemm_kernel(%arg0: i32, %arg1: i32, %arg2: i32, %arg3: memref<128x64xbf16, #tpu.memory_space<vmem>>, %arg4: memref<64x64xbf16, #tpu.memory_space<vmem>>, %arg5: memref<1x64xf32, #tpu.memory_space<vmem>>, %arg6: memref<128x64xbf16, #tpu.memory_space<vmem>>, %arg7: memref<128x64xf32, #tpu.memory_space<vmem>>) attributes {dimension_semantics = [#tpu.dimension_semantics<parallel>, #tpu.dimension_semantics<parallel>, #tpu.dimension_semantics<arbitrary>], iteration_bounds = array<i64: 2, 1, 1>, scalar_prefetch = 0 : i64, scratch_operands = 1 : i64, tpu.core_type = #tpu.core_type<tc>, window_params = [{transform_indices = @transform_0, window_bounds = array<i64: 128, 64>}, {transform_indices = @transform_1, window_bounds = array<i64: 64, 64>}, {transform_indices = @transform_2, window_bounds = array<i64: 1, 64>}, {transform_indices = @transform_3, window_bounds = array<i64: 128, 64>}]} {
    %c0_i32 = arith.constant 0 : i32
    %0 = arith.cmpi eq, %arg2, %c0_i32 : i32
    %1 = arith.extui %0 : i1 to i32
    %c0_i32_0 = arith.constant 0 : i32
    %2 = arith.cmpi ne, %1, %c0_i32_0 : i32
    scf.if %2 {
      %cst_10 = arith.constant 0.000000e+00 : f32
      %12 = vector.broadcast %cst_10 : f32 to vector<128x64xf32>
      %c0_11 = arith.constant 0 : index
      %c0_12 = arith.constant 0 : index
      %13 = vector.load %arg5[%c0_11, %c0_12] : memref<1x64xf32, #tpu.memory_space<vmem>>, vector<1x64xf32>
      %14 = vector.broadcast %13 : vector<1x64xf32> to vector<128x64xf32>
      %15 = arith.addf %12, %14 : vector<128x64xf32>
      %c0_13 = arith.constant 0 : index
      %c0_14 = arith.constant 0 : index
      %16 = vector.load %arg7[%c0_13, %c0_14] : memref<128x64xf32, #tpu.memory_space<vmem>>, vector<128x64xf32>
      tpu.vector_store %arg7[%c0_13, %c0_14], %15 {strides = array<i32>} : memref<128x64xf32, #tpu.memory_space<vmem>>, vector<128x64xf32>,
    } else {
    }
    %c0 = arith.constant 0 : index
    %c0_1 = arith.constant 0 : index
    %3 = vector.load %arg7[%c0, %c0_1] : memref<128x64xf32, #tpu.memory_space<vmem>>, vector<128x64xf32>
    %c0_2 = arith.constant 0 : index
    %c0_3 = arith.constant 0 : index
    %4 = vector.load %arg3[%c0_2, %c0_3] : memref<128x64xbf16, #tpu.memory_space<vmem>>, vector<128x64xbf16>
    %c0_4 = arith.constant 0 : index
    %c0_5 = arith.constant 0 : index
    %5 = vector.load %arg4[%c0_4, %c0_5] : memref<64x64xbf16, #tpu.memory_space<vmem>>, vector<64x64xbf16>
    %cst = arith.constant dense<0.000000e+00> : vector<128x64xf32>
    %6 = tpu.matmul %4, %5, %cst {dimension_numbers = #tpu.dot_dimension_numbers<[1], [0], [0], [1], [0, 0, 1, 1], [], []>} : vector<128x64xbf16>, vector<64x64xbf16>, vector<128x64xf32> -> vector<128x64xf32>
    %7 = arith.addf %3, %6 : vector<128x64xf32>
    %c0_6 = arith.constant 0 : index
    %c0_7 = arith.constant 0 : index
    %8 = vector.load %arg7[%c0_6, %c0_7] : memref<128x64xf32, #tpu.memory_space<vmem>>, vector<128x64xf32>
    tpu.vector_store %arg7[%c0_6, %c0_7], %7 {strides = array<i32>} : memref<128x64xf32, #tpu.memory_space<vmem>>, vector<128x64xf32>,
    %c0_i32_8 = arith.constant 0 : i32
    %9 = arith.cmpi eq, %arg2, %c0_i32_8 : i32
    %10 = arith.extui %9 : i1 to i32
    %c0_i32_9 = arith.constant 0 : i32
    %11 = arith.cmpi ne, %10, %c0_i32_9 : i32
    scf.if %11 {
      %cst_10 = arith.constant 0.000000e+00 : f32
      %12 = vector.broadcast %cst_10 : f32 to vector<128x64xf32>
      %13 = arith.maximumf %7, %12 : vector<128x64xf32>
      %14 = arith.truncf %13 : vector<128x64xf32> to vector<128x64xbf16>
      %c0_11 = arith.constant 0 : index
      %c0_12 = arith.constant 0 : index
      %15 = vector.load %arg6[%c0_11, %c0_12] : memref<128x64xbf16, #tpu.memory_space<vmem>>, vector<128x64xbf16>
      tpu.vector_store %arg6[%c0_11, %c0_12], %14 {strides = array<i32>} : memref<128x64xbf16, #tpu.memory_space<vmem>>, vector<128x64xbf16>,
    } else {
    }
    return
  }
  func.func @transform_0(%arg0: i32, %arg1: i32, %arg2: i32) -> (i32, i32) {
    %c0_i32 = arith.constant 0 : i32
    return %arg0, %arg2 : i32, i32
  }
  func.func @transform_1(%arg0: i32, %arg1: i32, %arg2: i32) -> (i32, i32) {
    %c0_i32 = arith.constant 0 : i32
    return %arg2, %arg1 : i32, i32
  }
  func.func @transform_2(%arg0: i32, %arg1: i32, %arg2: i32) -> (i32, i32) {
    %c0_i32 = arith.constant 0 : i32
    %c0_i32_0 = arith.constant 0 : i32
    return %c0_i32, %arg1 : i32, i32
  }
  func.func @transform_3(%arg0: i32, %arg1: i32, %arg2: i32) -> (i32, i32) {
    %c0_i32 = arith.constant 0 : i32
    return %arg0, %arg1 : i32, i32
  }
}

module attributes {stable_mosaic.version = 11 : i64} {
  func.func @_gemm_kernel(%arg0: i32, %arg1: i32, %arg2: i32, %arg3: memref<64x64xbf16, #tpu.memory_space<vmem>>, %arg4: memref<64x256xbf16, #tpu.memory_space<vmem>>, %arg5: memref<1x256xf32, #tpu.memory_space<vmem>>, %arg6: memref<64x256xbf16, #tpu.memory_space<vmem>>, %arg7: memref<64x256xf32, #tpu.memory_space<vmem>>) attributes {dimension_semantics = [#tpu.dimension_semantics<parallel>, #tpu.dimension_semantics<parallel>, #tpu.dimension_semantics<arbitrary>], iteration_bounds = array<i64: 1, 1, 1>, scalar_prefetch = 0 : i64, scratch_operands = 1 : i64, tpu.core_type = #tpu.core_type<tc>, window_params = [{transform_indices = @transform_0, window_bounds = array<i64: 64, 64>}, {transform_indices = @transform_1, window_bounds = array<i64: 64, 256>}, {transform_indices = @transform_2, window_bounds = array<i64: 1, 256>}, {transform_indices = @transform_3, window_bounds = array<i64: 64, 256>}]} {
    %c0_i32 = arith.constant 0 : i32
    %0 = arith.cmpi eq, %arg2, %c0_i32 : i32
    %1 = arith.extui %0 : i1 to i32
    %c0_i32_0 = arith.constant 0 : i32
    %2 = arith.cmpi ne, %1, %c0_i32_0 : i32
    scf.if %2 {
      %cst_10 = arith.constant 0.000000e+00 : f32
      %12 = vector.broadcast %cst_10 : f32 to vector<64x256xf32>
      %c0_11 = arith.constant 0 : index
      %c0_12 = arith.constant 0 : index
      %13 = vector.load %arg5[%c0_11, %c0_12] : memref<1x256xf32, #tpu.memory_space<vmem>>, vector<1x256xf32>
      %14 = vector.broadcast %13 : vector<1x256xf32> to vector<64x256xf32>
      %15 = arith.addf %12, %14 : vector<64x256xf32>
      %c0_13 = arith.constant 0 : index
      %c0_14 = arith.constant 0 : index
      %16 = vector.load %arg7[%c0_13, %c0_14] : memref<64x256xf32, #tpu.memory_space<vmem>>, vector<64x256xf32>
      tpu.vector_store %arg7[%c0_13, %c0_14], %15 {strides = array<i32>} : memref<64x256xf32, #tpu.memory_space<vmem>>, vector<64x256xf32>,
    } else {
    }
    %c0 = arith.constant 0 : index
    %c0_1 = arith.constant 0 : index
    %3 = vector.load %arg7[%c0, %c0_1] : memref<64x256xf32, #tpu.memory_space<vmem>>, vector<64x256xf32>
    %c0_2 = arith.constant 0 : index
    %c0_3 = arith.constant 0 : index
    %4 = vector.load %arg3[%c0_2, %c0_3] : memref<64x64xbf16, #tpu.memory_space<vmem>>, vector<64x64xbf16>
    %c0_4 = arith.constant 0 : index
    %c0_5 = arith.constant 0 : index
    %5 = vector.load %arg4[%c0_4, %c0_5] : memref<64x256xbf16, #tpu.memory_space<vmem>>, vector<64x256xbf16>
    %cst = arith.constant dense<0.000000e+00> : vector<64x256xf32>
    %6 = tpu.matmul %4, %5, %cst {dimension_numbers = #tpu.dot_dimension_numbers<[1], [0], [0], [1], [0, 0, 1, 1], [], []>} : vector<64x64xbf16>, vector<64x256xbf16>, vector<64x256xf32> -> vector<64x256xf32>
    %7 = arith.addf %3, %6 : vector<64x256xf32>
    %c0_6 = arith.constant 0 : index
    %c0_7 = arith.constant 0 : index
    %8 = vector.load %arg7[%c0_6, %c0_7] : memref<64x256xf32, #tpu.memory_space<vmem>>, vector<64x256xf32>
    tpu.vector_store %arg7[%c0_6, %c0_7], %7 {strides = array<i32>} : memref<64x256xf32, #tpu.memory_space<vmem>>, vector<64x256xf32>,
    %c0_i32_8 = arith.constant 0 : i32
    %9 = arith.cmpi eq, %arg2, %c0_i32_8 : i32
    %10 = arith.extui %9 : i1 to i32
    %c0_i32_9 = arith.constant 0 : i32
    %11 = arith.cmpi ne, %10, %c0_i32_9 : i32
    scf.if %11 {
      %12 = arith.truncf %7 : vector<64x256xf32> to vector<64x256xbf16>
      %c0_10 = arith.constant 0 : index
      %c0_11 = arith.constant 0 : index
      %13 = vector.load %arg6[%c0_10, %c0_11] : memref<64x256xbf16, #tpu.memory_space<vmem>>, vector<64x256xbf16>
      tpu.vector_store %arg6[%c0_10, %c0_11], %12 {strides = array<i32>} : memref<64x256xbf16, #tpu.memory_space<vmem>>, vector<64x256xbf16>,
    } else {
    }
    return
  }
  func.func @transform_0(%arg0: i32, %arg1: i32, %arg2: i32) -> (i32, i32) {
    %c0_i32 = arith.constant 0 : i32
    return %arg0, %arg2 : i32, i32
  }
  func.func @transform_1(%arg0: i32, %arg1: i32, %arg2: i32) -> (i32, i32) {
    %c0_i32 = arith.constant 0 : i32
    return %arg2, %arg1 : i32, i32
  }
  func.func @transform_2(%arg0: i32, %arg1: i32, %arg2: i32) -> (i32, i32) {
    %c0_i32 = arith.constant 0 : i32
    %c0_i32_0 = arith.constant 0 : i32
    return %c0_i32, %arg1 : i32, i32
  }
  func.func @transform_3(%arg0: i32, %arg1: i32, %arg2: i32) -> (i32, i32) {
    %c0_i32 = arith.constant 0 : i32
    return %arg0, %arg1 : i32, i32
  }
}

module attributes {stable_mosaic.version = 11 : i64} {
  func.func @_gemm_kernel(%arg0: i32, %arg1: i32, %arg2: i32, %arg3: memref<64x64xbf16, #tpu.memory_space<vmem>>, %arg4: memref<64x256xbf16, #tpu.memory_space<vmem>>, %arg5: memref<1x256xf32, #tpu.memory_space<vmem>>, %arg6: memref<64x256xbf16, #tpu.memory_space<vmem>>, %arg7: memref<64x256xbf16, #tpu.memory_space<vmem>>, %arg8: memref<64x256xf32, #tpu.memory_space<vmem>>) attributes {dimension_semantics = [#tpu.dimension_semantics<parallel>, #tpu.dimension_semantics<parallel>, #tpu.dimension_semantics<arbitrary>], iteration_bounds = array<i64: 1, 1, 1>, scalar_prefetch = 0 : i64, scratch_operands = 1 : i64, tpu.core_type = #tpu.core_type<tc>, window_params = [{transform_indices = @transform_0, window_bounds = array<i64: 64, 64>}, {transform_indices = @transform_1, window_bounds = array<i64: 64, 256>}, {transform_indices = @transform_2, window_bounds = array<i64: 1, 256>}, {transform_indices = @transform_3, window_bounds = array<i64: 64, 256>}, {transform_indices = @transform_4, window_bounds = array<i64: 64, 256>}]} {
    %c0_i32 = arith.constant 0 : i32
    %0 = arith.cmpi eq, %arg2, %c0_i32 : i32
    %1 = arith.extui %0 : i1 to i32
    %c0_i32_0 = arith.constant 0 : i32
    %2 = arith.cmpi ne, %1, %c0_i32_0 : i32
    scf.if %2 {
      %cst_10 = arith.constant 0.000000e+00 : f32
      %12 = vector.broadcast %cst_10 : f32 to vector<64x256xf32>
      %c0_11 = arith.constant 0 : index
      %c0_12 = arith.constant 0 : index
      %13 = vector.load %arg5[%c0_11, %c0_12] : memref<1x256xf32, #tpu.memory_space<vmem>>, vector<1x256xf32>
      %14 = vector.broadcast %13 : vector<1x256xf32> to vector<64x256xf32>
      %15 = arith.addf %12, %14 : vector<64x256xf32>
      %c0_13 = arith.constant 0 : index
      %c0_14 = arith.constant 0 : index
      %16 = vector.load %arg8[%c0_13, %c0_14] : memref<64x256xf32, #tpu.memory_space<vmem>>, vector<64x256xf32>
      tpu.vector_store %arg8[%c0_13, %c0_14], %15 {strides = array<i32>} : memref<64x256xf32, #tpu.memory_space<vmem>>, vector<64x256xf32>,
    } else {
    }
    %c0 = arith.constant 0 : index
    %c0_1 = arith.constant 0 : index
    %3 = vector.load %arg8[%c0, %c0_1] : memref<64x256xf32, #tpu.memory_space<vmem>>, vector<64x256xf32>
    %c0_2 = arith.constant 0 : index
    %c0_3 = arith.constant 0 : index
    %4 = vector.load %arg3[%c0_2, %c0_3] : memref<64x64xbf16, #tpu.memory_space<vmem>>, vector<64x64xbf16>
    %c0_4 = arith.constant 0 : index
    %c0_5 = arith.constant 0 : index
    %5 = vector.load %arg4[%c0_4, %c0_5] : memref<64x256xbf16, #tpu.memory_space<vmem>>, vector<64x256xbf16>
    %cst = arith.constant dense<0.000000e+00> : vector<64x256xf32>
    %6 = tpu.matmul %4, %5, %cst {dimension_numbers = #tpu.dot_dimension_numbers<[1], [0], [0], [1], [0, 0, 1, 1], [], []>} : vector<64x64xbf16>, vector<64x256xbf16>, vector<64x256xf32> -> vector<64x256xf32>
    %7 = arith.addf %3, %6 : vector<64x256xf32>
    %c0_6 = arith.constant 0 : index
    %c0_7 = arith.constant 0 : index
    %8 = vector.load %arg8[%c0_6, %c0_7] : memref<64x256xf32, #tpu.memory_space<vmem>>, vector<64x256xf32>
    tpu.vector_store %arg8[%c0_6, %c0_7], %7 {strides = array<i32>} : memref<64x256xf32, #tpu.memory_space<vmem>>, vector<64x256xf32>,
    %c0_i32_8 = arith.constant 0 : i32
    %9 = arith.cmpi eq, %arg2, %c0_i32_8 : i32
    %10 = arith.extui %9 : i1 to i32
    %c0_i32_9 = arith.constant 0 : i32
    %11 = arith.cmpi ne, %10, %c0_i32_9 : i32
    scf.if %11 {
      %c0_10 = arith.constant 0 : index
      %c0_11 = arith.constant 0 : index
      %12 = vector.load %arg6[%c0_10, %c0_11] : memref<64x256xbf16, #tpu.memory_space<vmem>>, vector<64x256xbf16>
      %13 = arith.extf %12 : vector<64x256xbf16> to vector<64x256xf32>
      %14 = arith.addf %7, %13 : vector<64x256xf32>
      %cst_12 = arith.constant 0.000000e+00 : f32
      %15 = vector.broadcast %cst_12 : f32 to vector<64x256xf32>
      %16 = arith.maximumf %14, %15 : vector<64x256xf32>
      %17 = arith.truncf %16 : vector<64x256xf32> to vector<64x256xbf16>
      %c0_13 = arith.constant 0 : index
      %c0_14 = arith.constant 0 : index
      %18 = vector.load %arg7[%c0_13, %c0_14] : memref<64x256xbf16, #tpu.memory_space<vmem>>, vector<64x256xbf16>
      tpu.vector_store %arg7[%c0_13, %c0_14], %17 {strides = array<i32>} : memref<64x256xbf16, #tpu.memory_space<vmem>>, vector<64x256xbf16>,
    } else {
    }
    return
  }
  func.func @transform_0(%arg0: i32, %arg1: i32, %arg2: i32) -> (i32, i32) {
    %c0_i32 = arith.constant 0 : i32
    return %arg0, %arg2 : i32, i32
  }
  func.func @transform_1(%arg0: i32, %arg1: i32, %arg2: i32) -> (i32, i32) {
    %c0_i32 = arith.constant 0 : i32
    return %arg2, %arg1 : i32, i32
  }
  func.func @transform_2(%arg0: i32, %arg1: i32, %arg2: i32) -> (i32, i32) {
    %c0_i32 = arith.constant 0 : i32
    %c0_i32_0 = arith.constant 0 : i32
    return %c0_i32, %arg1 : i32, i32
  }
  func.func @transform_3(%arg0: i32, %arg1: i32, %arg2: i32) -> (i32, i32) {
    %c0_i32 = arith.constant 0 : i32
    return %arg0, %arg1 : i32, i32
  }
  func.func @transform_4(%arg0: i32, %arg1: i32, %arg2: i32) -> (i32, i32) {
    %c0_i32 = arith.constant 0 : i32
    return %arg0, %arg1 : i32, i32
  }
}

module attributes {stable_mosaic.version = 11 : i64} {
  func.func @_conv3_kernel(%arg0: i32, %arg1: i32, %arg2: i32, %arg3: i32, %arg4: memref<1x1x18x384xbf16, #tpu.memory_space<vmem>>, %arg5: memref<1x1x18x384xbf16, #tpu.memory_space<vmem>>, %arg6: memref<1x1x18x384xbf16, #tpu.memory_space<vmem>>, %arg7: memref<9x384x64xbf16, #tpu.memory_space<vmem>>, %arg8: memref<1x64xf32, #tpu.memory_space<vmem>>, %arg9: memref<1x1x16x64xbf16, #tpu.memory_space<vmem>>, %arg10: memref<16x64xf32, #tpu.memory_space<vmem>>) attributes {dimension_semantics = [#tpu.dimension_semantics<parallel>, #tpu.dimension_semantics<parallel>, #tpu.dimension_semantics<parallel>, #tpu.dimension_semantics<arbitrary>], iteration_bounds = array<i64: 1, 1, 16, 1>, scalar_prefetch = 0 : i64, scratch_operands = 1 : i64, tpu.core_type = #tpu.core_type<tc>, window_params = [{transform_indices = @transform_0, window_bounds = array<i64: 1, 1, 18, 384>}, {transform_indices = @transform_1, window_bounds = array<i64: 1, 1, 18, 384>}, {transform_indices = @transform_2, window_bounds = array<i64: 1, 1, 18, 384>}, {transform_indices = @transform_3, window_bounds = array<i64: 9, 384, 64>}, {transform_indices = @transform_4, window_bounds = array<i64: 1, 64>}, {transform_indices = @transform_5, window_bounds = array<i64: 1, 1, 16, 64>}]} {
    %c0_i32 = arith.constant 0 : i32
    %0 = arith.cmpi eq, %arg3, %c0_i32 : i32
    %1 = arith.extui %0 : i1 to i32
    %c0_i32_0 = arith.constant 0 : i32
    %2 = arith.cmpi ne, %1, %c0_i32_0 : i32
    scf.if %2 {
      %cst_69 = arith.constant 0.000000e+00 : f32
      %62 = vector.broadcast %cst_69 : f32 to vector<16x64xf32>
      %c0_70 = arith.constant 0 : index
      %c0_71 = arith.constant 0 : index
      %63 = vector.load %arg8[%c0_70, %c0_71] : memref<1x64xf32, #tpu.memory_space<vmem>>, vector<1x64xf32>
      %64 = vector.broadcast %63 : vector<1x64xf32> to vector<16x64xf32>
      %65 = arith.addf %62, %64 : vector<16x64xf32>
      %c0_72 = arith.constant 0 : index
      %c0_73 = arith.constant 0 : index
      %66 = vector.load %arg10[%c0_72, %c0_73] : memref<16x64xf32, #tpu.memory_space<vmem>>, vector<16x64xf32>
      tpu.vector_store %arg10[%c0_72, %c0_73], %65 {strides = array<i32>} : memref<16x64xf32, #tpu.memory_space<vmem>>, vector<16x64xf32>,
    } else {
    }
    %c0 = arith.constant 0 : index
    %c0_1 = arith.constant 0 : index
    %3 = vector.load %arg10[%c0, %c0_1] : memref<16x64xf32, #tpu.memory_space<vmem>>, vector<16x64xf32>
    %c0_2 = arith.constant 0 : index
    %c0_3 = arith.constant 0 : index
    %c0_4 = arith.constant 0 : index
    %c0_5 = arith.constant 0 : index
    %4 = vector.load %arg4[%c0_2, %c0_3, %c0_4, %c0_5] : memref<1x1x18x384xbf16, #tpu.memory_space<vmem>>, vector<1x1x16x384xbf16>
    %5 = vector.shape_cast %4 : vector<1x1x16x384xbf16> to vector<16x384xbf16>
    %c0_6 = arith.constant 0 : index
    %c0_7 = arith.constant 0 : index
    %c0_8 = arith.constant 0 : index
    %6 = vector.load %arg7[%c0_6, %c0_7, %c0_8] : memref<9x384x64xbf16, #tpu.memory_space<vmem>>, vector<1x384x64xbf16>
    %7 = vector.shape_cast %6 : vector<1x384x64xbf16> to vector<384x64xbf16>
    %cst = arith.constant dense<0.000000e+00> : vector<16x64xf32>
    %8 = tpu.matmul %5, %7, %cst {dimension_numbers = #tpu.dot_dimension_numbers<[1], [0], [0], [1], [0, 0, 1, 1], [], []>} : vector<16x384xbf16>, vector<384x64xbf16>, vector<16x64xf32> -> vector<16x64xf32>
    %9 = arith.addf %3, %8 : vector<16x64xf32>
    %c0_9 = arith.constant 0 : index
    %c0_10 = arith.constant 0 : index
    %c1 = arith.constant 1 : index
    %c0_11 = arith.constant 0 : index
    %10 = vector.load %arg4[%c0_9, %c0_10, %c1, %c0_11] : memref<1x1x18x384xbf16, #tpu.memory_space<vmem>>, vector<1x1x16x384xbf16>
    %11 = vector.shape_cast %10 : vector<1x1x16x384xbf16> to vector<16x384xbf16>
    %c1_12 = arith.constant 1 : index
    %c0_13 = arith.constant 0 : index
    %c0_14 = arith.constant 0 : index
    %12 = vector.load %arg7[%c1_12, %c0_13, %c0_14] : memref<9x384x64xbf16, #tpu.memory_space<vmem>>, vector<1x384x64xbf16>
    %13 = vector.shape_cast %12 : vector<1x384x64xbf16> to vector<384x64xbf16>
    %cst_15 = arith.constant dense<0.000000e+00> : vector<16x64xf32>
    %14 = tpu.matmul %11, %13, %cst_15 {dimension_numbers = #tpu.dot_dimension_numbers<[1], [0], [0], [1], [0, 0, 1, 1], [], []>} : vector<16x384xbf16>, vector<384x64xbf16>, vector<16x64xf32> -> vector<16x64xf32>
    %15 = arith.addf %9, %14 : vector<16x64xf32>
    %c0_16 = arith.constant 0 : index
    %c0_17 = arith.constant 0 : index
    %c2 = arith.constant 2 : index
    %c0_18 = arith.constant 0 : index
    %16 = vector.load %arg4[%c0_16, %c0_17, %c2, %c0_18] : memref<1x1x18x384xbf16, #tpu.memory_space<vmem>>, vector<1x1x16x384xbf16>
    %17 = vector.shape_cast %16 : vector<1x1x16x384xbf16> to vector<16x384xbf16>
    %c2_19 = arith.constant 2 : index
    %c0_20 = arith.constant 0 : index
    %c0_21 = arith.constant 0 : index
    %18 = vector.load %arg7[%c2_19, %c0_20, %c0_21] : memref<9x384x64xbf16, #tpu.memory_space<vmem>>, vector<1x384x64xbf16>
    %19 = vector.shape_cast %18 : vector<1x384x64xbf16> to vector<384x64xbf16>
    %cst_22 = arith.constant dense<0.000000e+00> : vector<16x64xf32>
    %20 = tpu.matmul %17, %19, %cst_22 {dimension_numbers = #tpu.dot_dimension_numbers<[1], [0], [0], [1], [0, 0, 1, 1], [], []>} : vector<16x384xbf16>, vector<384x64xbf16>, vector<16x64xf32> -> vector<16x64xf32>
    %21 = arith.addf %15, %20 : vector<16x64xf32>
    %c0_23 = arith.constant 0 : index
    %c0_24 = arith.constant 0 : index
    %c0_25 = arith.constant 0 : index
    %c0_26 = arith.constant 0 : index
    %22 = vector.load %arg5[%c0_23, %c0_24, %c0_25, %c0_26] : memref<1x1x18x384xbf16, #tpu.memory_space<vmem>>, vector<1x1x16x384xbf16>
    %23 = vector.shape_cast %22 : vector<1x1x16x384xbf16> to vector<16x384xbf16>
    %c3 = arith.constant 3 : index
    %c0_27 = arith.constant 0 : index
    %c0_28 = arith.constant 0 : index
    %24 = vector.load %arg7[%c3, %c0_27, %c0_28] : memref<9x384x64xbf16, #tpu.memory_space<vmem>>, vector<1x384x64xbf16>
    %25 = vector.shape_cast %24 : vector<1x384x64xbf16> to vector<384x64xbf16>
    %cst_29 = arith.constant dense<0.000000e+00> : vector<16x64xf32>
    %26 = tpu.matmul %23, %25, %cst_29 {dimension_numbers = #tpu.dot_dimension_numbers<[1], [0], [0], [1], [0, 0, 1, 1], [], []>} : vector<16x384xbf16>, vector<384x64xbf16>, vector<16x64xf32> -> vector<16x64xf32>
    %27 = arith.addf %21, %26 : vector<16x64xf32>
    %c0_30 = arith.constant 0 : index
    %c0_31 = arith.constant 0 : index
    %c1_32 = arith.constant 1 : index
    %c0_33 = arith.constant 0 : index
    %28 = vector.load %arg5[%c0_30, %c0_31, %c1_32, %c0_33] : memref<1x1x18x384xbf16, #tpu.memory_space<vmem>>, vector<1x1x16x384xbf16>
    %29 = vector.shape_cast %28 : vector<1x1x16x384xbf16> to vector<16x384xbf16>
    %c4 = arith.constant 4 : index
    %c0_34 = arith.constant 0 : index
    %c0_35 = arith.constant 0 : index
    %30 = vector.load %arg7[%c4, %c0_34, %c0_35] : memref<9x384x64xbf16, #tpu.memory_space<vmem>>, vector<1x384x64xbf16>
    %31 = vector.shape_cast %30 : vector<1x384x64xbf16> to vector<384x64xbf16>
    %cst_36 = arith.constant dense<0.000000e+00> : vector<16x64xf32>
    %32 = tpu.matmul %29, %31, %cst_36 {dimension_numbers = #tpu.dot_dimension_numbers<[1], [0], [0], [1], [0, 0, 1, 1], [], []>} : vector<16x384xbf16>, vector<384x64xbf16>, vector<16x64xf32> -> vector<16x64xf32>
    %33 = arith.addf %27, %32 : vector<16x64xf32>
    %c0_37 = arith.constant 0 : index
    %c0_38 = arith.constant 0 : index
    %c2_39 = arith.constant 2 : index
    %c0_40 = arith.constant 0 : index
    %34 = vector.load %arg5[%c0_37, %c0_38, %c2_39, %c0_40] : memref<1x1x18x384xbf16, #tpu.memory_space<vmem>>, vector<1x1x16x384xbf16>
    %35 = vector.shape_cast %34 : vector<1x1x16x384xbf16> to vector<16x384xbf16>
    %c5 = arith.constant 5 : index
    %c0_41 = arith.constant 0 : index
    %c0_42 = arith.constant 0 : index
    %36 = vector.load %arg7[%c5, %c0_41, %c0_42] : memref<9x384x64xbf16, #tpu.memory_space<vmem>>, vector<1x384x64xbf16>
    %37 = vector.shape_cast %36 : vector<1x384x64xbf16> to vector<384x64xbf16>
    %cst_43 = arith.constant dense<0.000000e+00> : vector<16x64xf32>
    %38 = tpu.matmul %35, %37, %cst_43 {dimension_numbers = #tpu.dot_dimension_numbers<[1], [0], [0], [1], [0, 0, 1, 1], [], []>} : vector<16x384xbf16>, vector<384x64xbf16>, vector<16x64xf32> -> vector<16x64xf32>
    %39 = arith.addf %33, %38 : vector<16x64xf32>
    %c0_44 = arith.constant 0 : index
    %c0_45 = arith.constant 0 : index
    %c0_46 = arith.constant 0 : index
    %c0_47 = arith.constant 0 : index
    %40 = vector.load %arg6[%c0_44, %c0_45, %c0_46, %c0_47] : memref<1x1x18x384xbf16, #tpu.memory_space<vmem>>, vector<1x1x16x384xbf16>
    %41 = vector.shape_cast %40 : vector<1x1x16x384xbf16> to vector<16x384xbf16>
    %c6 = arith.constant 6 : index
    %c0_48 = arith.constant 0 : index
    %c0_49 = arith.constant 0 : index
    %42 = vector.load %arg7[%c6, %c0_48, %c0_49] : memref<9x384x64xbf16, #tpu.memory_space<vmem>>, vector<1x384x64xbf16>
    %43 = vector.shape_cast %42 : vector<1x384x64xbf16> to vector<384x64xbf16>
    %cst_50 = arith.constant dense<0.000000e+00> : vector<16x64xf32>
    %44 = tpu.matmul %41, %43, %cst_50 {dimension_numbers = #tpu.dot_dimension_numbers<[1], [0], [0], [1], [0, 0, 1, 1], [], []>} : vector<16x384xbf16>, vector<384x64xbf16>, vector<16x64xf32> -> vector<16x64xf32>
    %45 = arith.addf %39, %44 : vector<16x64xf32>
    %c0_51 = arith.constant 0 : index
    %c0_52 = arith.constant 0 : index
    %c1_53 = arith.constant 1 : index
    %c0_54 = arith.constant 0 : index
    %46 = vector.load %arg6[%c0_51, %c0_52, %c1_53, %c0_54] : memref<1x1x18x384xbf16, #tpu.memory_space<vmem>>, vector<1x1x16x384xbf16>
    %47 = vector.shape_cast %46 : vector<1x1x16x384xbf16> to vector<16x384xbf16>
    %c7 = arith.constant 7 : index
    %c0_55 = arith.constant 0 : index
    %c0_56 = arith.constant 0 : index
    %48 = vector.load %arg7[%c7, %c0_55, %c0_56] : memref<9x384x64xbf16, #tpu.memory_space<vmem>>, vector<1x384x64xbf16>
    %49 = vector.shape_cast %48 : vector<1x384x64xbf16> to vector<384x64xbf16>
    %cst_57 = arith.constant dense<0.000000e+00> : vector<16x64xf32>
    %50 = tpu.matmul %47, %49, %cst_57 {dimension_numbers = #tpu.dot_dimension_numbers<[1], [0], [0], [1], [0, 0, 1, 1], [], []>} : vector<16x384xbf16>, vector<384x64xbf16>, vector<16x64xf32> -> vector<16x64xf32>
    %51 = arith.addf %45, %50 : vector<16x64xf32>
    %c0_58 = arith.constant 0 : index
    %c0_59 = arith.constant 0 : index
    %c2_60 = arith.constant 2 : index
    %c0_61 = arith.constant 0 : index
    %52 = vector.load %arg6[%c0_58, %c0_59, %c2_60, %c0_61] : memref<1x1x18x384xbf16, #tpu.memory_space<vmem>>, vector<1x1x16x384xbf16>
    %53 = vector.shape_cast %52 : vector<1x1x16x384xbf16> to vector<16x384xbf16>
    %c8 = arith.constant 8 : index
    %c0_62 = arith.constant 0 : index
    %c0_63 = arith.constant 0 : index
    %54 = vector.load %arg7[%c8, %c0_62, %c0_63] : memref<9x384x64xbf16, #tpu.memory_space<vmem>>, vector<1x384x64xbf16>
    %55 = vector.shape_cast %54 : vector<1x384x64xbf16> to vector<384x64xbf16>
    %cst_64 = arith.constant dense<0.000000e+00> : vector<16x64xf32>
    %56 = tpu.matmul %53, %55, %cst_64 {dimension_numbers = #tpu.dot_dimension_numbers<[1], [0], [0], [1], [0, 0, 1, 1], [], []>} : vector<16x384xbf16>, vector<384x64xbf16>, vector<16x64xf32> -> vector<16x64xf32>
    %57 = arith.addf %51, %56 : vector<16x64xf32>
    %c0_65 = arith.constant 0 : index
    %c0_66 = arith.constant 0 : index
    %58 = vector.load %arg10[%c0_65, %c0_66] : memref<16x64xf32, #tpu.memory_space<vmem>>, vector<16x64xf32>
    tpu.vector_store %arg10[%c0_65, %c0_66], %57 {strides = array<i32>} : memref<16x64xf32, #tpu.memory_space<vmem>>, vector<16x64xf32>,
    %c0_i32_67 = arith.constant 0 : i32
    %59 = arith.cmpi eq, %arg3, %c0_i32_67 : i32
    %60 = arith.extui %59 : i1 to i32
    %c0_i32_68 = arith.constant 0 : i32
    %61 = arith.cmpi ne, %60, %c0_i32_68 : i32
    scf.if %61 {
      %cst_69 = arith.constant 0.000000e+00 : f32
      %62 = vector.broadcast %cst_69 : f32 to vector<16x64xf32>
      %63 = arith.cmpf ogt, %57, %62 : vector<16x64xf32>
      %cst_70 = arith.constant 0.000000e+00 : f32
      %64 = vector.broadcast %cst_70 : f32 to vector<16x64xf32>
      %65 = arith.minimumf %57, %64 : vector<16x64xf32>
      %66 = math.exp %65 : vector<16x64xf32>
      %cst_71 = arith.constant 1.000000e+00 : f32
      %67 = vector.broadcast %cst_71 : f32 to vector<16x64xf32>
      %68 = arith.subf %66, %67 : vector<16x64xf32>
      %69 = arith.select %63, %57, %68 : vector<16x64xi1>, vector<16x64xf32>
      %70 = arith.truncf %69 : vector<16x64xf32> to vector<16x64xbf16>
      %c0_72 = arith.constant 0 : index
      %c0_73 = arith.constant 0 : index
      %c0_74 = arith.constant 0 : index
      %c0_75 = arith.constant 0 : index
      %71 = vector.load %arg9[%c0_72, %c0_73, %c0_74, %c0_75] : memref<1x1x16x64xbf16, #tpu.memory_space<vmem>>, vector<1x1x16x64xbf16>
      %72 = vector.shape_cast %71 : vector<1x1x16x64xbf16> to vector<16x64xbf16>
      %73 = vector.shape_cast %70 : vector<16x64xbf16> to vector<1x1x16x64xbf16>
      tpu.vector_store %arg9[%c0_72, %c0_73, %c0_74, %c0_75], %73 {strides = array<i32>} : memref<1x1x16x64xbf16, #tpu.memory_space<vmem>>, vector<1x1x16x64xbf16>,
    } else {
    }
    return
  }
  func.func @transform_0(%arg0: i32, %arg1: i32, %arg2: i32, %arg3: i32) -> (i32, i32, i32, i32) {
    %c0_i32 = arith.constant 0 : i32
    %0 = arith.addi %arg2, %c0_i32 : i32
    %c0_i32_0 = arith.constant 0 : i32
    %c0_i32_1 = arith.constant 0 : i32
    return %arg0, %0, %c0_i32_0, %arg3 : i32, i32, i32, i32
  }
  func.func @transform_1(%arg0: i32, %arg1: i32, %arg2: i32, %arg3: i32) -> (i32, i32, i32, i32) {
    %c1_i32 = arith.constant 1 : i32
    %0 = arith.addi %arg2, %c1_i32 : i32
    %c0_i32 = arith.constant 0 : i32
    %c0_i32_0 = arith.constant 0 : i32
    return %arg0, %0, %c0_i32, %arg3 : i32, i32, i32, i32
  }
  func.func @transform_2(%arg0: i32, %arg1: i32, %arg2: i32, %arg3: i32) -> (i32, i32, i32, i32) {
    %c2_i32 = arith.constant 2 : i32
    %0 = arith.addi %arg2, %c2_i32 : i32
    %c0_i32 = arith.constant 0 : i32
    %c0_i32_0 = arith.constant 0 : i32
    return %arg0, %0, %c0_i32, %arg3 : i32, i32, i32, i32
  }
  func.func @transform_3(%arg0: i32, %arg1: i32, %arg2: i32, %arg3: i32) -> (i32, i32, i32) {
    %c0_i32 = arith.constant 0 : i32
    %c0_i32_0 = arith.constant 0 : i32
    return %c0_i32, %arg3, %arg1 : i32, i32, i32
  }
  func.func @transform_4(%arg0: i32, %arg1: i32, %arg2: i32, %arg3: i32) -> (i32, i32) {
    %c0_i32 = arith.constant 0 : i32
    %c0_i32_0 = arith.constant 0 : i32
    return %c0_i32, %arg1 : i32, i32
  }
  func.func @transform_5(%arg0: i32, %arg1: i32, %arg2: i32, %arg3: i32) -> (i32, i32, i32, i32) {
    %c0_i32 = arith.constant 0 : i32
    %c0_i32_0 = arith.constant 0 : i32
    return %arg0, %arg2, %c0_i32, %arg1 : i32, i32, i32, i32
  }
}

module attributes {stable_mosaic.version = 11 : i64} {
  func.func @_conv3_kernel(%arg0: i32, %arg1: i32, %arg2: i32, %arg3: i32, %arg4: memref<1x1x34x128xbf16, #tpu.memory_space<vmem>>, %arg5: memref<1x1x34x128xbf16, #tpu.memory_space<vmem>>, %arg6: memref<1x1x34x128xbf16, #tpu.memory_space<vmem>>, %arg7: memref<9x128x32xbf16, #tpu.memory_space<vmem>>, %arg8: memref<1x32xf32, #tpu.memory_space<vmem>>, %arg9: memref<1x1x32x32xbf16, #tpu.memory_space<vmem>>, %arg10: memref<32x32xf32, #tpu.memory_space<vmem>>) attributes {dimension_semantics = [#tpu.dimension_semantics<parallel>, #tpu.dimension_semantics<parallel>, #tpu.dimension_semantics<parallel>, #tpu.dimension_semantics<arbitrary>], iteration_bounds = array<i64: 1, 1, 32, 1>, scalar_prefetch = 0 : i64, scratch_operands = 1 : i64, tpu.core_type = #tpu.core_type<tc>, window_params = [{transform_indices = @transform_0, window_bounds = array<i64: 1, 1, 34, 128>}, {transform_indices = @transform_1, window_bounds = array<i64: 1, 1, 34, 128>}, {transform_indices = @transform_2, window_bounds = array<i64: 1, 1, 34, 128>}, {transform_indices = @transform_3, window_bounds = array<i64: 9, 128, 32>}, {transform_indices = @transform_4, window_bounds = array<i64: 1, 32>}, {transform_indices = @transform_5, window_bounds = array<i64: 1, 1, 32, 32>}]} {
    %c0_i32 = arith.constant 0 : i32
    %0 = arith.cmpi eq, %arg3, %c0_i32 : i32
    %1 = arith.extui %0 : i1 to i32
    %c0_i32_0 = arith.constant 0 : i32
    %2 = arith.cmpi ne, %1, %c0_i32_0 : i32
    scf.if %2 {
      %cst_69 = arith.constant 0.000000e+00 : f32
      %62 = vector.broadcast %cst_69 : f32 to vector<32x32xf32>
      %c0_70 = arith.constant 0 : index
      %c0_71 = arith.constant 0 : index
      %63 = vector.load %arg8[%c0_70, %c0_71] : memref<1x32xf32, #tpu.memory_space<vmem>>, vector<1x32xf32>
      %64 = vector.broadcast %63 : vector<1x32xf32> to vector<32x32xf32>
      %65 = arith.addf %62, %64 : vector<32x32xf32>
      %c0_72 = arith.constant 0 : index
      %c0_73 = arith.constant 0 : index
      %66 = vector.load %arg10[%c0_72, %c0_73] : memref<32x32xf32, #tpu.memory_space<vmem>>, vector<32x32xf32>
      tpu.vector_store %arg10[%c0_72, %c0_73], %65 {strides = array<i32>} : memref<32x32xf32, #tpu.memory_space<vmem>>, vector<32x32xf32>,
    } else {
    }
    %c0 = arith.constant 0 : index
    %c0_1 = arith.constant 0 : index
    %3 = vector.load %arg10[%c0, %c0_1] : memref<32x32xf32, #tpu.memory_space<vmem>>, vector<32x32xf32>
    %c0_2 = arith.constant 0 : index
    %c0_3 = arith.constant 0 : index
    %c0_4 = arith.constant 0 : index
    %c0_5 = arith.constant 0 : index
    %4 = vector.load %arg4[%c0_2, %c0_3, %c0_4, %c0_5] : memref<1x1x34x128xbf16, #tpu.memory_space<vmem>>, vector<1x1x32x128xbf16>
    %5 = vector.shape_cast %4 : vector<1x1x32x128xbf16> to vector<32x128xbf16>
    %c0_6 = arith.constant 0 : index
    %c0_7 = arith.constant 0 : index
    %c0_8 = arith.constant 0 : index
    %6 = vector.load %arg7[%c0_6, %c0_7, %c0_8] : memref<9x128x32xbf16, #tpu.memory_space<vmem>>, vector<1x128x32xbf16>
    %7 = vector.shape_cast %6 : vector<1x128x32xbf16> to vector<128x32xbf16>
    %cst = arith.constant dense<0.000000e+00> : vector<32x32xf32>
    %8 = tpu.matmul %5, %7, %cst {dimension_numbers = #tpu.dot_dimension_numbers<[1], [0], [0], [1], [0, 0, 1, 1], [], []>} : vector<32x128xbf16>, vector<128x32xbf16>, vector<32x32xf32> -> vector<32x32xf32>
    %9 = arith.addf %3, %8 : vector<32x32xf32>
    %c0_9 = arith.constant 0 : index
    %c0_10 = arith.constant 0 : index
    %c1 = arith.constant 1 : index
    %c0_11 = arith.constant 0 : index
    %10 = vector.load %arg4[%c0_9, %c0_10, %c1, %c0_11] : memref<1x1x34x128xbf16, #tpu.memory_space<vmem>>, vector<1x1x32x128xbf16>
    %11 = vector.shape_cast %10 : vector<1x1x32x128xbf16> to vector<32x128xbf16>
    %c1_12 = arith.constant 1 : index
    %c0_13 = arith.constant 0 : index
    %c0_14 = arith.constant 0 : index
    %12 = vector.load %arg7[%c1_12, %c0_13, %c0_14] : memref<9x128x32xbf16, #tpu.memory_space<vmem>>, vector<1x128x32xbf16>
    %13 = vector.shape_cast %12 : vector<1x128x32xbf16> to vector<128x32xbf16>
    %cst_15 = arith.constant dense<0.000000e+00> : vector<32x32xf32>
    %14 = tpu.matmul %11, %13, %cst_15 {dimension_numbers = #tpu.dot_dimension_numbers<[1], [0], [0], [1], [0, 0, 1, 1], [], []>} : vector<32x128xbf16>, vector<128x32xbf16>, vector<32x32xf32> -> vector<32x32xf32>
    %15 = arith.addf %9, %14 : vector<32x32xf32>
    %c0_16 = arith.constant 0 : index
    %c0_17 = arith.constant 0 : index
    %c2 = arith.constant 2 : index
    %c0_18 = arith.constant 0 : index
    %16 = vector.load %arg4[%c0_16, %c0_17, %c2, %c0_18] : memref<1x1x34x128xbf16, #tpu.memory_space<vmem>>, vector<1x1x32x128xbf16>
    %17 = vector.shape_cast %16 : vector<1x1x32x128xbf16> to vector<32x128xbf16>
    %c2_19 = arith.constant 2 : index
    %c0_20 = arith.constant 0 : index
    %c0_21 = arith.constant 0 : index
    %18 = vector.load %arg7[%c2_19, %c0_20, %c0_21] : memref<9x128x32xbf16, #tpu.memory_space<vmem>>, vector<1x128x32xbf16>
    %19 = vector.shape_cast %18 : vector<1x128x32xbf16> to vector<128x32xbf16>
    %cst_22 = arith.constant dense<0.000000e+00> : vector<32x32xf32>
    %20 = tpu.matmul %17, %19, %cst_22 {dimension_numbers = #tpu.dot_dimension_numbers<[1], [0], [0], [1], [0, 0, 1, 1], [], []>} : vector<32x128xbf16>, vector<128x32xbf16>, vector<32x32xf32> -> vector<32x32xf32>
    %21 = arith.addf %15, %20 : vector<32x32xf32>
    %c0_23 = arith.constant 0 : index
    %c0_24 = arith.constant 0 : index
    %c0_25 = arith.constant 0 : index
    %c0_26 = arith.constant 0 : index
    %22 = vector.load %arg5[%c0_23, %c0_24, %c0_25, %c0_26] : memref<1x1x34x128xbf16, #tpu.memory_space<vmem>>, vector<1x1x32x128xbf16>
    %23 = vector.shape_cast %22 : vector<1x1x32x128xbf16> to vector<32x128xbf16>
    %c3 = arith.constant 3 : index
    %c0_27 = arith.constant 0 : index
    %c0_28 = arith.constant 0 : index
    %24 = vector.load %arg7[%c3, %c0_27, %c0_28] : memref<9x128x32xbf16, #tpu.memory_space<vmem>>, vector<1x128x32xbf16>
    %25 = vector.shape_cast %24 : vector<1x128x32xbf16> to vector<128x32xbf16>
    %cst_29 = arith.constant dense<0.000000e+00> : vector<32x32xf32>
    %26 = tpu.matmul %23, %25, %cst_29 {dimension_numbers = #tpu.dot_dimension_numbers<[1], [0], [0], [1], [0, 0, 1, 1], [], []>} : vector<32x128xbf16>, vector<128x32xbf16>, vector<32x32xf32> -> vector<32x32xf32>
    %27 = arith.addf %21, %26 : vector<32x32xf32>
    %c0_30 = arith.constant 0 : index
    %c0_31 = arith.constant 0 : index
    %c1_32 = arith.constant 1 : index
    %c0_33 = arith.constant 0 : index
    %28 = vector.load %arg5[%c0_30, %c0_31, %c1_32, %c0_33] : memref<1x1x34x128xbf16, #tpu.memory_space<vmem>>, vector<1x1x32x128xbf16>
    %29 = vector.shape_cast %28 : vector<1x1x32x128xbf16> to vector<32x128xbf16>
    %c4 = arith.constant 4 : index
    %c0_34 = arith.constant 0 : index
    %c0_35 = arith.constant 0 : index
    %30 = vector.load %arg7[%c4, %c0_34, %c0_35] : memref<9x128x32xbf16, #tpu.memory_space<vmem>>, vector<1x128x32xbf16>
    %31 = vector.shape_cast %30 : vector<1x128x32xbf16> to vector<128x32xbf16>
    %cst_36 = arith.constant dense<0.000000e+00> : vector<32x32xf32>
    %32 = tpu.matmul %29, %31, %cst_36 {dimension_numbers = #tpu.dot_dimension_numbers<[1], [0], [0], [1], [0, 0, 1, 1], [], []>} : vector<32x128xbf16>, vector<128x32xbf16>, vector<32x32xf32> -> vector<32x32xf32>
    %33 = arith.addf %27, %32 : vector<32x32xf32>
    %c0_37 = arith.constant 0 : index
    %c0_38 = arith.constant 0 : index
    %c2_39 = arith.constant 2 : index
    %c0_40 = arith.constant 0 : index
    %34 = vector.load %arg5[%c0_37, %c0_38, %c2_39, %c0_40] : memref<1x1x34x128xbf16, #tpu.memory_space<vmem>>, vector<1x1x32x128xbf16>
    %35 = vector.shape_cast %34 : vector<1x1x32x128xbf16> to vector<32x128xbf16>
    %c5 = arith.constant 5 : index
    %c0_41 = arith.constant 0 : index
    %c0_42 = arith.constant 0 : index
    %36 = vector.load %arg7[%c5, %c0_41, %c0_42] : memref<9x128x32xbf16, #tpu.memory_space<vmem>>, vector<1x128x32xbf16>
    %37 = vector.shape_cast %36 : vector<1x128x32xbf16> to vector<128x32xbf16>
    %cst_43 = arith.constant dense<0.000000e+00> : vector<32x32xf32>
    %38 = tpu.matmul %35, %37, %cst_43 {dimension_numbers = #tpu.dot_dimension_numbers<[1], [0], [0], [1], [0, 0, 1, 1], [], []>} : vector<32x128xbf16>, vector<128x32xbf16>, vector<32x32xf32> -> vector<32x32xf32>
    %39 = arith.addf %33, %38 : vector<32x32xf32>
    %c0_44 = arith.constant 0 : index
    %c0_45 = arith.constant 0 : index
    %c0_46 = arith.constant 0 : index
    %c0_47 = arith.constant 0 : index
    %40 = vector.load %arg6[%c0_44, %c0_45, %c0_46, %c0_47] : memref<1x1x34x128xbf16, #tpu.memory_space<vmem>>, vector<1x1x32x128xbf16>
    %41 = vector.shape_cast %40 : vector<1x1x32x128xbf16> to vector<32x128xbf16>
    %c6 = arith.constant 6 : index
    %c0_48 = arith.constant 0 : index
    %c0_49 = arith.constant 0 : index
    %42 = vector.load %arg7[%c6, %c0_48, %c0_49] : memref<9x128x32xbf16, #tpu.memory_space<vmem>>, vector<1x128x32xbf16>
    %43 = vector.shape_cast %42 : vector<1x128x32xbf16> to vector<128x32xbf16>
    %cst_50 = arith.constant dense<0.000000e+00> : vector<32x32xf32>
    %44 = tpu.matmul %41, %43, %cst_50 {dimension_numbers = #tpu.dot_dimension_numbers<[1], [0], [0], [1], [0, 0, 1, 1], [], []>} : vector<32x128xbf16>, vector<128x32xbf16>, vector<32x32xf32> -> vector<32x32xf32>
    %45 = arith.addf %39, %44 : vector<32x32xf32>
    %c0_51 = arith.constant 0 : index
    %c0_52 = arith.constant 0 : index
    %c1_53 = arith.constant 1 : index
    %c0_54 = arith.constant 0 : index
    %46 = vector.load %arg6[%c0_51, %c0_52, %c1_53, %c0_54] : memref<1x1x34x128xbf16, #tpu.memory_space<vmem>>, vector<1x1x32x128xbf16>
    %47 = vector.shape_cast %46 : vector<1x1x32x128xbf16> to vector<32x128xbf16>
    %c7 = arith.constant 7 : index
    %c0_55 = arith.constant 0 : index
    %c0_56 = arith.constant 0 : index
    %48 = vector.load %arg7[%c7, %c0_55, %c0_56] : memref<9x128x32xbf16, #tpu.memory_space<vmem>>, vector<1x128x32xbf16>
    %49 = vector.shape_cast %48 : vector<1x128x32xbf16> to vector<128x32xbf16>
    %cst_57 = arith.constant dense<0.000000e+00> : vector<32x32xf32>
    %50 = tpu.matmul %47, %49, %cst_57 {dimension_numbers = #tpu.dot_dimension_numbers<[1], [0], [0], [1], [0, 0, 1, 1], [], []>} : vector<32x128xbf16>, vector<128x32xbf16>, vector<32x32xf32> -> vector<32x32xf32>
    %51 = arith.addf %45, %50 : vector<32x32xf32>
    %c0_58 = arith.constant 0 : index
    %c0_59 = arith.constant 0 : index
    %c2_60 = arith.constant 2 : index
    %c0_61 = arith.constant 0 : index
    %52 = vector.load %arg6[%c0_58, %c0_59, %c2_60, %c0_61] : memref<1x1x34x128xbf16, #tpu.memory_space<vmem>>, vector<1x1x32x128xbf16>
    %53 = vector.shape_cast %52 : vector<1x1x32x128xbf16> to vector<32x128xbf16>
    %c8 = arith.constant 8 : index
    %c0_62 = arith.constant 0 : index
    %c0_63 = arith.constant 0 : index
    %54 = vector.load %arg7[%c8, %c0_62, %c0_63] : memref<9x128x32xbf16, #tpu.memory_space<vmem>>, vector<1x128x32xbf16>
    %55 = vector.shape_cast %54 : vector<1x128x32xbf16> to vector<128x32xbf16>
    %cst_64 = arith.constant dense<0.000000e+00> : vector<32x32xf32>
    %56 = tpu.matmul %53, %55, %cst_64 {dimension_numbers = #tpu.dot_dimension_numbers<[1], [0], [0], [1], [0, 0, 1, 1], [], []>} : vector<32x128xbf16>, vector<128x32xbf16>, vector<32x32xf32> -> vector<32x32xf32>
    %57 = arith.addf %51, %56 : vector<32x32xf32>
    %c0_65 = arith.constant 0 : index
    %c0_66 = arith.constant 0 : index
    %58 = vector.load %arg10[%c0_65, %c0_66] : memref<32x32xf32, #tpu.memory_space<vmem>>, vector<32x32xf32>
    tpu.vector_store %arg10[%c0_65, %c0_66], %57 {strides = array<i32>} : memref<32x32xf32, #tpu.memory_space<vmem>>, vector<32x32xf32>,
    %c0_i32_67 = arith.constant 0 : i32
    %59 = arith.cmpi eq, %arg3, %c0_i32_67 : i32
    %60 = arith.extui %59 : i1 to i32
    %c0_i32_68 = arith.constant 0 : i32
    %61 = arith.cmpi ne, %60, %c0_i32_68 : i32
    scf.if %61 {
      %cst_69 = arith.constant 0.000000e+00 : f32
      %62 = vector.broadcast %cst_69 : f32 to vector<32x32xf32>
      %63 = arith.cmpf ogt, %57, %62 : vector<32x32xf32>
      %cst_70 = arith.constant 0.000000e+00 : f32
      %64 = vector.broadcast %cst_70 : f32 to vector<32x32xf32>
      %65 = arith.minimumf %57, %64 : vector<32x32xf32>
      %66 = math.exp %65 : vector<32x32xf32>
      %cst_71 = arith.constant 1.000000e+00 : f32
      %67 = vector.broadcast %cst_71 : f32 to vector<32x32xf32>
      %68 = arith.subf %66, %67 : vector<32x32xf32>
      %69 = arith.select %63, %57, %68 : vector<32x32xi1>, vector<32x32xf32>
      %70 = arith.truncf %69 : vector<32x32xf32> to vector<32x32xbf16>
      %c0_72 = arith.constant 0 : index
      %c0_73 = arith.constant 0 : index
      %c0_74 = arith.constant 0 : index
      %c0_75 = arith.constant 0 : index
      %71 = vector.load %arg9[%c0_72, %c0_73, %c0_74, %c0_75] : memref<1x1x32x32xbf16, #tpu.memory_space<vmem>>, vector<1x1x32x32xbf16>
      %72 = vector.shape_cast %71 : vector<1x1x32x32xbf16> to vector<32x32xbf16>
      %73 = vector.shape_cast %70 : vector<32x32xbf16> to vector<1x1x32x32xbf16>
      tpu.vector_store %arg9[%c0_72, %c0_73, %c0_74, %c0_75], %73 {strides = array<i32>} : memref<1x1x32x32xbf16, #tpu.memory_space<vmem>>, vector<1x1x32x32xbf16>,
    } else {
    }
    return
  }
  func.func @transform_0(%arg0: i32, %arg1: i32, %arg2: i32, %arg3: i32) -> (i32, i32, i32, i32) {
    %c0_i32 = arith.constant 0 : i32
    %0 = arith.addi %arg2, %c0_i32 : i32
    %c0_i32_0 = arith.constant 0 : i32
    %c0_i32_1 = arith.constant 0 : i32
    return %arg0, %0, %c0_i32_0, %arg3 : i32, i32, i32, i32
  }
  func.func @transform_1(%arg0: i32, %arg1: i32, %arg2: i32, %arg3: i32) -> (i32, i32, i32, i32) {
    %c1_i32 = arith.constant 1 : i32
    %0 = arith.addi %arg2, %c1_i32 : i32
    %c0_i32 = arith.constant 0 : i32
    %c0_i32_0 = arith.constant 0 : i32
    return %arg0, %0, %c0_i32, %arg3 : i32, i32, i32, i32
  }
  func.func @transform_2(%arg0: i32, %arg1: i32, %arg2: i32, %arg3: i32) -> (i32, i32, i32, i32) {
    %c2_i32 = arith.constant 2 : i32
    %0 = arith.addi %arg2, %c2_i32 : i32
    %c0_i32 = arith.constant 0 : i32
    %c0_i32_0 = arith.constant 0 : i32
    return %arg0, %0, %c0_i32, %arg3 : i32, i32, i32, i32
  }
  func.func @transform_3(%arg0: i32, %arg1: i32, %arg2: i32, %arg3: i32) -> (i32, i32, i32) {
    %c0_i32 = arith.constant 0 : i32
    %c0_i32_0 = arith.constant 0 : i32
    return %c0_i32, %arg3, %arg1 : i32, i32, i32
  }
  func.func @transform_4(%arg0: i32, %arg1: i32, %arg2: i32, %arg3: i32) -> (i32, i32) {
    %c0_i32 = arith.constant 0 : i32
    %c0_i32_0 = arith.constant 0 : i32
    return %c0_i32, %arg1 : i32, i32
  }
  func.func @transform_5(%arg0: i32, %arg1: i32, %arg2: i32, %arg3: i32) -> (i32, i32, i32, i32) {
    %c0_i32 = arith.constant 0 : i32
    %c0_i32_0 = arith.constant 0 : i32
    return %arg0, %arg2, %c0_i32, %arg1 : i32, i32, i32, i32
  }
}

module attributes {stable_mosaic.version = 11 : i64} {
  func.func @_conv3_kernel(%arg0: i32, %arg1: i32, %arg2: i32, %arg3: i32, %arg4: memref<1x1x66x96xbf16, #tpu.memory_space<vmem>>, %arg5: memref<1x1x66x96xbf16, #tpu.memory_space<vmem>>, %arg6: memref<1x1x66x96xbf16, #tpu.memory_space<vmem>>, %arg7: memref<9x96x32xbf16, #tpu.memory_space<vmem>>, %arg8: memref<1x32xf32, #tpu.memory_space<vmem>>, %arg9: memref<1x1x64x32xbf16, #tpu.memory_space<vmem>>, %arg10: memref<64x32xf32, #tpu.memory_space<vmem>>) attributes {dimension_semantics = [#tpu.dimension_semantics<parallel>, #tpu.dimension_semantics<parallel>, #tpu.dimension_semantics<parallel>, #tpu.dimension_semantics<arbitrary>], iteration_bounds = array<i64: 1, 1, 64, 1>, scalar_prefetch = 0 : i64, scratch_operands = 1 : i64, tpu.core_type = #tpu.core_type<tc>, window_params = [{transform_indices = @transform_0, window_bounds = array<i64: 1, 1, 66, 96>}, {transform_indices = @transform_1, window_bounds = array<i64: 1, 1, 66, 96>}, {transform_indices = @transform_2, window_bounds = array<i64: 1, 1, 66, 96>}, {transform_indices = @transform_3, window_bounds = array<i64: 9, 96, 32>}, {transform_indices = @transform_4, window_bounds = array<i64: 1, 32>}, {transform_indices = @transform_5, window_bounds = array<i64: 1, 1, 64, 32>}]} {
    %c0_i32 = arith.constant 0 : i32
    %0 = arith.cmpi eq, %arg3, %c0_i32 : i32
    %1 = arith.extui %0 : i1 to i32
    %c0_i32_0 = arith.constant 0 : i32
    %2 = arith.cmpi ne, %1, %c0_i32_0 : i32
    scf.if %2 {
      %cst_69 = arith.constant 0.000000e+00 : f32
      %62 = vector.broadcast %cst_69 : f32 to vector<64x32xf32>
      %c0_70 = arith.constant 0 : index
      %c0_71 = arith.constant 0 : index
      %63 = vector.load %arg8[%c0_70, %c0_71] : memref<1x32xf32, #tpu.memory_space<vmem>>, vector<1x32xf32>
      %64 = vector.broadcast %63 : vector<1x32xf32> to vector<64x32xf32>
      %65 = arith.addf %62, %64 : vector<64x32xf32>
      %c0_72 = arith.constant 0 : index
      %c0_73 = arith.constant 0 : index
      %66 = vector.load %arg10[%c0_72, %c0_73] : memref<64x32xf32, #tpu.memory_space<vmem>>, vector<64x32xf32>
      tpu.vector_store %arg10[%c0_72, %c0_73], %65 {strides = array<i32>} : memref<64x32xf32, #tpu.memory_space<vmem>>, vector<64x32xf32>,
    } else {
    }
    %c0 = arith.constant 0 : index
    %c0_1 = arith.constant 0 : index
    %3 = vector.load %arg10[%c0, %c0_1] : memref<64x32xf32, #tpu.memory_space<vmem>>, vector<64x32xf32>
    %c0_2 = arith.constant 0 : index
    %c0_3 = arith.constant 0 : index
    %c0_4 = arith.constant 0 : index
    %c0_5 = arith.constant 0 : index
    %4 = vector.load %arg4[%c0_2, %c0_3, %c0_4, %c0_5] : memref<1x1x66x96xbf16, #tpu.memory_space<vmem>>, vector<1x1x64x96xbf16>
    %5 = vector.shape_cast %4 : vector<1x1x64x96xbf16> to vector<64x96xbf16>
    %c0_6 = arith.constant 0 : index
    %c0_7 = arith.constant 0 : index
    %c0_8 = arith.constant 0 : index
    %6 = vector.load %arg7[%c0_6, %c0_7, %c0_8] : memref<9x96x32xbf16, #tpu.memory_space<vmem>>, vector<1x96x32xbf16>
    %7 = vector.shape_cast %6 : vector<1x96x32xbf16> to vector<96x32xbf16>
    %cst = arith.constant dense<0.000000e+00> : vector<64x32xf32>
    %8 = tpu.matmul %5, %7, %cst {dimension_numbers = #tpu.dot_dimension_numbers<[1], [0], [0], [1], [0, 0, 1, 1], [], []>} : vector<64x96xbf16>, vector<96x32xbf16>, vector<64x32xf32> -> vector<64x32xf32>
    %9 = arith.addf %3, %8 : vector<64x32xf32>
    %c0_9 = arith.constant 0 : index
    %c0_10 = arith.constant 0 : index
    %c1 = arith.constant 1 : index
    %c0_11 = arith.constant 0 : index
    %10 = vector.load %arg4[%c0_9, %c0_10, %c1, %c0_11] : memref<1x1x66x96xbf16, #tpu.memory_space<vmem>>, vector<1x1x64x96xbf16>
    %11 = vector.shape_cast %10 : vector<1x1x64x96xbf16> to vector<64x96xbf16>
    %c1_12 = arith.constant 1 : index
    %c0_13 = arith.constant 0 : index
    %c0_14 = arith.constant 0 : index
    %12 = vector.load %arg7[%c1_12, %c0_13, %c0_14] : memref<9x96x32xbf16, #tpu.memory_space<vmem>>, vector<1x96x32xbf16>
    %13 = vector.shape_cast %12 : vector<1x96x32xbf16> to vector<96x32xbf16>
    %cst_15 = arith.constant dense<0.000000e+00> : vector<64x32xf32>
    %14 = tpu.matmul %11, %13, %cst_15 {dimension_numbers = #tpu.dot_dimension_numbers<[1], [0], [0], [1], [0, 0, 1, 1], [], []>} : vector<64x96xbf16>, vector<96x32xbf16>, vector<64x32xf32> -> vector<64x32xf32>
    %15 = arith.addf %9, %14 : vector<64x32xf32>
    %c0_16 = arith.constant 0 : index
    %c0_17 = arith.constant 0 : index
    %c2 = arith.constant 2 : index
    %c0_18 = arith.constant 0 : index
    %16 = vector.load %arg4[%c0_16, %c0_17, %c2, %c0_18] : memref<1x1x66x96xbf16, #tpu.memory_space<vmem>>, vector<1x1x64x96xbf16>
    %17 = vector.shape_cast %16 : vector<1x1x64x96xbf16> to vector<64x96xbf16>
    %c2_19 = arith.constant 2 : index
    %c0_20 = arith.constant 0 : index
    %c0_21 = arith.constant 0 : index
    %18 = vector.load %arg7[%c2_19, %c0_20, %c0_21] : memref<9x96x32xbf16, #tpu.memory_space<vmem>>, vector<1x96x32xbf16>
    %19 = vector.shape_cast %18 : vector<1x96x32xbf16> to vector<96x32xbf16>
    %cst_22 = arith.constant dense<0.000000e+00> : vector<64x32xf32>
    %20 = tpu.matmul %17, %19, %cst_22 {dimension_numbers = #tpu.dot_dimension_numbers<[1], [0], [0], [1], [0, 0, 1, 1], [], []>} : vector<64x96xbf16>, vector<96x32xbf16>, vector<64x32xf32> -> vector<64x32xf32>
    %21 = arith.addf %15, %20 : vector<64x32xf32>
    %c0_23 = arith.constant 0 : index
    %c0_24 = arith.constant 0 : index
    %c0_25 = arith.constant 0 : index
    %c0_26 = arith.constant 0 : index
    %22 = vector.load %arg5[%c0_23, %c0_24, %c0_25, %c0_26] : memref<1x1x66x96xbf16, #tpu.memory_space<vmem>>, vector<1x1x64x96xbf16>
    %23 = vector.shape_cast %22 : vector<1x1x64x96xbf16> to vector<64x96xbf16>
    %c3 = arith.constant 3 : index
    %c0_27 = arith.constant 0 : index
    %c0_28 = arith.constant 0 : index
    %24 = vector.load %arg7[%c3, %c0_27, %c0_28] : memref<9x96x32xbf16, #tpu.memory_space<vmem>>, vector<1x96x32xbf16>
    %25 = vector.shape_cast %24 : vector<1x96x32xbf16> to vector<96x32xbf16>
    %cst_29 = arith.constant dense<0.000000e+00> : vector<64x32xf32>
    %26 = tpu.matmul %23, %25, %cst_29 {dimension_numbers = #tpu.dot_dimension_numbers<[1], [0], [0], [1], [0, 0, 1, 1], [], []>} : vector<64x96xbf16>, vector<96x32xbf16>, vector<64x32xf32> -> vector<64x32xf32>
    %27 = arith.addf %21, %26 : vector<64x32xf32>
    %c0_30 = arith.constant 0 : index
    %c0_31 = arith.constant 0 : index
    %c1_32 = arith.constant 1 : index
    %c0_33 = arith.constant 0 : index
    %28 = vector.load %arg5[%c0_30, %c0_31, %c1_32, %c0_33] : memref<1x1x66x96xbf16, #tpu.memory_space<vmem>>, vector<1x1x64x96xbf16>
    %29 = vector.shape_cast %28 : vector<1x1x64x96xbf16> to vector<64x96xbf16>
    %c4 = arith.constant 4 : index
    %c0_34 = arith.constant 0 : index
    %c0_35 = arith.constant 0 : index
    %30 = vector.load %arg7[%c4, %c0_34, %c0_35] : memref<9x96x32xbf16, #tpu.memory_space<vmem>>, vector<1x96x32xbf16>
    %31 = vector.shape_cast %30 : vector<1x96x32xbf16> to vector<96x32xbf16>
    %cst_36 = arith.constant dense<0.000000e+00> : vector<64x32xf32>
    %32 = tpu.matmul %29, %31, %cst_36 {dimension_numbers = #tpu.dot_dimension_numbers<[1], [0], [0], [1], [0, 0, 1, 1], [], []>} : vector<64x96xbf16>, vector<96x32xbf16>, vector<64x32xf32> -> vector<64x32xf32>
    %33 = arith.addf %27, %32 : vector<64x32xf32>
    %c0_37 = arith.constant 0 : index
    %c0_38 = arith.constant 0 : index
    %c2_39 = arith.constant 2 : index
    %c0_40 = arith.constant 0 : index
    %34 = vector.load %arg5[%c0_37, %c0_38, %c2_39, %c0_40] : memref<1x1x66x96xbf16, #tpu.memory_space<vmem>>, vector<1x1x64x96xbf16>
    %35 = vector.shape_cast %34 : vector<1x1x64x96xbf16> to vector<64x96xbf16>
    %c5 = arith.constant 5 : index
    %c0_41 = arith.constant 0 : index
    %c0_42 = arith.constant 0 : index
    %36 = vector.load %arg7[%c5, %c0_41, %c0_42] : memref<9x96x32xbf16, #tpu.memory_space<vmem>>, vector<1x96x32xbf16>
    %37 = vector.shape_cast %36 : vector<1x96x32xbf16> to vector<96x32xbf16>
    %cst_43 = arith.constant dense<0.000000e+00> : vector<64x32xf32>
    %38 = tpu.matmul %35, %37, %cst_43 {dimension_numbers = #tpu.dot_dimension_numbers<[1], [0], [0], [1], [0, 0, 1, 1], [], []>} : vector<64x96xbf16>, vector<96x32xbf16>, vector<64x32xf32> -> vector<64x32xf32>
    %39 = arith.addf %33, %38 : vector<64x32xf32>
    %c0_44 = arith.constant 0 : index
    %c0_45 = arith.constant 0 : index
    %c0_46 = arith.constant 0 : index
    %c0_47 = arith.constant 0 : index
    %40 = vector.load %arg6[%c0_44, %c0_45, %c0_46, %c0_47] : memref<1x1x66x96xbf16, #tpu.memory_space<vmem>>, vector<1x1x64x96xbf16>
    %41 = vector.shape_cast %40 : vector<1x1x64x96xbf16> to vector<64x96xbf16>
    %c6 = arith.constant 6 : index
    %c0_48 = arith.constant 0 : index
    %c0_49 = arith.constant 0 : index
    %42 = vector.load %arg7[%c6, %c0_48, %c0_49] : memref<9x96x32xbf16, #tpu.memory_space<vmem>>, vector<1x96x32xbf16>
    %43 = vector.shape_cast %42 : vector<1x96x32xbf16> to vector<96x32xbf16>
    %cst_50 = arith.constant dense<0.000000e+00> : vector<64x32xf32>
    %44 = tpu.matmul %41, %43, %cst_50 {dimension_numbers = #tpu.dot_dimension_numbers<[1], [0], [0], [1], [0, 0, 1, 1], [], []>} : vector<64x96xbf16>, vector<96x32xbf16>, vector<64x32xf32> -> vector<64x32xf32>
    %45 = arith.addf %39, %44 : vector<64x32xf32>
    %c0_51 = arith.constant 0 : index
    %c0_52 = arith.constant 0 : index
    %c1_53 = arith.constant 1 : index
    %c0_54 = arith.constant 0 : index
    %46 = vector.load %arg6[%c0_51, %c0_52, %c1_53, %c0_54] : memref<1x1x66x96xbf16, #tpu.memory_space<vmem>>, vector<1x1x64x96xbf16>
    %47 = vector.shape_cast %46 : vector<1x1x64x96xbf16> to vector<64x96xbf16>
    %c7 = arith.constant 7 : index
    %c0_55 = arith.constant 0 : index
    %c0_56 = arith.constant 0 : index
    %48 = vector.load %arg7[%c7, %c0_55, %c0_56] : memref<9x96x32xbf16, #tpu.memory_space<vmem>>, vector<1x96x32xbf16>
    %49 = vector.shape_cast %48 : vector<1x96x32xbf16> to vector<96x32xbf16>
    %cst_57 = arith.constant dense<0.000000e+00> : vector<64x32xf32>
    %50 = tpu.matmul %47, %49, %cst_57 {dimension_numbers = #tpu.dot_dimension_numbers<[1], [0], [0], [1], [0, 0, 1, 1], [], []>} : vector<64x96xbf16>, vector<96x32xbf16>, vector<64x32xf32> -> vector<64x32xf32>
    %51 = arith.addf %45, %50 : vector<64x32xf32>
    %c0_58 = arith.constant 0 : index
    %c0_59 = arith.constant 0 : index
    %c2_60 = arith.constant 2 : index
    %c0_61 = arith.constant 0 : index
    %52 = vector.load %arg6[%c0_58, %c0_59, %c2_60, %c0_61] : memref<1x1x66x96xbf16, #tpu.memory_space<vmem>>, vector<1x1x64x96xbf16>
    %53 = vector.shape_cast %52 : vector<1x1x64x96xbf16> to vector<64x96xbf16>
    %c8 = arith.constant 8 : index
    %c0_62 = arith.constant 0 : index
    %c0_63 = arith.constant 0 : index
    %54 = vector.load %arg7[%c8, %c0_62, %c0_63] : memref<9x96x32xbf16, #tpu.memory_space<vmem>>, vector<1x96x32xbf16>
    %55 = vector.shape_cast %54 : vector<1x96x32xbf16> to vector<96x32xbf16>
    %cst_64 = arith.constant dense<0.000000e+00> : vector<64x32xf32>
    %56 = tpu.matmul %53, %55, %cst_64 {dimension_numbers = #tpu.dot_dimension_numbers<[1], [0], [0], [1], [0, 0, 1, 1], [], []>} : vector<64x96xbf16>, vector<96x32xbf16>, vector<64x32xf32> -> vector<64x32xf32>
    %57 = arith.addf %51, %56 : vector<64x32xf32>
    %c0_65 = arith.constant 0 : index
    %c0_66 = arith.constant 0 : index
    %58 = vector.load %arg10[%c0_65, %c0_66] : memref<64x32xf32, #tpu.memory_space<vmem>>, vector<64x32xf32>
    tpu.vector_store %arg10[%c0_65, %c0_66], %57 {strides = array<i32>} : memref<64x32xf32, #tpu.memory_space<vmem>>, vector<64x32xf32>,
    %c0_i32_67 = arith.constant 0 : i32
    %59 = arith.cmpi eq, %arg3, %c0_i32_67 : i32
    %60 = arith.extui %59 : i1 to i32
    %c0_i32_68 = arith.constant 0 : i32
    %61 = arith.cmpi ne, %60, %c0_i32_68 : i32
    scf.if %61 {
      %cst_69 = arith.constant 0.000000e+00 : f32
      %62 = vector.broadcast %cst_69 : f32 to vector<64x32xf32>
      %63 = arith.cmpf ogt, %57, %62 : vector<64x32xf32>
      %cst_70 = arith.constant 0.000000e+00 : f32
      %64 = vector.broadcast %cst_70 : f32 to vector<64x32xf32>
      %65 = arith.minimumf %57, %64 : vector<64x32xf32>
      %66 = math.exp %65 : vector<64x32xf32>
      %cst_71 = arith.constant 1.000000e+00 : f32
      %67 = vector.broadcast %cst_71 : f32 to vector<64x32xf32>
      %68 = arith.subf %66, %67 : vector<64x32xf32>
      %69 = arith.select %63, %57, %68 : vector<64x32xi1>, vector<64x32xf32>
      %70 = arith.truncf %69 : vector<64x32xf32> to vector<64x32xbf16>
      %c0_72 = arith.constant 0 : index
      %c0_73 = arith.constant 0 : index
      %c0_74 = arith.constant 0 : index
      %c0_75 = arith.constant 0 : index
      %71 = vector.load %arg9[%c0_72, %c0_73, %c0_74, %c0_75] : memref<1x1x64x32xbf16, #tpu.memory_space<vmem>>, vector<1x1x64x32xbf16>
      %72 = vector.shape_cast %71 : vector<1x1x64x32xbf16> to vector<64x32xbf16>
      %73 = vector.shape_cast %70 : vector<64x32xbf16> to vector<1x1x64x32xbf16>
      tpu.vector_store %arg9[%c0_72, %c0_73, %c0_74, %c0_75], %73 {strides = array<i32>} : memref<1x1x64x32xbf16, #tpu.memory_space<vmem>>, vector<1x1x64x32xbf16>,
    } else {
    }
    return
  }
  func.func @transform_0(%arg0: i32, %arg1: i32, %arg2: i32, %arg3: i32) -> (i32, i32, i32, i32) {
    %c0_i32 = arith.constant 0 : i32
    %0 = arith.addi %arg2, %c0_i32 : i32
    %c0_i32_0 = arith.constant 0 : i32
    %c0_i32_1 = arith.constant 0 : i32
    return %arg0, %0, %c0_i32_0, %arg3 : i32, i32, i32, i32
  }
  func.func @transform_1(%arg0: i32, %arg1: i32, %arg2: i32, %arg3: i32) -> (i32, i32, i32, i32) {
    %c1_i32 = arith.constant 1 : i32
    %0 = arith.addi %arg2, %c1_i32 : i32
    %c0_i32 = arith.constant 0 : i32
    %c0_i32_0 = arith.constant 0 : i32
    return %arg0, %0, %c0_i32, %arg3 : i32, i32, i32, i32
  }
  func.func @transform_2(%arg0: i32, %arg1: i32, %arg2: i32, %arg3: i32) -> (i32, i32, i32, i32) {
    %c2_i32 = arith.constant 2 : i32
    %0 = arith.addi %arg2, %c2_i32 : i32
    %c0_i32 = arith.constant 0 : i32
    %c0_i32_0 = arith.constant 0 : i32
    return %arg0, %0, %c0_i32, %arg3 : i32, i32, i32, i32
  }
  func.func @transform_3(%arg0: i32, %arg1: i32, %arg2: i32, %arg3: i32) -> (i32, i32, i32) {
    %c0_i32 = arith.constant 0 : i32
    %c0_i32_0 = arith.constant 0 : i32
    return %c0_i32, %arg3, %arg1 : i32, i32, i32
  }
  func.func @transform_4(%arg0: i32, %arg1: i32, %arg2: i32, %arg3: i32) -> (i32, i32) {
    %c0_i32 = arith.constant 0 : i32
    %c0_i32_0 = arith.constant 0 : i32
    return %c0_i32, %arg1 : i32, i32
  }
  func.func @transform_5(%arg0: i32, %arg1: i32, %arg2: i32, %arg3: i32) -> (i32, i32, i32, i32) {
    %c0_i32 = arith.constant 0 : i32
    %c0_i32_0 = arith.constant 0 : i32
    return %arg0, %arg2, %c0_i32, %arg1 : i32, i32, i32, i32
  }
}

</mosaic_0001>

<bundles_post_ra>
// kernel: dsrnet_forward.18
= control target key start
LH: loop header
LB: loop body
LE: loop exit
PB: predicated region body
PF: predicated region fallthrough
CT: control target
= control target key end

     0   :  { %s948_s12 = smov 0   ;;  %s950_s13 = smov 0   ;;  %s1077_s0 = inlined_call_operand.vmem [shape: bf16[256,64], index: 0, kind: input, shape index: {}]   ;;  %s1078_s1 = inlined_call_operand.vmem [shape: bf16[64,64], index: 1, kind: input, shape index: {}]   ;;  %s1079_s2 = inlined_call_operand.vmem [shape: f32[1,64], index: 2, kind: input, shape index: {}]   ;;  %s1080_s3 = inlined_call_operand.vmem [shape: bf16[256,64], index: 3, kind: output, shape index: {}]  }
   0x1   :  { %s952_s14 = smov 0  }
   0x2 LB: > { %s32_s15 = sadd.s32 1, %s922_s13  ;;  %p764_p0 = scmp.ge.s32.totalorder %s926_s14, 1  ;;  %s926_s14 = sphi %s952_s14, %s13_s14   ;;  %s922_s13 = sphi %s950_s13, %s1082_s13   ;;  %s918_s12 = sphi %s948_s12, %s1081_s12  }
   0x3   : > { %p34_p1 = scmp.ge.s32.totalorder %s32_s15, 2  ;;  %p188_p2 = scmp.lt.s32.totalorder %s926_s14, 3 }
   0x5   : > { %s1084_s15 = smov (%p34_p1, %s32_s15), 0  ;;  %p189_p3 = pnand %p764_p0, %p188_p2 }
   0x6   : > { %v892_v0 = vld [vmem:[%s1078_s1] sm:$0xff] (!%p189_p3)   ;;  %s765_s18 = sshll.u32 (!%p189_p3), %s918_s12, 4  ;;  %v893_v1 = vld [vmem:[%s1078_s1 + $0x8] sm:$0xff] (!%p189_p3)   ;;  %v894_v2 = vld [vmem:[%s1078_s1 + $0x10] sm:$0xff] (!%p189_p3)   ;;  %vm272_vm0 = vcmask (!%p189_p3), 523264   ;;  %vm630_vm1 = vcmask (!%p189_p3), 519168  }
   0x7   : > { %192 = sbr.rel (%p189_p3) target bundleno = 253 (0xfd), region = 32  ;;  %p230_p4 = scmp.lt.s32.totalorder (!%p189_p3), %s765_s18, 31  ;;  %836 = vmatprep.subr.bf16.mxu0 (!%p189_p3), %v892_v0  ;;  %860 = vmatprep.subr.bf16.mxu1 (!%p189_p3), %v892_v0  ;;  %v769_v3 = vld [vmem:[%s1079_s2] ss:$0 sm:$0xff] (!%p189_p3)  ;;  %v895_v4 = vld [vmem:[%s1078_s1 + $0x18] sm:$0xff] (!%p189_p3)  }
   0x8   : > { %837 = vmatpush3.bf16.msra.mxu0 (!%p189_p3), %v892_v0  ;;  %864 = vmatpush3.bf16.msra.mxu1 (!%p189_p3), %v892_v0  ;;  %275 = vst.msk [vmem:[#allocation2 + $0x10] sm:$0xff] (!%p189_p3), %vm272_vm0, %v769_v3  ;;  %273 = vst.msk [vmem:[#allocation2] sm:$0xff] (!%p189_p3), %vm272_vm0, %v769_v3 }
   0x9   : > { %838 = vmatprep.subr.bf16.mxu0 (!%p189_p3), %v893_v1  ;;  %861 = vmatprep.subr.bf16.mxu1 (!%p189_p3), %v893_v1  ;;  %274 = vst.msk [vmem:[#allocation2 + $0x8] sm:$0xff] (!%p189_p3), %vm272_vm0, %v769_v3  ;;  %276 = vst.msk [vmem:[#allocation2 + $0x18] sm:$0xff] (!%p189_p3), %vm272_vm0, %v769_v3 }
   0xa   : > { %277 = vst.msk [vmem:[#allocation2 + $0x20] sm:$0xff] (!%p189_p3), %vm272_vm0, %v769_v3  ;;  %278 = vst.msk [vmem:[#allocation2 + $0x28] sm:$0xff] (!%p189_p3), %vm272_vm0, %v769_v3 }
   0xb   : > { %279 = vst.msk [vmem:[#allocation2 + $0x30] sm:$0xff] (!%p189_p3), %vm272_vm0, %v769_v3  ;;  %280 = vst.msk [vmem:[#allocation2 + $0x38] sm:$0xff] (!%p189_p3), %vm272_vm0, %v769_v3 }
   0xc   : > { %281 = vst.msk [vmem:[#allocation2 + $0x40] sm:$0xff] (!%p189_p3), %vm272_vm0, %v769_v3  ;;  %282 = vst.msk [vmem:[#allocation2 + $0x48] sm:$0xff] (!%p189_p3), %vm272_vm0, %v769_v3  ;;  %839 = vmatpush3.bf16.msra.mxu0 (!%p189_p3), %v893_v1  ;;  %865 = vmatpush3.bf16.msra.mxu1 (!%p189_p3), %v893_v1 }
   0xd   : > { %283 = vst.msk [vmem:[#allocation2 + $0x50] sm:$0xff] (!%p189_p3), %vm272_vm0, %v769_v3  ;;  %284 = vst.msk [vmem:[#allocation2 + $0x58] sm:$0xff] (!%p189_p3), %vm272_vm0, %v769_v3  ;;  %840 = vmatprep.subr.bf16.mxu0 (!%p189_p3), %v894_v2  ;;  %862 = vmatprep.subr.bf16.mxu1 (!%p189_p3), %v894_v2 }
   0xe   : > { %s1086_s18 = smov (!%p230_p4, %s765_s18), 31  ;;  %285 = vst.msk [vmem:[#allocation2 + $0x60] sm:$0xff] %vm272_vm0, %v769_v3  ;;  %286 = vst.msk [vmem:[#allocation2 + $0x68] sm:$0xff] %vm272_vm0, %v769_v3 }
   0xf   : > { %s766_s25 = sshll.u32 %s1086_s18, 2  ;;  %287 = vst.msk [vmem:[#allocation2 + $0x70] sm:$0xff] %vm272_vm0, %v769_v3  ;;  %288 = vst.msk [vmem:[#allocation2 + $0x78] sm:$0xff] %vm272_vm0, %v769_v3  ;;  %v291_v13 = vld [vmem:[#allocation2 + $0x10] sm:$0xff]  ;;  %v289_v15 = vld [vmem:[#allocation2] sm:$0xff] }
  0x10   : > { %s236_s30 = scalar_lea.vmem %s1077_s0, %s766_s25  ;;  %841 = vmatpush3.bf16.msra.mxu0 %v894_v2  ;;  %866 = vmatpush3.bf16.msra.mxu1 %v894_v2  ;;  %v292_v19 = vld [vmem:[#allocation2 + $0x18] sm:$0xff]  ;;  %v290_v25 = vld [vmem:[#allocation2 + $0x8] sm:$0xff]  ;;  %s1020_s6 = scalar_lea.vmem %s1080_s3, %s766_s25 }
  0x11   : > { %v896_v5 = vld [vmem:[%s236_s30] sm:$0xff]   ;;  %842 = vmatprep.subr.bf16.mxu0 %v895_v4  ;;  %863 = vmatprep.subr.bf16.mxu1 %v895_v4  ;;  %v898_v7 = vld [vmem:[%s236_s30 + $0x8] sm:$0xff]   ;;  %v900_v9 = vld [vmem:[%s236_s30 + $0x10] sm:$0xff]  }
  0x12   : > { %v897_v6 = vld [vmem:[%s236_s30 + $0x20] sm:$0xff]   ;;  %844 = vmatprep.mubr.msk.bf16.mxu0 %vm272_vm0, %v896_v5  ;;  %v899_v8 = vld [vmem:[%s236_s30 + $0x28] sm:$0xff]   ;;  %v901_v10 = vld [vmem:[%s236_s30 + $0x30] sm:$0xff]  }
  0x13   : > { %852 = vmatprep.mubr.msk.bf16.mxu1 %vm272_vm0, %v897_v6  ;;  %v902_v11 = vld [vmem:[%s236_s30 + $0x18] sm:$0xff]   ;;  %v297_v16 = vld [vmem:[#allocation2 + $0x40] sm:$0xff]  ;;  %v298_v26 = vld [vmem:[#allocation2 + $0x48] sm:$0xff] }
  0x14   : > { %843 = vmatpush3.bf16.msra.mxu0 %v895_v4  ;;  %867 = vmatpush3.bf16.msra.mxu1 %v895_v4  ;;  %v903_v12 = vld [vmem:[%s236_s30 + $0x38] sm:$0xff]   ;;  %v299_v14 = vld [vmem:[#allocation2 + $0x50] sm:$0xff]  ;;  %v293_v53 = vld [vmem:[#allocation2 + $0x20] sm:$0xff] }
  0x15   : > { %v300_v20 = vld [vmem:[#allocation2 + $0x58] sm:$0xff]  ;;  %v295_v49 = vld [vmem:[#allocation2 + $0x30] sm:$0xff]  ;;  %v301_v54 = vld [vmem:[#allocation2 + $0x60] sm:$0xff] }
  0x16   : > { %v303_v50 = vld [vmem:[#allocation2 + $0x70] sm:$0xff]  ;;  %v296_v59 = vld [vmem:[#allocation2 + $0x38] sm:$0xff]  ;;  %v294_v1 = vld [vmem:[#allocation2 + $0x28] sm:$0xff] }
  0x17   : > { %845 = vmatmul.mubr.msk.bf16.vlgmr.msra.gmra.mrb[0].mxu0 %vm272_vm0, %v898_v7  ;;  %853 = vmatmul.mubr.msk.bf16.vlgmr.msra.gmra.mrb[0].mxu1 %vm272_vm0, %v899_v8  ;;  %v304_v60 = vld [vmem:[#allocation2 + $0x78] sm:$0xff]  ;;  %v302_v2 = vld [vmem:[#allocation2 + $0x68] sm:$0xff] }
  0x18   : > { %848 = vmatprep.mubr.msk.bf16.mxu0 %vm272_vm0, %v900_v9  ;;  %856 = vmatprep.mubr.msk.bf16.mxu1 %vm272_vm0, %v901_v10 }
  0x1f   : > { %849 = vmatmul.mubr.msk.bf16.gmra.mrb[4].mxu0 %vm272_vm0, %v902_v11  ;;  %857 = vmatmul.mubr.msk.bf16.gmra.mrb[4].mxu1 %vm272_vm0, %v903_v12 }
  0xea   : > { %v846_v17 = vpop.f32.mrb[0].mxu0  ;;  %v854_v18 = vpop.f32.mrb[0].mxu1 }
  0xeb   : > { %v517_v21 = vadd.f32 %v846_v17, %v291_v13  ;;  %v525_v22 = vadd.f32 %v854_v18, %v299_v14  ;;  %v452_v23 = vpop.f32.mrb[1].mxu0  ;;  %v484_v24 = vpop.f32.mrb[1].mxu1 }
  0xec   : > { %v515_v27 = vadd.f32 %v452_v23, %v289_v15  ;;  %v523_v28 = vadd.f32 %v484_v24, %v297_v16  ;;  %v847_v29 = vpop.f32.mrb[2].mxu0  ;;  %v855_v30 = vpop.f32.mrb[2].mxu1 }
  0xed   : > { %533 = vst.msk [vmem:[#allocation2 + $0x10] sm:$0xff] %vm272_vm0, %v517_v21  ;;  %v552_v31 = vmax.f32 %v517_v21, 0.0  ;;  %541 = vst.msk [vmem:[#allocation2 + $0x50] sm:$0xff] %vm272_vm0, %v525_v22  ;;  %v560_v32 = vmax.f32 %v525_v22, 0.0  ;;  %v518_v33 = vadd.f32 %v847_v29, %v292_v19  ;;  %v526_v34 = vadd.f32 %v855_v30, %v300_v20  ;;  %v455_v35 = vpop.f32.mrb[3].mxu0  ;;  %v487_v36 = vpop.f32.mrb[3].mxu1 }
  0xee   : > { %531 = vst.msk [vmem:[#allocation2] sm:$0xff] %vm272_vm0, %v515_v27  ;;  %v550_v37 = vmax.f32 %v515_v27, 0.0  ;;  %539 = vst.msk [vmem:[#allocation2 + $0x40] sm:$0xff] %vm272_vm0, %v523_v28  ;;  %v558_v38 = vmax.f32 %v523_v28, 0.0  ;;  %v516_v39 = vadd.f32 %v455_v35, %v290_v25  ;;  %v524_v40 = vadd.f32 %v487_v36, %v298_v26 }
  0xef   : > { %v810_v41 = vpack.c.bf16 %v552_v31, %v552_v31  ;;  %v818_v42 = vpack.c.bf16 %v560_v32, %v560_v32  ;;  %534 = vst.msk [vmem:[#allocation2 + $0x18] sm:$0xff] %vm272_vm0, %v518_v33  ;;  %v553_v43 = vmax.f32 %v518_v33, 0.0  ;;  %542 = vst.msk [vmem:[#allocation2 + $0x58] sm:$0xff] %vm272_vm0, %v526_v34  ;;  %v561_v44 = vmax.f32 %v526_v34, 0.0 }
  0xf0   : > { %v808_v45 = vpack.c.bf16 %v550_v37, %v550_v37  ;;  %v816_v46 = vpack.c.bf16 %v558_v38, %v558_v38  ;;  %532 = vst.msk [vmem:[#allocation2 + $0x8] sm:$0xff] %vm272_vm0, %v516_v39  ;;  %v551_v47 = vmax.f32 %v516_v39, 0.0  ;;  %540 = vst.msk [vmem:[#allocation2 + $0x48] sm:$0xff] %vm272_vm0, %v524_v40  ;;  %v559_v48 = vmax.f32 %v524_v40, 0.0 }
  0xf1   : > { %633 = vst.msk [vmem:[%s1020_s6 + $0x8] sm:$0xf] %vm630_vm1, %v810_v41  ;;  %641 = vst.msk [vmem:[%s1020_s6 + $0x28] sm:$0xf] %vm630_vm1, %v818_v42  ;;  %v811_v51 = vpack.c.bf16 %v553_v43, %v553_v43  ;;  %v819_v52 = vpack.c.bf16 %v561_v44, %v561_v44 }
  0xf2   : > { %631 = vst.msk [vmem:[%s1020_s6] sm:$0xf] %vm630_vm1, %v808_v45  ;;  %639 = vst.msk [vmem:[%s1020_s6 + $0x20] sm:$0xf] %vm630_vm1, %v816_v46  ;;  %v809_v55 = vpack.c.bf16 %v551_v47, %v551_v47  ;;  %v817_v56 = vpack.c.bf16 %v559_v48, %v559_v48  ;;  %v850_v57 = vpop.f32.mrb[4].mxu0  ;;  %v858_v58 = vpop.f32.mrb[4].mxu1 }
  0xf3   : > { %634 = vst.msk [vmem:[%s1020_s6 + $0xc] sm:$0xf] %vm630_vm1, %v811_v51  ;;  %642 = vst.msk [vmem:[%s1020_s6 + $0x2c] sm:$0xf] %vm630_vm1, %v819_v52  ;;  %v521_v61 = vadd.f32 %v850_v57, %v295_v49  ;;  %v529_v62 = vadd.f32 %v858_v58, %v303_v50  ;;  %v468_v63 = vpop.f32.mrb[5].mxu0  ;;  %v500_v0 = vpop.f32.mrb[5].mxu1 }
  0xf4   : > { %632 = vst.msk [vmem:[%s1020_s6 + $0x4] sm:$0xf] %vm630_vm1, %v809_v55  ;;  %640 = vst.msk [vmem:[%s1020_s6 + $0x24] sm:$0xf] %vm630_vm1, %v817_v56  ;;  %v519_v3 = vadd.f32 %v468_v63, %v293_v53  ;;  %v527_v4 = vadd.f32 %v500_v0, %v301_v54  ;;  %v851_v5 = vpop.f32.mrb[6].mxu0  ;;  %v859_v6 = vpop.f32.mrb[6].mxu1 }
  0xf5   : > { %537 = vst.msk [vmem:[#allocation2 + $0x30] sm:$0xff] %vm272_vm0, %v521_v61  ;;  %v556_v7 = vmax.f32 %v521_v61, 0.0  ;;  %545 = vst.msk [vmem:[#allocation2 + $0x70] sm:$0xff] %vm272_vm0, %v529_v62  ;;  %v564_v8 = vmax.f32 %v529_v62, 0.0  ;;  %v522_v9 = vadd.f32 %v851_v5, %v296_v59  ;;  %v530_v10 = vadd.f32 %v859_v6, %v304_v60  ;;  %v471_v11 = vpop.f32.mrb[7].mxu0  ;;  %v503_v12 = vpop.f32.mrb[7].mxu1 }
  0xf6   : > { %535 = vst.msk [vmem:[#allocation2 + $0x20] sm:$0xff] %vm272_vm0, %v519_v3  ;;  %v554_v13 = vmax.f32 %v519_v3, 0.0  ;;  %543 = vst.msk [vmem:[#allocation2 + $0x60] sm:$0xff] %vm272_vm0, %v527_v4  ;;  %v562_v14 = vmax.f32 %v527_v4, 0.0  ;;  %v520_v15 = vadd.f32 %v471_v11, %v294_v1  ;;  %v528_v16 = vadd.f32 %v503_v12, %v302_v2 }
  0xf7   : > { %v814_v17 = vpack.c.bf16 %v556_v7, %v556_v7  ;;  %v822_v18 = vpack.c.bf16 %v564_v8, %v564_v8  ;;  %538 = vst.msk [vmem:[#allocation2 + $0x38] sm:$0xff] %vm272_vm0, %v522_v9  ;;  %v557_v19 = vmax.f32 %v522_v9, 0.0  ;;  %546 = vst.msk [vmem:[#allocation2 + $0x78] sm:$0xff] %vm272_vm0, %v530_v10  ;;  %v565_v20 = vmax.f32 %v530_v10, 0.0 }
  0xf8   : > { %v812_v21 = vpack.c.bf16 %v554_v13, %v554_v13  ;;  %v820_v22 = vpack.c.bf16 %v562_v14, %v562_v14  ;;  %536 = vst.msk [vmem:[#allocation2 + $0x28] sm:$0xff] %vm272_vm0, %v520_v15  ;;  %v555_v23 = vmax.f32 %v520_v15, 0.0  ;;  %544 = vst.msk [vmem:[#allocation2 + $0x68] sm:$0xff] %vm272_vm0, %v528_v16  ;;  %v563_v24 = vmax.f32 %v528_v16, 0.0 }
  0xf9   : > { %637 = vst.msk [vmem:[%s1020_s6 + $0x18] sm:$0xf] %vm630_vm1, %v814_v17  ;;  %645 = vst.msk [vmem:[%s1020_s6 + $0x38] sm:$0xf] %vm630_vm1, %v822_v18  ;;  %v815_v25 = vpack.c.bf16 %v557_v19, %v557_v19  ;;  %v823_v26 = vpack.c.bf16 %v565_v20, %v565_v20 }
  0xfa   : > { %635 = vst.msk [vmem:[%s1020_s6 + $0x10] sm:$0xf] %vm630_vm1, %v812_v21  ;;  %643 = vst.msk [vmem:[%s1020_s6 + $0x30] sm:$0xf] %vm630_vm1, %v820_v22  ;;  %v813_v27 = vpack.c.bf16 %v555_v23, %v555_v23  ;;  %v821_v28 = vpack.c.bf16 %v563_v24, %v563_v24 }
  0xfb   : > { %638 = vst.msk [vmem:[%s1020_s6 + $0x1c] sm:$0xf] %vm630_vm1, %v815_v25  ;;  %646 = vst.msk [vmem:[%s1020_s6 + $0x3c] sm:$0xf] %vm630_vm1, %v823_v26 }
  0xfc   : > { %636 = vst.msk [vmem:[%s1020_s6 + $0x14] sm:$0xf] %vm630_vm1, %v813_v27  ;;  %644 = vst.msk [vmem:[%s1020_s6 + $0x34] sm:$0xf] %vm630_vm1, %v821_v28 }
  0xfd PF: > { %s13_s14 = sadd.s32 1, %s926_s14   ;;  %s1081_s12 = smov %s922_s13 }
  0xfe   : > { %p10_p5 = scmp.ge.s32.totalorder %s13_s14, 4   ;;  %s1082_s13 = smov %s1084_s15 }
 0x100   :  { %12 = sbr.rel (!%p10_p5) target bundleno = 2 (0x2), region = 76 }

// kernel: dsrnet_forward.19
= control target key start
LH: loop header
LB: loop body
LE: loop exit
PB: predicated region body
PF: predicated region fallthrough
CT: control target
= control target key end

     0   :  { %v379_v1 = vmov 0   ;;  %vm141_vm0 = vcmask 523264   ;;  %v21_v13 = vlaneseq  ;;  %s463_s1 = inlined_call_operand.vmem [shape: bf16[64,256], index: 1, kind: input, shape index: {}]   ;;  %s464_s0 = inlined_call_operand.vmem [shape: bf16[64,64], index: 0, kind: input, shape index: {}]   ;;  %s465_s2 = inlined_call_operand.vmem [shape: f32[1,256], index: 2, kind: input, shape index: {}]   ;;  %s466_s3 = inlined_call_operand.vmem [shape: bf16[64,256], index: 3, kind: output, shape index: {}]  }
   0x1   :  { %v363_v0 = vld [vmem:[%s463_s1 + $0x4] ss:$8 sps:$4 sm:$0xff]   ;;  %186 = vmatprep.mubr.bf16.mxu0 %v379_v1  ;;  %206 = vmatprep.mubr.bf16.mxu1 %v379_v1  ;;  %v365_v2 = vld [vmem:[%s463_s1] ss:$8 sps:$4 sm:$0xff]   ;;  %v366_v3 = vld [vmem:[%s463_s1 + $0x14] ss:$8 sps:$4 sm:$0xff]  }
   0x2   :  { %154 = vmatprep.subr.bf16.mxu0 %v363_v0  ;;  %354 = vmatprep.subr.bf16.mxu1 %v363_v0  ;;  %v368_v4 = vld [vmem:[%s463_s1 + $0x10] ss:$8 sps:$4 sm:$0xff]   ;;  %v369_v5 = vld [vmem:[%s463_s1 + $0x24] ss:$8 sps:$4 sm:$0xff]   ;;  %v371_v6 = vld [vmem:[%s463_s1 + $0x20] ss:$8 sps:$4 sm:$0xff]  }
   0x3   :  { %155 = vmatpush1.bf16.msra.mxu0 %v365_v2  ;;  %358 = vmatpush1.bf16.msra.mxu1 %v365_v2  ;;  %v372_v7 = vld [vmem:[%s463_s1 + $0x34] ss:$8 sps:$4 sm:$0xff]   ;;  %v374_v8 = vld [vmem:[%s463_s1 + $0x30] ss:$8 sps:$4 sm:$0xff]   ;;  %v375_v9 = vld [vmem:[%s464_s0] sm:$0xff]   ;;  %v22_v14 = vshrl.u32 %v21_v13, 7 }
   0x4   :  { %156 = vmatprep.subr.bf16.mxu0 %v366_v3  ;;  %355 = vmatprep.subr.bf16.mxu1 %v366_v3  ;;  %v376_v10 = vld [vmem:[%s464_s0 + $0x10] sm:$0xff]   ;;  %v377_v11 = vld [vmem:[%s464_s0 + $0x8] sm:$0xff]   ;;  %v378_v12 = vld [vmem:[%s464_s0 + $0x18] sm:$0xff]  }
   0x5   :  { %v23_v15 = vsub.s32 0, %v22_v14  ;;  %v19_v16 = vld [vmem:[%s465_s2] sm:$0x3]  ;;  %v27_v17 = vsub.s32 1, %v22_v14 }
   0x7   :  { %157 = vmatpush1.bf16.msra.mxu0 %v368_v4  ;;  %359 = vmatpush1.bf16.msra.mxu1 %v368_v4  ;;  %v24_v18 = vrot.slane %v19_v16, %v23_v15  ;;  %v28_v19 = vrot.slane %v19_v16, %v27_v17 }
   0x8   :  { %158 = vmatprep.subr.bf16.mxu0 %v369_v5  ;;  %356 = vmatprep.subr.bf16.mxu1 %v369_v5 }
   0xb   :  { %159 = vmatpush1.bf16.msra.mxu0 %v371_v6  ;;  %360 = vmatpush1.bf16.msra.mxu1 %v371_v6 }
   0xc   :  { %160 = vmatprep.subr.bf16.mxu0 %v372_v7  ;;  %357 = vmatprep.subr.bf16.mxu1 %v372_v7 }
   0xf   :  { %161 = vmatpush1.bf16.msra.mxu0 %v374_v8  ;;  %361 = vmatpush1.bf16.msra.mxu1 %v374_v8 }
  0x12   :  { %334 = vmatmul.mubr.msk.bf16.vlgmr.msra.gmra.mrb[0].mxu0 %vm141_vm0, %v375_v9  ;;  %336 = vmatmul.mubr.msk.bf16.vlgmr.msra.gmra.mrb[0].mxu1 %vm141_vm0, %v376_v10 }
  0x13   :  { %196 = vmatprep.mubr.bf16.mxu0 %v379_v1  ;;  %216 = vmatprep.mubr.bf16.mxu1 %v379_v1 }
  0x1a   :  { %335 = vmatmul.mubr.msk.bf16.gmra.mrb[4].mxu0 %vm141_vm0, %v377_v11  ;;  %337 = vmatmul.mubr.msk.bf16.gmra.mrb[4].mxu1 %vm141_vm0, %v378_v12 }
  0xe5   :  { %v188_v20 = vpop.f32.mrb[0].mxu0  ;;  %v208_v21 = vpop.f32.mrb[0].mxu1 }
  0xe6   :  { %v227_v22 = vadd.f32 %v188_v20, %v24_v18  ;;  %v235_v23 = vadd.f32 %v208_v21, %v24_v18  ;;  %v190_v24 = vpop.f32.mrb[1].mxu0  ;;  %v210_v25 = vpop.f32.mrb[1].mxu1 }
  0xe7   :  { %v228_v26 = vadd.f32 %v190_v24, %v28_v19  ;;  %v236_v27 = vadd.f32 %v210_v25, %v28_v19  ;;  %v192_v28 = vpop.f32.mrb[2].mxu0  ;;  %v212_v29 = vpop.f32.mrb[2].mxu1 }
  0xe8   :  { %v229_v30 = vadd.f32 %v192_v28, %v24_v18  ;;  %v237_v31 = vadd.f32 %v212_v29, %v24_v18  ;;  %v194_v32 = vpop.f32.mrb[3].mxu0  ;;  %v214_v33 = vpop.f32.mrb[3].mxu1 }
  0xe9   :  { %v346_v34 = vpack.c.bf16 %v228_v26, %v227_v22  ;;  %v350_v35 = vpack.c.bf16 %v236_v27, %v235_v23  ;;  %v230_v36 = vadd.f32 %v194_v32, %v28_v19  ;;  %v238_v37 = vadd.f32 %v214_v33, %v28_v19 }
  0xeb   :  { %310 = vst [vmem:[%s466_s3] sm:$0xff] %v346_v34  ;;  %314 = vst [vmem:[%s466_s3 + $0x20] sm:$0xff] %v350_v35  ;;  %v347_v38 = vpack.c.bf16 %v230_v36, %v229_v30  ;;  %v351_v39 = vpack.c.bf16 %v238_v37, %v237_v31 }
  0xed   :  { %311 = vst [vmem:[%s466_s3 + $0x8] sm:$0xff] %v347_v38  ;;  %315 = vst [vmem:[%s466_s3 + $0x28] sm:$0xff] %v351_v39  ;;  %v198_v40 = vpop.f32.mrb[4].mxu0  ;;  %v218_v41 = vpop.f32.mrb[4].mxu1 }
  0xee   :  { %v231_v42 = vadd.f32 %v198_v40, %v24_v18  ;;  %v239_v43 = vadd.f32 %v218_v41, %v24_v18  ;;  %v200_v44 = vpop.f32.mrb[5].mxu0  ;;  %v220_v45 = vpop.f32.mrb[5].mxu1 }
  0xef   :  { %v232_v46 = vadd.f32 %v200_v44, %v28_v19  ;;  %v240_v47 = vadd.f32 %v220_v45, %v28_v19  ;;  %v202_v48 = vpop.f32.mrb[6].mxu0  ;;  %v222_v49 = vpop.f32.mrb[6].mxu1 }
  0xf0   :  { %v233_v50 = vadd.f32 %v202_v48, %v24_v18  ;;  %v241_v51 = vadd.f32 %v222_v49, %v24_v18  ;;  %v204_v52 = vpop.f32.mrb[7].mxu0  ;;  %v224_v53 = vpop.f32.mrb[7].mxu1 }
  0xf1   :  { %v348_v54 = vpack.c.bf16 %v232_v46, %v231_v42  ;;  %v352_v55 = vpack.c.bf16 %v240_v47, %v239_v43  ;;  %v234_v56 = vadd.f32 %v204_v52, %v28_v19  ;;  %v242_v57 = vadd.f32 %v224_v53, %v28_v19 }
  0xf3   :  { %312 = vst [vmem:[%s466_s3 + $0x10] sm:$0xff] %v348_v54  ;;  %316 = vst [vmem:[%s466_s3 + $0x30] sm:$0xff] %v352_v55  ;;  %v349_v58 = vpack.c.bf16 %v234_v56, %v233_v50  ;;  %v353_v59 = vpack.c.bf16 %v242_v57, %v241_v51 }
  0xf5   :  { %313 = vst [vmem:[%s466_s3 + $0x18] sm:$0xff] %v349_v58  ;;  %317 = vst [vmem:[%s466_s3 + $0x38] sm:$0xff] %v353_v59 }

// kernel: dsrnet_forward.20
= control target key start
LH: loop header
LB: loop body
LE: loop exit
PB: predicated region body
PF: predicated region fallthrough
CT: control target
= control target key end

     0   :  { %v438_v1 = vmov 0   ;;  %vm144_vm0 = vcmask 523264   ;;  %v24_v13 = vlaneseq  ;;  %s579_s1 = inlined_call_operand.vmem [shape: bf16[64,256], index: 1, kind: input, shape index: {}]   ;;  %s580_s0 = inlined_call_operand.vmem [shape: bf16[64,64], index: 0, kind: input, shape index: {}]   ;;  %s581_s2 = inlined_call_operand.vmem [shape: f32[1,256], index: 2, kind: input, shape index: {}]   ;;  %s582_s3 = inlined_call_operand.vmem [shape: bf16[64,256], index: 3, kind: input, shape index: {}]   ;;  %s583_s4 = inlined_call_operand.vmem [shape: bf16[64,256], index: 4, kind: output, shape index: {}]  }
   0x1   :  { %v422_v0 = vld [vmem:[%s579_s1 + $0x4] ss:$8 sps:$4 sm:$0xff]   ;;  %189 = vmatprep.mubr.bf16.mxu0 %v438_v1  ;;  %209 = vmatprep.mubr.bf16.mxu1 %v438_v1  ;;  %v424_v2 = vld [vmem:[%s579_s1] ss:$8 sps:$4 sm:$0xff]   ;;  %v425_v3 = vld [vmem:[%s579_s1 + $0x14] ss:$8 sps:$4 sm:$0xff]  }
   0x2   :  { %157 = vmatprep.subr.bf16.mxu0 %v422_v0  ;;  %413 = vmatprep.subr.bf16.mxu1 %v422_v0  ;;  %v427_v4 = vld [vmem:[%s579_s1 + $0x10] ss:$8 sps:$4 sm:$0xff]   ;;  %v428_v5 = vld [vmem:[%s579_s1 + $0x24] ss:$8 sps:$4 sm:$0xff]   ;;  %v430_v6 = vld [vmem:[%s579_s1 + $0x20] ss:$8 sps:$4 sm:$0xff]  }
   0x3   :  { %158 = vmatpush1.bf16.msra.mxu0 %v424_v2  ;;  %417 = vmatpush1.bf16.msra.mxu1 %v424_v2  ;;  %v431_v7 = vld [vmem:[%s579_s1 + $0x34] ss:$8 sps:$4 sm:$0xff]   ;;  %v433_v8 = vld [vmem:[%s579_s1 + $0x30] ss:$8 sps:$4 sm:$0xff]   ;;  %v434_v9 = vld [vmem:[%s580_s0] sm:$0xff]   ;;  %v25_v14 = vshrl.u32 %v24_v13, 7 }
   0x4   :  { %159 = vmatprep.subr.bf16.mxu0 %v425_v3  ;;  %414 = vmatprep.subr.bf16.mxu1 %v425_v3  ;;  %v435_v10 = vld [vmem:[%s580_s0 + $0x10] sm:$0xff]   ;;  %v436_v11 = vld [vmem:[%s580_s0 + $0x8] sm:$0xff]   ;;  %v437_v12 = vld [vmem:[%s580_s0 + $0x18] sm:$0xff]  }
   0x5   :  { %v26_v15 = vsub.s32 0, %v25_v14  ;;  %v22_v16 = vld [vmem:[%s581_s2] sm:$0x3]  ;;  %v30_v17 = vsub.s32 1, %v25_v14  ;;  %v266_v21 = vld [vmem:[%s582_s3 + $0x8] sm:$0xff]  ;;  %v522_v24 = vld [vmem:[%s582_s3 + $0x10] sm:$0xff] }
   0x6   :  { %v265_v18 = vld [vmem:[%s582_s3] sm:$0xff]  ;;  %v270_v22 = vld [vmem:[%s582_s3 + $0x28] sm:$0xff]  ;;  %v527_v25 = vld [vmem:[%s582_s3 + $0x30] sm:$0xff]  ;;  %v275_v32 = vunpack.c.l.bf16 %v266_v21  ;;  %v276_v34 = vunpack.c.h.bf16 %v266_v21  ;;  %v277_v40 = vunpack.c.l.bf16 %v522_v24  ;;  %v278_v46 = vunpack.c.h.bf16 %v522_v24 }
   0x7   :  { %160 = vmatpush1.bf16.msra.mxu0 %v427_v4  ;;  %418 = vmatpush1.bf16.msra.mxu1 %v427_v4  ;;  %v269_v19 = vld [vmem:[%s582_s3 + $0x20] sm:$0xff]  ;;  %v509_v20 = vrot.slane %v22_v16, %v26_v15  ;;  %v517_v23 = vrot.slane %v22_v16, %v30_v17  ;;  %v273_v26 = vunpack.c.l.bf16 %v265_v18  ;;  %v274_v28 = vunpack.c.h.bf16 %v265_v18  ;;  %v268_v58 = vld [vmem:[%s582_s3 + $0x18] sm:$0xff] }
   0x8   :  { %161 = vmatprep.subr.bf16.mxu0 %v428_v5  ;;  %415 = vmatprep.subr.bf16.mxu1 %v428_v5  ;;  %v281_v27 = vunpack.c.l.bf16 %v269_v19  ;;  %v282_v29 = vunpack.c.h.bf16 %v269_v19  ;;  %v283_v33 = vunpack.c.l.bf16 %v270_v22  ;;  %v284_v35 = vunpack.c.h.bf16 %v270_v22  ;;  %v272_v59 = vld [vmem:[%s582_s3 + $0x38] sm:$0xff] }
   0x9   :  { %v285_v41 = vunpack.c.l.bf16 %v527_v25  ;;  %v286_v47 = vunpack.c.h.bf16 %v527_v25  ;;  %v280_v18 = vunpack.c.h.bf16 %v268_v58  ;;  %v288_v19 = vunpack.c.h.bf16 %v272_v59 }
   0xb   :  { %162 = vmatpush1.bf16.msra.mxu0 %v430_v6  ;;  %419 = vmatpush1.bf16.msra.mxu1 %v430_v6  ;;  %v279_v6 = vunpack.c.l.bf16 %v268_v58 }
   0xc   :  { %163 = vmatprep.subr.bf16.mxu0 %v431_v7  ;;  %416 = vmatprep.subr.bf16.mxu1 %v431_v7  ;;  %v287_v7 = vunpack.c.l.bf16 %v272_v59 }
   0xf   :  { %164 = vmatpush1.bf16.msra.mxu0 %v433_v8  ;;  %420 = vmatpush1.bf16.msra.mxu1 %v433_v8 }
  0x12   :  { %393 = vmatmul.mubr.msk.bf16.vlgmr.msra.gmra.mrb[0].mxu0 %vm144_vm0, %v434_v9  ;;  %395 = vmatmul.mubr.msk.bf16.vlgmr.msra.gmra.mrb[0].mxu1 %vm144_vm0, %v435_v10 }
  0x13   :  { %199 = vmatprep.mubr.bf16.mxu0 %v438_v1  ;;  %219 = vmatprep.mubr.bf16.mxu1 %v438_v1 }
  0x1a   :  { %394 = vmatmul.mubr.msk.bf16.gmra.mrb[4].mxu0 %vm144_vm0, %v436_v11  ;;  %396 = vmatmul.mubr.msk.bf16.gmra.mrb[4].mxu1 %vm144_vm0, %v437_v12 }
  0xe5   :  { %v191_v30 = vpop.f32.mrb[0].mxu0  ;;  %v211_v31 = vpop.f32.mrb[0].mxu1 }
  0xe6   :  { %v230_v36 = vadd.f32 %v191_v30, %v509_v20  ;;  %v238_v37 = vadd.f32 %v211_v31, %v509_v20  ;;  %v193_v38 = vpop.f32.mrb[1].mxu0  ;;  %v213_v39 = vpop.f32.mrb[1].mxu1 }
  0xe7   :  { %v231_v42 = vadd.f32 %v193_v38, %v517_v23  ;;  %v239_v43 = vadd.f32 %v213_v39, %v517_v23  ;;  %v195_v44 = vpop.f32.mrb[2].mxu0  ;;  %v215_v45 = vpop.f32.mrb[2].mxu1 }
  0xe8   :  { %v289_v48 = vadd.f32 %v273_v26, %v230_v36  ;;  %v297_v49 = vadd.f32 %v281_v27, %v238_v37  ;;  %v232_v50 = vadd.f32 %v195_v44, %v509_v20  ;;  %v240_v51 = vadd.f32 %v215_v45, %v509_v20  ;;  %v197_v52 = vpop.f32.mrb[3].mxu0  ;;  %v217_v53 = vpop.f32.mrb[3].mxu1 }
  0xe9   :  { %v290_v54 = vadd.f32 %v274_v28, %v231_v42  ;;  %v298_v55 = vadd.f32 %v282_v29, %v239_v43  ;;  %v233_v56 = vadd.f32 %v197_v52, %v517_v23  ;;  %v241_v57 = vadd.f32 %v217_v53, %v517_v23 }
  0xea   :  { %v305_v60 = vmax.f32 %v289_v48, 0.0  ;;  %v313_v61 = vmax.f32 %v297_v49, 0.0  ;;  %v291_v62 = vadd.f32 %v275_v32, %v232_v50  ;;  %v299_v63 = vadd.f32 %v283_v33, %v240_v51 }
  0xeb   :  { %v306_v0 = vmax.f32 %v290_v54, 0.0  ;;  %v314_v1 = vmax.f32 %v298_v55, 0.0  ;;  %v292_v2 = vadd.f32 %v276_v34, %v233_v56  ;;  %v300_v3 = vadd.f32 %v284_v35, %v241_v57 }
  0xec   :  { %v307_v4 = vmax.f32 %v291_v62, 0.0  ;;  %v315_v5 = vmax.f32 %v299_v63, 0.0 }
  0xed   :  { %v405_v8 = vpack.c.bf16 %v306_v0, %v305_v60  ;;  %v409_v9 = vpack.c.bf16 %v314_v1, %v313_v61  ;;  %v308_v10 = vmax.f32 %v292_v2, 0.0  ;;  %v316_v11 = vmax.f32 %v300_v3, 0.0  ;;  %v201_v12 = vpop.f32.mrb[4].mxu0  ;;  %v221_v13 = vpop.f32.mrb[4].mxu1 }
  0xee   :  { %v234_v14 = vadd.f32 %v201_v12, %v509_v20  ;;  %v242_v15 = vadd.f32 %v221_v13, %v509_v20  ;;  %v203_v16 = vpop.f32.mrb[5].mxu0  ;;  %v223_v17 = vpop.f32.mrb[5].mxu1 }
  0xef   :  { %369 = vst [vmem:[%s583_s4] sm:$0xff] %v405_v8  ;;  %373 = vst [vmem:[%s583_s4 + $0x20] sm:$0xff] %v409_v9  ;;  %v406_v21 = vpack.c.bf16 %v308_v10, %v307_v4  ;;  %v410_v22 = vpack.c.bf16 %v316_v11, %v315_v5  ;;  %v235_v24 = vadd.f32 %v203_v16, %v517_v23  ;;  %v205_v26 = vpop.f32.mrb[6].mxu0  ;;  %v225_v27 = vpop.f32.mrb[6].mxu1 }
  0xf0   :  { %v243_v25 = vadd.f32 %v223_v17, %v517_v23  ;;  %v293_v28 = vadd.f32 %v277_v40, %v234_v14  ;;  %v301_v29 = vadd.f32 %v285_v41, %v242_v15  ;;  %v236_v30 = vadd.f32 %v205_v26, %v509_v20  ;;  %v207_v32 = vpop.f32.mrb[7].mxu0  ;;  %v227_v33 = vpop.f32.mrb[7].mxu1 }
  0xf1   :  { %v244_v31 = vadd.f32 %v225_v27, %v509_v20  ;;  %370 = vst [vmem:[%s583_s4 + $0x8] sm:$0xff] %v406_v21  ;;  %374 = vst [vmem:[%s583_s4 + $0x28] sm:$0xff] %v410_v22  ;;  %v294_v34 = vadd.f32 %v278_v46, %v235_v24  ;;  %v237_v36 = vadd.f32 %v207_v32, %v517_v23 }
  0xf2   :  { %v302_v35 = vadd.f32 %v286_v47, %v243_v25  ;;  %v245_v37 = vadd.f32 %v227_v33, %v517_v23  ;;  %v309_v38 = vmax.f32 %v293_v28, 0.0  ;;  %v317_v39 = vmax.f32 %v301_v29, 0.0 }
  0xf3   :  { %v295_v40 = vadd.f32 %v279_v6, %v236_v30  ;;  %v303_v20 = vadd.f32 %v287_v7, %v244_v31  ;;  %v310_v41 = vmax.f32 %v294_v34, 0.0  ;;  %v296_v43 = vadd.f32 %v280_v18, %v237_v36 }
  0xf4   :  { %v318_v42 = vmax.f32 %v302_v35, 0.0  ;;  %v304_v44 = vadd.f32 %v288_v19, %v245_v37 }
  0xf5   :  { %v311_v45 = vmax.f32 %v295_v40, 0.0  ;;  %v319_v48 = vmax.f32 %v303_v20, 0.0  ;;  %v407_v49 = vpack.c.bf16 %v310_v41, %v309_v38  ;;  %v312_v51 = vmax.f32 %v296_v43, 0.0 }
  0xf6   :  { %v411_v50 = vpack.c.bf16 %v318_v42, %v317_v39  ;;  %v320_v52 = vmax.f32 %v304_v44, 0.0 }
  0xf7   :  { %371 = vst [vmem:[%s583_s4 + $0x10] sm:$0xff] %v407_v49  ;;  %v408_v23 = vpack.c.bf16 %v312_v51, %v311_v45 }
  0xf8   :  { %375 = vst [vmem:[%s583_s4 + $0x30] sm:$0xff] %v411_v50  ;;  %v412_v46 = vpack.c.bf16 %v320_v52, %v319_v48 }
  0xf9   :  { %372 = vst [vmem:[%s583_s4 + $0x18] sm:$0xff] %v408_v23 }
  0xfa   :  { %376 = vst [vmem:[%s583_s4 + $0x38] sm:$0xff] %v412_v46 }

// kernel: dsrnet_forward.23
= control target key start
LH: loop header
LB: loop body
LE: loop exit
PB: predicated region body
PF: predicated region fallthrough
CT: control target
= control target key end

     0   :  { %s5017_s18 = smov 0   ;;  %s5019_s19 = smov 0   ;;  %s5978_s0 = inlined_call_operand.vmem [shape: bf16[1,18,18,384], index: 0, kind: input, shape index: {}, may-alias: {0,1,2}]   ;;  %s5979_s1 = inlined_call_operand.vmem [shape: bf16[1,18,18,384], index: 1, kind: input, shape index: {}, may-alias: {0,1,2}]   ;;  %s5980_s2 = inlined_call_operand.vmem [shape: bf16[1,18,18,384], index: 2, kind: input, shape index: {}, may-alias: {0,1,2}]   ;;  %s5981_s3 = inlined_call_operand.vmem [shape: bf16[9,384,64], index: 3, kind: input, shape index: {}]   ;;  %s5982_s4 = inlined_call_operand.vmem [shape: f32[1,64], index: 4, kind: input, shape index: {}]   ;;  %s5983_s5 = inlined_call_operand.vmem [shape: bf16[1,16,16,64], index: 5, kind: output, shape index: {}]  }
   0x1   :  { %s5021_s20 = smov 0  }
   0x2 LB: > { %s33_s21 = sadd.s32 1, %s4979_s19  ;;  %p3521_p0 = scmp.ge.s32.totalorder %s4983_s20, 1  ;;  %s4983_s20 = sphi %s5021_s20, %s15_s20   ;;  %s4979_s19 = sphi %s5019_s19, %s5985_s19   ;;  %s4975_s18 = sphi %s5017_s18, %s5984_s18  }
   0x3   : > { %p35_p1 = scmp.ge.s32.totalorder %s33_s21, 16  ;;  %p308_p2 = scmp.lt.s32.totalorder %s4983_s20, 17 }
   0x5   : > { %s5987_s21 = smov (%p35_p1, %s33_s21), 0  ;;  %p309_p3 = pnand %p3521_p0, %p308_p2 }
   0x6   : > { %v4713_v0 = vld [vmem:[%s5981_s3 + $0x40] sm:$0xff] (!%p309_p3)   ;;  %v4985_v1 = vmov (!%p309_p3), 0.0   ;;  %v4716_v4 = vld [vmem:[%s5981_s3 + $0x48] sm:$0xff] (!%p309_p3)   ;;  %vm4986_vm0 = vmmov (!%p309_p3), 0   ;;  %v4719_v7 = vld [vmem:[%s5981_s3 + $0x50] sm:$0xff] (!%p309_p3)   ;;  %p393_p4 = scmp.lt.s32.totalorder (!%p309_p3), %s4975_s18, 17 }
   0x7   : > { %312 = sbr.rel (%p309_p3) target bundleno = 538 (0x21a), region = 40  ;;  %4452 = vmatprep.subr.bf16.mxu1 (!%p309_p3), %v4985_v1  ;;  %v4714_v2 = vld [vmem:[%s5981_s3 + $0x80] sm:$0xff] (!%p309_p3)   ;;  %4173 = vmatprep.subr.bf16.mxu0 (!%p309_p3), %v4713_v0  ;;  %v4717_v5 = vld [vmem:[%s5981_s3 + $0x88] sm:$0xff] (!%p309_p3)   ;;  %v4720_v8 = vld [vmem:[%s5981_s3 + $0x90] sm:$0xff] (!%p309_p3)   ;;  %vm850_vm1 = vsmask.f32 (!%p309_p3), 7424 }
   0x8   : > { %v4715_v3 = vld [vmem:[%s5981_s3] sm:$0xff] (!%p309_p3)   ;;  %4453 = vmatpush3.bf16.msra.mxu1 (!%p309_p3), %v4714_v2  ;;  %4468 = vmatprep.mubr.msk.bf16.mxu1 (!%p309_p3), %vm4986_vm0, %v4985_v1  ;;  %v4718_v6 = vld [vmem:[%s5981_s3 + $0x8] sm:$0xff] (!%p309_p3)   ;;  %v4721_v9 = vld [vmem:[%s5981_s3 + $0x10] sm:$0xff] (!%p309_p3)   ;;  %vm1177_vm2 = vcmask (!%p309_p3), 1046528   ;;  %s404_s10 = sadd.s32 (!%p309_p3), 1, %s4975_s18  ;;  %vm473_vm3 = vcmask (!%p309_p3), 523264  }
   0x9   : > { %4174 = vmatpush3.bf16.msra.mxu0 (!%p309_p3), %v4715_v3  ;;  %4454 = vmatprep.subr.bf16.mxu1 (!%p309_p3), %v4985_v1  ;;  %v4722_v10 = vld [vmem:[%s5981_s3 + $0x58] sm:$0xff] (!%p309_p3)   ;;  %v4725_v13 = vld [vmem:[%s5981_s3 + $0x60] sm:$0xff] (!%p309_p3)   ;;  %v4728_v16 = vld [vmem:[%s5981_s3 + $0x68] sm:$0xff] (!%p309_p3)   ;;  %p408_p5 = scmp.lt.s32.totalorder (!%p309_p3), %s404_s10, 17  ;;  %p450_p7 = scmp.lt.s32.totalorder (!%p309_p3), %s4975_s18, 15  ;;  %vm3322_vm5 = vcmask (!%p309_p3), 519168  }
   0xa   : > { %4175 = vmatprep.subr.bf16.mxu0 (!%p309_p3), %v4716_v4  ;;  %v4723_v11 = vld [vmem:[%s5981_s3 + $0x98] sm:$0xff] (!%p309_p3)   ;;  %v4726_v14 = vld [vmem:[%s5981_s3 + $0xa0] sm:$0xff] (!%p309_p3)   ;;  %v4729_v17 = vld [vmem:[%s5981_s3 + $0xa8] sm:$0xff] (!%p309_p3)  }
   0xb   : > { %v4724_v12 = vld [vmem:[%s5981_s3 + $0x18] sm:$0xff] (!%p309_p3)   ;;  %v4727_v15 = vld [vmem:[%s5981_s3 + $0x20] sm:$0xff] (!%p309_p3)   ;;  %v4730_v18 = vld [vmem:[%s5981_s3 + $0x28] sm:$0xff] (!%p309_p3)  }
   0xc   : > { %4455 = vmatpush3.bf16.msra.mxu1 (!%p309_p3), %v4717_v5  ;;  %v4731_v19 = vld [vmem:[%s5981_s3 + $0x70] sm:$0xff] (!%p309_p3)   ;;  %v4734_v24 = vld [vmem:[%s5981_s3 + $0x78] sm:$0xff] (!%p309_p3)   ;;  %v4740_v28 = vld [vmem:[%s5981_s3 + $0x100] sm:$0xff] (!%p309_p3)  }
   0xd   : > { %4176 = vmatpush3.bf16.msra.mxu0 (!%p309_p3), %v4718_v6  ;;  %4456 = vmatprep.subr.bf16.mxu1 (!%p309_p3), %v4985_v1  ;;  %v4732_v20 = vld [vmem:[%s5981_s3 + $0xb0] sm:$0xff] (!%p309_p3)   ;;  %v4735_v26 = vld [vmem:[%s5981_s3 + $0xb8] sm:$0xff] (!%p309_p3)   ;;  %v4741_v31 = vld [vmem:[%s5981_s3 + $0x140] sm:$0xff] (!%p309_p3)  }
   0xe   : > { %4177 = vmatprep.subr.bf16.mxu0 %v4719_v7  ;;  %s394_s27 = scalar_select %p393_p4, %s4975_s18, 17  ;;  %v4733_v21 = vld [vmem:[%s5981_s3 + $0x30] sm:$0xff]   ;;  %v4736_v27 = vld [vmem:[%s5981_s3 + $0x38] sm:$0xff]   ;;  %v4742_v32 = vld [vmem:[%s5981_s3 + $0xc0] sm:$0xff]  }
   0xf   : > { %v4743_v33 = vld [vmem:[%s5981_s3 + $0x108] sm:$0xff]   ;;  %v4746_v36 = vld [vmem:[%s5981_s3 + $0x110] sm:$0xff]   ;;  %v4749_v39 = vld [vmem:[%s5981_s3 + $0x118] sm:$0xff]   ;;  %s5989_s10 = smov (!%p408_p5, %s404_s10), 17 }
  0x10   : > { %4457 = vmatpush3.bf16.msra.mxu1 %v4720_v8  ;;  %s4684_s9 = smul.u32 36, %s394_s27  ;;  %v4744_v34 = vld [vmem:[%s5981_s3 + $0x148] sm:$0xff]   ;;  %v4747_v37 = vld [vmem:[%s5981_s3 + $0x150] sm:$0xff]   ;;  %v4750_v40 = vld [vmem:[%s5981_s3 + $0x158] sm:$0xff]  }
  0x11   : > { %4178 = vmatpush3.bf16.msra.mxu0 %v4721_v9  ;;  %4458 = vmatprep.subr.bf16.mxu1 %v4985_v1  ;;  %v4745_v35 = vld [vmem:[%s5981_s3 + $0xc8] sm:$0xff]   ;;  %v4748_v38 = vld [vmem:[%s5981_s3 + $0xd0] sm:$0xff]   ;;  %v4751_v41 = vld [vmem:[%s5981_s3 + $0xd8] sm:$0xff]   ;;  %s4685_s6 = smul.u32 36, %s5989_s10  ;;  %s420_s10 = sadd.s32 2, %s4975_s18 }
  0x12   : > { %4179 = vmatprep.subr.bf16.mxu0 %v4722_v10  ;;  %s5107_s22 = scalar_lea.vmem %s5978_s0, %s4684_s9  ;;  %v4752_v43 = vld [vmem:[%s5981_s3 + $0x120] sm:$0xff]   ;;  %v4755_v49 = vld [vmem:[%s5981_s3 + $0x128] sm:$0xff]   ;;  %v4758_v62 = vld [vmem:[%s5981_s3 + $0x130] sm:$0xff]   ;;  %p424_p6 = scmp.lt.s32.totalorder %s420_s10, 17 }
  0x13   : > { %v478_v22 = vld [vmem:[%s5107_s22] sm:$0xff]  ;;  %v5118_v23 = vld [vmem:[%s5107_s22 + $0xc] sm:$0xff]  ;;  %v4739_v29 = vld [vmem:[%s5107_s22 + $0x8] ss:$12 sps:$4 sm:$0xff]   ;;  %s5354_s15 = scalar_lea.vmem %s5979_s1, %s4685_s6  ;;  %s5993_s18 = smov (!%p450_p7, %s4975_s18), 15 }
  0x14   : > { %4459 = vmatpush3.bf16.msra.mxu1 %v4723_v11  ;;  %v5124_v25 = vcombine.high %v478_v22, %v5118_v23  ;;  %v5139_v30 = vcombine.low %v478_v22, %v5118_v23  ;;  %v4753_v45 = vld [vmem:[%s5981_s3 + $0x160] sm:$0xff]   ;;  %v778_v50 = vld [vmem:[%s5107_s22 + $0x18] sm:$0x11]  ;;  %v775_v53 = vld [vmem:[%s5107_s22 + $0x8] sm:$0xf]  ;;  %s5991_s10 = smov (!%p424_p6, %s420_s10), 17 }
  0x15   : > { %4180 = vmatpush3.bf16.msra.mxu0 %v4724_v12  ;;  %4460 = vmatprep.subr.bf16.mxu1 %v4985_v1  ;;  %v4754_v47 = vld [vmem:[%s5981_s3 + $0xe0] sm:$0xff]   ;;  %v5199_v52 = vcombine.high %v778_v50, %v778_v50  ;;  %v5203_v54 = vld [vmem:[%s5107_s22 + $0x14] sm:$0xf]  ;;  %v4756_v55 = vld [vmem:[%s5981_s3 + $0x168] sm:$0xff]   ;;  %v5208_v56 = vcombine.low %v778_v50, %v778_v50  ;;  %s4686_s11 = smul.u32 36, %s5991_s10  ;;  %s4170_s25 = sshll.u32 %s5993_s18, 3 }
  0x16   : > { %4181 = vmatprep.subr.bf16.mxu0 %v4725_v13  ;;  %722 = vmatprep.mubr.bf16.mxu0 %v5124_v25  ;;  %v866_v42 = vshll.u32 %v5124_v25, 16  ;;  %v864_v44 = vshrl.u32 %v5124_v25, 16  ;;  %v852_v46 = vshrl.u32 %v5139_v30, 16  ;;  %v854_v51 = vshll.u32 %v5139_v30, 16  ;;  %v4757_v59 = vld [vmem:[%s5981_s3 + $0xe8] sm:$0xff]   ;;  %v4759_v63 = vld [vmem:[%s5981_s3 + $0x170] sm:$0xff]   ;;  %s459_s29 = scalar_lea.vmem %s5983_s5, %s4170_s25 }
  0x17   : > { %v3605_v57 = vcombine.low %v775_v53, %v5203_v54  ;;  %v5212_v58 = vld [vmem:[%s5107_s22 + $0x20] ss:$0 sps:$4 sm:$0x11]   ;;  %v871_v61 = vshll.u32 %v5199_v52, 16  ;;  %v4760_v3 = vld [vmem:[%s5981_s3 + $0xf0] sm:$0xff]   ;;  %v859_v5 = vshll.u32 %v5208_v56, 16  ;;  %s5607_s26 = scalar_lea.vmem %s5980_s2, %s4686_s11 }
  0x18   : > { %4461 = vmatpush3.bf16.msra.mxu1 %v4726_v14  ;;  %v868_v48 = vrot.slane %v866_v42, 1  ;;  %v856_v0 = vrot.slane %v854_v51, 1  ;;  %v883_v8 = vshll.u32 %v5212_v58, 16  ;;  %v4761_v10 = vld [vmem:[%s5981_s3 + $0x138] sm:$0xff]   ;;  %v4771_v22 = vld [vmem:[%s5981_s3 + $0x1c8] sm:$0xff]   ;;  %v1179_v50 = vrot.slane %v5208_v56, 1 }
  0x19   : > { %4182 = vmatpush3.bf16.msra.mxu0 %v4727_v15  ;;  %4462 = vmatprep.subr.bf16.mxu1 %v4985_v1  ;;  %v878_v2 = vshll.u32 %v3605_v57, 16  ;;  %v873_v4 = vrot.slane %v871_v61, 1  ;;  %v876_v6 = vshrl.u32 %v3605_v57, 16  ;;  %v4762_v11 = vld [vmem:[%s5981_s3 + $0x178] sm:$0xff]   ;;  %v4773_v25 = vld [vmem:[%s5981_s3 + $0x188] sm:$0xff]   ;;  %v1185_v51 = vrot.slane %v5212_v58, 1 }
  0x1a   : > { %4183 = vmatprep.subr.bf16.mxu0 %v4728_v16  ;;  %v869_v60 = vor.u32 %v868_v48, %v864_v44  ;;  %v885_v13 = vrot.slane %v883_v8, 1  ;;  %v4763_v14 = vld [vmem:[%s5981_s3 + $0xf8] sm:$0xff]   ;;  %v857_v15 = vor.u32 %v856_v0, %v852_v46  ;;  %v861_v16 = vrot.slane %v859_v5, 1  ;;  %v4785_v42 = vld [vmem:[%s5981_s3 + $0x1a8] sm:$0xff]   ;;  %v4786_v44 = vld [vmem:[%s5981_s3 + $0x1f0] sm:$0xff]  }
  0x1b   : > { %v880_v7 = vrot.slane %v878_v2, 1  ;;  %v4796_v57 = vld [vmem:[%s5981_s3 + $0x2c0] sm:$0xff]   ;;  %v4799_v61 = vld [vmem:[%s5981_s3 + $0x2c8] sm:$0xff]   ;;  %v4803_v5 = vld [vmem:[%s5981_s3 + $0x250] sm:$0xff]  }
  0x1c   : > { %4463 = vmatpush3.bf16.msra.mxu1 %v4729_v17  ;;  %v874_v9 = vsel %vm850_vm1, %v869_v60, %v873_v4  ;;  %v4768_v17 = vld [vmem:[%s5981_s3 + $0x1c0] sm:$0xff]   ;;  %v4798_v60 = vld [vmem:[%s5981_s3 + $0x288] sm:$0xff]   ;;  %v4802_v4 = vld [vmem:[%s5981_s3 + $0x2d0] sm:$0xff]  }
  0x1d   : > { %4184 = vmatpush3.bf16.msra.mxu0 %v4730_v18  ;;  %4464 = vmatprep.subr.bf16.mxu1 %v4985_v1  ;;  %v881_v12 = vor.u32 %v880_v7, %v876_v6  ;;  %v1418_v0 = vld [vmem:[%s5354_s15] sm:$0xff]  ;;  %v5368_v2 = vld [vmem:[%s5354_s15 + $0xc] sm:$0xff]  ;;  %v4804_v6 = vld [vmem:[%s5981_s3 + $0x298] sm:$0xff]  }
  0x1e   : > { %4185 = vmatprep.subr.bf16.mxu0 %v4731_v19  ;;  %v4769_v19 = vld [vmem:[%s5981_s3 + $0x200] sm:$0xff]   ;;  %v4805_v7 = vld [vmem:[%s5981_s3 + $0x2d8] sm:$0xff]  }
  0x1f   : > { %v886_v18 = vsel %vm850_vm1, %v881_v12, %v885_v13  ;;  %v4806_v8 = vld [vmem:[%s5981_s3 + $0x258] sm:$0xff]   ;;  %v4810_v12 = vld [vmem:[%s5981_s3 + $0x2a8] sm:$0xff]  }
  0x20   : > { %4465 = vmatpush3.bf16.msra.mxu1 %v4732_v20  ;;  %v862_v20 = vsel %vm850_vm1, %v857_v15, %v861_v16  ;;  %v4811_v13 = vld [vmem:[%s5981_s3 + $0x2e8] sm:$0xff]   ;;  %v4813_v15 = vld [vmem:[%s5981_s3 + $0x2b0] sm:$0xff]  }
  0x21   : > { %4186 = vmatpush3.bf16.msra.mxu0 %v4733_v21  ;;  %4466 = vmatprep.subr.bf16.mxu1 %v4985_v1  ;;  %v4770_v21 = vld [vmem:[%s5981_s3 + $0x180] sm:$0xff]   ;;  %v4814_v16 = vld [vmem:[%s5981_s3 + $0x2f0] sm:$0xff]  }
  0x22   : > { %4187 = vmatprep.subr.bf16.mxu0 %v4734_v24  ;;  %v4772_v24 = vld [vmem:[%s5981_s3 + $0x208] sm:$0xff]  }
  0x24   : > { %4467 = vmatpush3.bf16.msra.mxu1 %v4735_v26  ;;  %v4774_v26 = vld [vmem:[%s5981_s3 + $0x1d0] sm:$0xff]  }
  0x25   : > { %4188 = vmatpush3.bf16.msra.mxu0 %v4736_v27  ;;  %4472 = vmatprep.subr.bf16.mxu1 %v4985_v1  ;;  %v4775_v27 = vld [vmem:[%s5981_s3 + $0x210] sm:$0xff]  }
  0x26   : > { %4204 = vmatprep.subr.bf16.mxu0 %v4740_v28  ;;  %v4776_v28 = vld [vmem:[%s5981_s3 + $0x190] sm:$0xff]  }
  0x27   : > { %4469 = vmatmul.mubr.bf16.vlgmr.msra.gmra.mrb[0].mxu1 %v4739_v29  ;;  %v4777_v29 = vld [vmem:[%s5981_s3 + $0x1d8] sm:$0xff]  }
  0x28   : > { %723 = vmatmul.mubr.bf16.vlgmr.msra.gmra.mrb[0].mxu0 %v5139_v30  ;;  %4473 = vmatpush3.bf16.msra.mxu1 %v4741_v31  ;;  %v4778_v30 = vld [vmem:[%s5981_s3 + $0x218] sm:$0xff]  }
  0x29   : > { %4205 = vmatpush3.bf16.msra.mxu0 %v4742_v32  ;;  %4474 = vmatprep.subr.bf16.mxu1 %v4985_v1  ;;  %v4779_v31 = vld [vmem:[%s5981_s3 + $0x198] sm:$0xff]   ;;  %v1118_v32 = vld [vmem:[%s5107_s22] sm:$0xee] }
  0x2a   : > { %4206 = vmatprep.subr.bf16.mxu0 %v4743_v33  ;;  %4488 = vmatprep.mubr.msk.bf16.mxu1 %vm4986_vm0, %v4985_v1  ;;  %v4780_v33 = vld [vmem:[%s5981_s3 + $0x1e0] sm:$0xff]   ;;  %v3681_v48 = vcombine.low %v1118_v32, %v5118_v23 }
  0x2b   : > { %1066 = vmatprep.mubr.bf16.mxu0 %v874_v9  ;;  %v4807_v9 = vld [vmem:[%s5981_s3 + $0x2a0] sm:$0xff]  }
  0x2c   : > { %4475 = vmatpush3.bf16.msra.mxu1 %v4744_v34  ;;  %v3682_v34 = vcombine.high %v1118_v32, %v5118_v23  ;;  %v4791_v23 = vld [vmem:[%s5981_s3 + $0x1b8] sm:$0xff]  }
  0x2d   : > { %4207 = vmatpush3.bf16.msra.mxu0 %v4745_v35  ;;  %4476 = vmatprep.subr.bf16.mxu1 %v4985_v1  ;;  %v1182_v35 = vrot.slane %v5199_v52, 1  ;;  %v4790_v52 = vld [vmem:[%s5981_s3 + $0x238] sm:$0xff]  }
  0x2e   : > { %4208 = vmatprep.subr.bf16.mxu0 %v4746_v36  ;;  %v4781_v36 = vld [vmem:[%s5981_s3 + $0x220] sm:$0xff]  }
  0x30   : > { %4477 = vmatpush3.bf16.msra.mxu1 %v4747_v37  ;;  %v4782_v37 = vld [vmem:[%s5981_s3 + $0x1a0] sm:$0xff]  }
  0x31   : > { %4209 = vmatpush3.bf16.msra.mxu0 %v4748_v38  ;;  %4478 = vmatprep.subr.bf16.mxu1 %v4985_v1  ;;  %v1181_v38 = vrot.slane %v3682_v34, 1 }
  0x32   : > { %4210 = vmatprep.subr.bf16.mxu0 %v4749_v39  ;;  %v4783_v39 = vld [vmem:[%s5981_s3 + $0x1e8] sm:$0xff]  }
  0x34   : > { %4479 = vmatpush3.bf16.msra.mxu1 %v4750_v40  ;;  %v1183_v40 = vsel %vm1177_vm2, %v1181_v38, %v1182_v35  ;;  %v4826_v35 = vld [vmem:[%s5981_s3 + $0x388] sm:$0xff]   ;;  %v4828_v38 = vld [vmem:[%s5981_s3 + $0x350] sm:$0xff]  }
  0x35   : > { %4211 = vmatpush3.bf16.msra.mxu0 %v4751_v41  ;;  %4480 = vmatprep.subr.bf16.mxu1 %v4985_v1  ;;  %v4784_v41 = vld [vmem:[%s5981_s3 + $0x228] sm:$0xff]  }
  0x36   : > { %4212 = vmatprep.subr.bf16.mxu0 %v4752_v43  ;;  %v1119_v43 = vld [vmem:[%s5107_s22 + $0x8] sm:$0xe] }
  0x37   : > { %v3683_v46 = vcombine.low %v1119_v43, %v5203_v54  ;;  %v1178_v54 = vrot.slane %v3681_v48, 1  ;;  %v4832_v43 = vld [vmem:[%s5981_s3 + $0x398] sm:$0xff]   ;;  %v4835_v48 = vld [vmem:[%s5981_s3 + $0x3a0] sm:$0xff]  }
  0x38   : > { %4481 = vmatpush3.bf16.msra.mxu1 %v4753_v45  ;;  %v4787_v45 = vld [vmem:[%s5981_s3 + $0x230] sm:$0xff]  }
  0x39   : > { %4213 = vmatpush3.bf16.msra.mxu0 %v4754_v47  ;;  %4482 = vmatprep.subr.bf16.mxu1 %v4985_v1  ;;  %v4788_v47 = vld [vmem:[%s5981_s3 + $0x1b0] sm:$0xff]   ;;  %v1184_v53 = vrot.slane %v3683_v46, 1  ;;  %v1180_v58 = vsel %vm1177_vm2, %v1178_v54, %v1179_v50  ;;  %v4836_v50 = vld [vmem:[%s5981_s3 + $0x320] sm:$0xff]  }
  0x3a   : > { %4214 = vmatprep.subr.bf16.mxu0 %v4755_v49  ;;  %v4789_v49 = vld [vmem:[%s5981_s3 + $0x1f8] sm:$0xff]   ;;  %v5484_v46 = vld [vmem:[%s5354_s15 + $0x14] sm:$0xf] }
  0x3b   : > { %v1186_v56 = vsel %vm1177_vm2, %v1184_v53, %v1185_v51  ;;  %v4837_v51 = vld [vmem:[%s5981_s3 + $0x368] sm:$0xff]   ;;  %v5502_v53 = vld [vmem:[%s5354_s15 + $0x20] ss:$0 sps:$4 sm:$0x11]  }
  0x3c   : > { %4483 = vmatpush3.bf16.msra.mxu1 %v4756_v55  ;;  %v4795_v55 = vld [vmem:[%s5981_s3 + $0x280] sm:$0xff]  }
  0x3d   : > { %4215 = vmatpush3.bf16.msra.mxu0 %v4757_v59  ;;  %4484 = vmatprep.subr.bf16.mxu1 %v4985_v1  ;;  %v4797_v59 = vld [vmem:[%s5981_s3 + $0x240] sm:$0xff]  }
  0x3e   : > { %4216 = vmatprep.subr.bf16.mxu0 %v4758_v62  ;;  %v4800_v62 = vld [vmem:[%s5981_s3 + $0x248] sm:$0xff]  }
  0x40   : > { %4485 = vmatpush3.bf16.msra.mxu1 %v4759_v63  ;;  %v4801_v63 = vld [vmem:[%s5981_s3 + $0x290] sm:$0xff]  }
  0x41   : > { %4217 = vmatpush3.bf16.msra.mxu0 %v4760_v3  ;;  %4486 = vmatprep.subr.bf16.mxu1 %v4985_v1  ;;  %v3757_v3 = vcombine.high %v1418_v0, %v5368_v2 }
  0x42   : > { %4218 = vmatprep.subr.bf16.mxu0 %v4761_v10  ;;  %v4808_v10 = vld [vmem:[%s5981_s3 + $0x2e0] sm:$0xff]  }
  0x44   : > { %4487 = vmatpush3.bf16.msra.mxu1 %v4762_v11  ;;  %v4809_v11 = vld [vmem:[%s5981_s3 + $0x260] sm:$0xff]  }
  0x45   : > { %4219 = vmatpush3.bf16.msra.mxu0 %v4763_v14  ;;  %4492 = vmatprep.subr.bf16.mxu1 %v4985_v1  ;;  %v4812_v14 = vld [vmem:[%s5981_s3 + $0x268] sm:$0xff]  }
  0x46   : > { %4235 = vmatprep.subr.bf16.mxu0 %v4768_v17  ;;  %v4815_v17 = vld [vmem:[%s5981_s3 + $0x270] sm:$0xff]  }
  0x47   : > { %4489 = vmatmul.mubr.bf16.vlgmr.msra.gmra.mrb[0].mxu1 %v886_v18  ;;  %v4816_v18 = vld [vmem:[%s5981_s3 + $0x2b8] sm:$0xff]  }
  0x48   : > { %1067 = vmatmul.mubr.bf16.vlgmr.msra.gmra.mrb[4].mxu0 %v862_v20  ;;  %4493 = vmatpush3.bf16.msra.mxu1 %v4769_v19  ;;  %v4817_v19 = vld [vmem:[%s5981_s3 + $0x2f8] sm:$0xff]   ;;  %v1806_v20 = vshll.u32 %v3757_v3, 16 }
  0x49   : > { %4236 = vmatpush3.bf16.msra.mxu0 %v4770_v21  ;;  %4494 = vmatprep.subr.bf16.mxu1 %v4985_v1  ;;  %v4818_v21 = vld [vmem:[%s5981_s3 + $0x278] sm:$0xff]  }
  0x4a   : > { %4237 = vmatprep.subr.bf16.mxu0 %v4771_v22  ;;  %4508 = vmatprep.mubr.msk.bf16.mxu1 %vm4986_vm0, %v4985_v1  ;;  %v4821_v22 = vld [vmem:[%s5354_s15 + $0x8] ss:$12 sps:$4 sm:$0xff]  }
  0x4b   : > { %1366 = vmatprep.mubr.bf16.mxu0 %v1183_v40 }
  0x4c   : > { %4495 = vmatpush3.bf16.msra.mxu1 %v4772_v24  ;;  %v4822_v24 = vld [vmem:[%s5981_s3 + $0x340] sm:$0xff]  }
  0x4d   : > { %4238 = vmatpush3.bf16.msra.mxu0 %v4773_v25  ;;  %4496 = vmatprep.subr.bf16.mxu1 %v4985_v1  ;;  %v1804_v25 = vshrl.u32 %v3757_v3, 16 }
  0x4e   : > { %4239 = vmatprep.subr.bf16.mxu0 %v4774_v26  ;;  %v1808_v26 = vrot.slane %v1806_v20, 1  ;;  %v4853_v20 = vld [vmem:[%s5981_s3 + $0x408] sm:$0xff]  }
  0x50   : > { %4497 = vmatpush3.bf16.msra.mxu1 %v4775_v27  ;;  %v5435_v27 = vcombine.low %v1418_v0, %v5368_v2  ;;  %v4842_v0 = vld [vmem:[%s5981_s3 + $0x330] sm:$0xff]  }
  0x51   : > { %4240 = vmatpush3.bf16.msra.mxu0 %v4776_v28  ;;  %4498 = vmatprep.subr.bf16.mxu1 %v4985_v1  ;;  %v4823_v28 = vld [vmem:[%s5981_s3 + $0x380] sm:$0xff]  }
  0x52   : > { %4241 = vmatprep.subr.bf16.mxu0 %v4777_v29  ;;  %v1719_v29 = vld [vmem:[%s5354_s15 + $0x18] sm:$0x11] }
  0x53   : > { %v5448_v32 = vcombine.high %v1719_v29, %v1719_v29 }
  0x54   : > { %4499 = vmatpush3.bf16.msra.mxu1 %v4778_v30  ;;  %v4824_v30 = vld [vmem:[%s5981_s3 + $0x300] sm:$0xff]  }
  0x55   : > { %4242 = vmatpush3.bf16.msra.mxu0 %v4779_v31  ;;  %4500 = vmatprep.subr.bf16.mxu1 %v4985_v1  ;;  %v4825_v31 = vld [vmem:[%s5981_s3 + $0x348] sm:$0xff]   ;;  %v1811_v34 = vshll.u32 %v5448_v32, 16 }
  0x56   : > { %4243 = vmatprep.subr.bf16.mxu0 %v4780_v33  ;;  %v1809_v33 = vor.u32 %v1808_v26, %v1804_v25  ;;  %v4856_v25 = vld [vmem:[%s5981_s3 + $0x410] sm:$0xff]  }
  0x57   : > { %v4857_v26 = vld [vmem:[%s5981_s3 + $0x450] sm:$0xff]  }
  0x58   : > { %4501 = vmatpush3.bf16.msra.mxu1 %v4781_v36  ;;  %v4827_v36 = vld [vmem:[%s5981_s3 + $0x308] sm:$0xff]  }
  0x59   : > { %4244 = vmatpush3.bf16.msra.mxu0 %v4782_v37  ;;  %4502 = vmatprep.subr.bf16.mxu1 %v4985_v1  ;;  %v1813_v37 = vrot.slane %v1811_v34, 1  ;;  %v4865_v34 = vld [vmem:[%s5981_s3 + $0x428] sm:$0xff]  }
  0x5a   : > { %4245 = vmatprep.subr.bf16.mxu0 %v4783_v39  ;;  %v4829_v39 = vld [vmem:[%s5981_s3 + $0x390] sm:$0xff]  }
  0x5b   : > { %v1814_v40 = vsel %vm850_vm1, %v1809_v33, %v1813_v37  ;;  %v4864_v33 = vld [vmem:[%s5981_s3 + $0x3e0] sm:$0xff]   ;;  %v2059_v37 = vld [vmem:[%s5354_s15 + $0x8] sm:$0xe] }
  0x5c   : > { %4503 = vmatpush3.bf16.msra.mxu1 %v4784_v41  ;;  %v4830_v41 = vld [vmem:[%s5981_s3 + $0x310] sm:$0xff]  }
  0x5d   : > { %4246 = vmatpush3.bf16.msra.mxu0 %v4785_v42  ;;  %4504 = vmatprep.subr.bf16.mxu1 %v4985_v1  ;;  %v4831_v42 = vld [vmem:[%s5981_s3 + $0x358] sm:$0xff]  }
  0x5e   : > { %4247 = vmatprep.subr.bf16.mxu0 %v4786_v44  ;;  %v4833_v44 = vld [vmem:[%s5981_s3 + $0x318] sm:$0xff]  }
  0x60   : > { %4505 = vmatpush3.bf16.msra.mxu1 %v4787_v45  ;;  %v1716_v45 = vld [vmem:[%s5354_s15 + $0x8] sm:$0xf] }
  0x61   : > { %4248 = vmatpush3.bf16.msra.mxu0 %v4788_v47  ;;  %4506 = vmatprep.subr.bf16.mxu1 %v4985_v1  ;;  %v4834_v47 = vld [vmem:[%s5981_s3 + $0x360] sm:$0xff]  }
  0x62   : > { %4249 = vmatprep.subr.bf16.mxu0 %v4789_v49  ;;  %v3833_v49 = vcombine.low %v1716_v45, %v5484_v46  ;;  %v4872_v45 = vld [vmem:[%s5981_s3 + $0x478] sm:$0xff]  }
  0x64   : > { %4507 = vmatpush3.bf16.msra.mxu1 %v4790_v52  ;;  %v1794_v52 = vshll.u32 %v5435_v27, 16  ;;  %v1818_v54 = vshll.u32 %v3833_v49, 16 }
  0x65   : > { %4250 = vmatpush3.bf16.msra.mxu0 %v4791_v23  ;;  %4512 = vmatprep.subr.bf16.mxu1 %v4985_v1  ;;  %v4838_v23 = vld [vmem:[%s5981_s3 + $0x3a8] sm:$0xff]  }
  0x66   : > { %4266 = vmatprep.subr.bf16.mxu0 %v4795_v55  ;;  %v4839_v55 = vld [vmem:[%s5981_s3 + $0x328] sm:$0xff]  }
  0x67   : > { %4509 = vmatmul.mubr.bf16.vlgmr.msra.gmra.mrb[0].mxu1 %v1186_v56  ;;  %v5511_v56 = vcombine.low %v1719_v29, %v1719_v29  ;;  %v4860_v29 = vld [vmem:[%s5981_s3 + $0x458] sm:$0xff]  }
  0x68   : > { %1367 = vmatmul.mubr.bf16.vlgmr.msra.gmra.mrb[8].mxu0 %v1180_v58  ;;  %4513 = vmatpush3.bf16.msra.mxu1 %v4796_v57  ;;  %v1792_v57 = vshrl.u32 %v5435_v27, 16  ;;  %v4840_v58 = vld [vmem:[%s5981_s3 + $0x370] sm:$0xff]  }
  0x69   : > { %4267 = vmatpush3.bf16.msra.mxu0 %v4797_v59  ;;  %4514 = vmatprep.subr.bf16.mxu1 %v4985_v1  ;;  %v1796_v59 = vrot.slane %v1794_v52, 1 }
  0x6a   : > { %4268 = vmatprep.subr.bf16.mxu0 %v4798_v60  ;;  %4528 = vmatprep.mubr.msk.bf16.mxu1 %vm4986_vm0, %v4985_v1  ;;  %v4841_v60 = vld [vmem:[%s5981_s3 + $0x3b0] sm:$0xff]  }
  0x6b   : > { %1663 = vmatprep.mubr.bf16.mxu0 %v3757_v3  ;;  %v1799_v3 = vshll.u32 %v5511_v56, 16 }
  0x6c   : > { %4515 = vmatpush3.bf16.msra.mxu1 %v4799_v61  ;;  %v1816_v61 = vshrl.u32 %v3833_v49, 16  ;;  %v4877_v49 = vld [vmem:[%s5981_s3 + $0x4c0] sm:$0xff]  }
  0x6d   : > { %4269 = vmatpush3.bf16.msra.mxu0 %v4800_v62  ;;  %4516 = vmatprep.subr.bf16.mxu1 %v4985_v1  ;;  %v1820_v62 = vrot.slane %v1818_v54, 1  ;;  %v4879_v54 = vld [vmem:[%s5981_s3 + $0x480] sm:$0xff]  }
  0x6e   : > { %4270 = vmatprep.subr.bf16.mxu0 %v4801_v63  ;;  %v1823_v63 = vshll.u32 %v5502_v53, 16 }
  0x70   : > { %4517 = vmatpush3.bf16.msra.mxu1 %v4802_v4  ;;  %v4843_v4 = vld [vmem:[%s5981_s3 + $0x378] sm:$0xff]  }
  0x71   : > { %4271 = vmatpush3.bf16.msra.mxu0 %v4803_v5  ;;  %4518 = vmatprep.subr.bf16.mxu1 %v4985_v1  ;;  %v5530_v5 = vld [vmem:[%s5354_s15] sm:$0xee] }
  0x72   : > { %4272 = vmatprep.subr.bf16.mxu0 %v4804_v6  ;;  %v3910_v6 = vcombine.high %v5530_v5, %v5368_v2 }
  0x74   : > { %4519 = vmatpush3.bf16.msra.mxu1 %v4805_v7  ;;  %v4844_v7 = vld [vmem:[%s5981_s3 + $0x3b8] sm:$0xff]  }
  0x75   : > { %4273 = vmatpush3.bf16.msra.mxu0 %v4806_v8  ;;  %4520 = vmatprep.subr.bf16.mxu1 %v4985_v1  ;;  %v1821_v8 = vor.u32 %v1820_v62, %v1816_v61  ;;  %v4884_v61 = vld [vmem:[%s5981_s3 + $0x510] sm:$0xff]  }
  0x76   : > { %4274 = vmatprep.subr.bf16.mxu0 %v4807_v9  ;;  %v1825_v9 = vrot.slane %v1823_v63, 1  ;;  %v4885_v62 = vld [vmem:[%s5981_s3 + $0x490] sm:$0xff]   ;;  %v4886_v63 = vld [vmem:[%s5981_s3 + $0x4d8] sm:$0xff]  }
  0x78   : > { %4521 = vmatpush3.bf16.msra.mxu1 %v4808_v10  ;;  %v4845_v10 = vld [vmem:[%s5981_s3 + $0x338] sm:$0xff]  }
  0x79   : > { %4275 = vmatpush3.bf16.msra.mxu0 %v4809_v11  ;;  %4522 = vmatprep.subr.bf16.mxu1 %v4985_v1  ;;  %v1797_v11 = vor.u32 %v1796_v59, %v1792_v57  ;;  %v4881_v57 = vld [vmem:[%s5981_s3 + $0x508] sm:$0xff]  }
  0x7a   : > { %4276 = vmatprep.subr.bf16.mxu0 %v4810_v12  ;;  %v1801_v12 = vrot.slane %v1799_v3, 1  ;;  %v4882_v59 = vld [vmem:[%s5981_s3 + $0x488] sm:$0xff]   ;;  %v4888_v3 = vld [vmem:[%s5981_s3 + $0x498] sm:$0xff]  }
  0x7c   : > { %4523 = vmatpush3.bf16.msra.mxu1 %v4811_v13  ;;  %v4850_v13 = vld [vmem:[%s5981_s3 + $0x400] sm:$0xff]  }
  0x7d   : > { %4277 = vmatpush3.bf16.msra.mxu0 %v4812_v14  ;;  %4524 = vmatprep.subr.bf16.mxu1 %v4985_v1  ;;  %v2120_v14 = vrot.slane %v3910_v6, 1  ;;  %v4891_v6 = vld [vmem:[%s5981_s3 + $0x4a0] sm:$0xff]  }
  0x7e   : > { %4278 = vmatprep.subr.bf16.mxu0 %v4813_v15  ;;  %v2121_v15 = vrot.slane %v5448_v32, 1  ;;  %v4863_v32 = vld [vmem:[%s5981_s3 + $0x460] sm:$0xff]  }
  0x80   : > { %4525 = vmatpush3.bf16.msra.mxu1 %v4814_v16  ;;  %v1826_v16 = vsel %vm850_vm1, %v1821_v8, %v1825_v9  ;;  %v4893_v8 = vld [vmem:[%s5981_s3 + $0x528] sm:$0xff]   ;;  %v5716_v9 = vld [vmem:[%s5607_s26 + $0x18] sm:$0x11] }
  0x81   : > { %4279 = vmatpush3.bf16.msra.mxu0 %v4815_v17  ;;  %4526 = vmatprep.subr.bf16.mxu1 %v4985_v1  ;;  %v4851_v17 = vld [vmem:[%s5981_s3 + $0x440] sm:$0xff]  }
  0x82   : > { %4280 = vmatprep.subr.bf16.mxu0 %v4816_v18  ;;  %v1802_v18 = vsel %vm850_vm1, %v1797_v11, %v1801_v12  ;;  %v4895_v11 = vld [vmem:[%s5981_s3 + $0x4f0] sm:$0xff]  }
  0x83   : > { %v4896_v12 = vld [vmem:[%s5981_s3 + $0x530] sm:$0xff]  }
  0x84   : > { %4527 = vmatpush3.bf16.msra.mxu1 %v4817_v19  ;;  %v4852_v19 = vld [vmem:[%s5981_s3 + $0x3c0] sm:$0xff]  }
  0x85   : > { %4281 = vmatpush3.bf16.msra.mxu0 %v4818_v21  ;;  %4532 = vmatprep.subr.bf16.mxu1 %v4985_v1  ;;  %v2122_v21 = vsel %vm1177_vm2, %v2120_v14, %v2121_v15  ;;  %v4897_v15 = vld [vmem:[%s5981_s3 + $0x4b0] sm:$0xff]  }
  0x86   : > { %4297 = vmatprep.subr.bf16.mxu0 %v4822_v24  ;;  %v4855_v24 = vld [vmem:[%s5981_s3 + $0x3c8] sm:$0xff]  }
  0x87   : > { %4529 = vmatmul.mubr.bf16.vlgmr.msra.gmra.mrb[0].mxu1 %v4821_v22  ;;  %v4854_v22 = vld [vmem:[%s5981_s3 + $0x448] sm:$0xff]  }
  0x88   : > { %1664 = vmatmul.mubr.bf16.vlgmr.msra.gmra.mrb[12].mxu0 %v5435_v27  ;;  %4533 = vmatpush3.bf16.msra.mxu1 %v4823_v28  ;;  %v4858_v27 = vld [vmem:[%s5981_s3 + $0x3d0] sm:$0xff]   ;;  %v4859_v28 = vld [vmem:[%s5981_s3 + $0x418] sm:$0xff]  }
  0x89   : > { %4298 = vmatpush3.bf16.msra.mxu0 %v4824_v30  ;;  %4534 = vmatprep.subr.bf16.mxu1 %v4985_v1  ;;  %v4861_v30 = vld [vmem:[%s5981_s3 + $0x3d8] sm:$0xff]  }
  0x8a   : > { %4299 = vmatprep.subr.bf16.mxu0 %v4825_v31  ;;  %4548 = vmatprep.mubr.msk.bf16.mxu1 %vm4986_vm0, %v4985_v1  ;;  %v4862_v31 = vld [vmem:[%s5981_s3 + $0x420] sm:$0xff]  }
  0x8b   : > { %2006 = vmatprep.mubr.bf16.mxu0 %v1814_v40  ;;  %v3911_v40 = vcombine.low %v2059_v37, %v5484_v46  ;;  %v2124_v46 = vrot.slane %v5502_v53, 1  ;;  %v4878_v53 = vld [vmem:[%s5981_s3 + $0x500] sm:$0xff]   ;;  %v4912_v37 = vld [vmem:[%s5981_s3 + $0x550] sm:$0xff]  }
  0x8c   : > { %4535 = vmatpush3.bf16.msra.mxu1 %v4826_v35  ;;  %v4866_v35 = vld [vmem:[%s5981_s3 + $0x468] sm:$0xff]  }
  0x8d   : > { %4300 = vmatpush3.bf16.msra.mxu0 %v4827_v36  ;;  %4536 = vmatprep.subr.bf16.mxu1 %v4985_v1  ;;  %v4867_v36 = vld [vmem:[%s5981_s3 + $0x3e8] sm:$0xff]  }
  0x8e   : > { %4301 = vmatprep.subr.bf16.mxu0 %v4828_v38  ;;  %v4868_v38 = vld [vmem:[%s5981_s3 + $0x430] sm:$0xff]  }
  0x90   : > { %4537 = vmatpush3.bf16.msra.mxu1 %v4829_v39  ;;  %v4869_v39 = vld [vmem:[%s5981_s3 + $0x470] sm:$0xff]  }
  0x91   : > { %4302 = vmatpush3.bf16.msra.mxu0 %v4830_v41  ;;  %4538 = vmatprep.subr.bf16.mxu1 %v4985_v1  ;;  %v4870_v41 = vld [vmem:[%s5981_s3 + $0x3f0] sm:$0xff]  }
  0x92   : > { %4303 = vmatprep.subr.bf16.mxu0 %v4831_v42  ;;  %v3909_v42 = vcombine.low %v5530_v5, %v5368_v2  ;;  %v4890_v5 = vld [vmem:[%s5981_s3 + $0x520] sm:$0xff]  }
  0x94   : > { %4539 = vmatpush3.bf16.msra.mxu1 %v4832_v43  ;;  %v4871_v43 = vld [vmem:[%s5981_s3 + $0x438] sm:$0xff]   ;;  %v2117_v2 = vrot.slane %v3909_v42, 1  ;;  %v2655_v42 = vld [vmem:[%s5607_s26 + $0x8] sm:$0xf] }
  0x95   : > { %4304 = vmatpush3.bf16.msra.mxu0 %v4833_v44  ;;  %4540 = vmatprep.subr.bf16.mxu1 %v4985_v1  ;;  %v2118_v44 = vrot.slane %v5511_v56, 1 }
  0x96   : > { %4305 = vmatprep.subr.bf16.mxu0 %v4834_v47  ;;  %v4873_v47 = vld [vmem:[%s5981_s3 + $0x3f8] sm:$0xff]  }
  0x98   : > { %4541 = vmatpush3.bf16.msra.mxu1 %v4835_v48  ;;  %v2123_v48 = vrot.slane %v3911_v40, 1  ;;  %v4914_v40 = vld [vmem:[%s5981_s3 + $0x5d8] sm:$0xff]  }
  0x99   : > { %4306 = vmatpush3.bf16.msra.mxu0 %v4836_v50  ;;  %4542 = vmatprep.subr.bf16.mxu1 %v4985_v1  ;;  %v5643_v50 = vld [vmem:[%s5607_s26] sm:$0xff] }
  0x9a   : > { %4307 = vmatprep.subr.bf16.mxu0 %v4837_v51  ;;  %v5646_v51 = vld [vmem:[%s5607_s26 + $0xc] sm:$0xff]  ;;  %v2125_v52 = vsel %vm1177_vm2, %v2123_v48, %v2124_v46 }
  0x9b   : > { %v5662_v56 = vcombine.high %v5643_v50, %v5646_v51  ;;  %v4919_v48 = vld [vmem:[%s5981_s3 + $0x5a8] sm:$0xff]  }
  0x9c   : > { %4543 = vmatpush3.bf16.msra.mxu1 %v4838_v23  ;;  %v2119_v23 = vsel %vm1177_vm2, %v2117_v2, %v2118_v44  ;;  %v4916_v44 = vld [vmem:[%s5981_s3 + $0x5a0] sm:$0xff]   ;;  %v4920_v2 = vld [vmem:[%s5981_s3 + $0x5e8] sm:$0xff]  }
  0x9d   : > { %4308 = vmatpush3.bf16.msra.mxu0 %v4839_v55  ;;  %4544 = vmatprep.subr.bf16.mxu1 %v4985_v1  ;;  %v4880_v55 = vld [vmem:[%s5981_s3 + $0x4c8] sm:$0xff]   ;;  %v2745_v14 = vshll.u32 %v5662_v56, 16 }
  0x9e   : > { %4309 = vmatprep.subr.bf16.mxu0 %v4840_v58  ;;  %v3527_v58 = vld [vmem:[%s5982_s4] ss:$0 sm:$0xff] }
  0x9f   : > { %474 = vst.msk [vmem:[#allocation2] sm:$0xff] %vm473_vm3, %v3527_v58  ;;  %475 = vst.msk [vmem:[#allocation2 + $0x8] sm:$0xff] %vm473_vm3, %v3527_v58 }
  0xa0   : > { %4545 = vmatpush3.bf16.msra.mxu1 %v4841_v60  ;;  %v4883_v60 = vld [vmem:[%s5981_s3 + $0x4d0] sm:$0xff]  }
  0xa1   : > { %4310 = vmatpush3.bf16.msra.mxu0 %v4842_v0  ;;  %4546 = vmatprep.subr.bf16.mxu1 %v4985_v1  ;;  %v4887_v0 = vld [vmem:[%s5981_s3 + $0x518] sm:$0xff]  }
  0xa2   : > { %4311 = vmatprep.subr.bf16.mxu0 %v4843_v4  ;;  %v4889_v4 = vld [vmem:[%s5981_s3 + $0x4e0] sm:$0xff]  }
  0xa4   : > { %4547 = vmatpush3.bf16.msra.mxu1 %v4844_v7  ;;  %v4892_v7 = vld [vmem:[%s5981_s3 + $0x4e8] sm:$0xff]  }
  0xa5   : > { %4312 = vmatpush3.bf16.msra.mxu0 %v4845_v10  ;;  %4552 = vmatprep.subr.bf16.mxu1 %v4985_v1  ;;  %v4894_v10 = vld [vmem:[%s5981_s3 + $0x4a8] sm:$0xff]  }
  0xa6   : > { %4328 = vmatprep.subr.bf16.mxu0 %v4850_v13  ;;  %v5730_v13 = vcombine.high %v5716_v9, %v5716_v9 }
  0xa7   : > { %4549 = vmatmul.mubr.bf16.vlgmr.msra.gmra.mrb[0].mxu1 %v1826_v16  ;;  %v4898_v16 = vld [vmem:[%s5981_s3 + $0x4f8] sm:$0xff]  }
  0xa8   : > { %2007 = vmatmul.mubr.bf16.vlgmr.msra.gmra.mrb[16].mxu0 %v1802_v18  ;;  %4553 = vmatpush3.bf16.msra.mxu1 %v4851_v17  ;;  %v4899_v17 = vld [vmem:[%s5981_s3 + $0x538] sm:$0xff]   ;;  %v2743_v18 = vshrl.u32 %v5662_v56, 16 }
  0xa9   : > { %4329 = vmatpush3.bf16.msra.mxu0 %v4852_v19  ;;  %4554 = vmatprep.subr.bf16.mxu1 %v4985_v1  ;;  %v2747_v19 = vrot.slane %v2745_v14, 1 }
  0xaa   : > { %4330 = vmatprep.subr.bf16.mxu0 %v4853_v20  ;;  %2305 = vmatprep.mubr.bf16.mxu0 %v2122_v21  ;;  %v2750_v20 = vshll.u32 %v5730_v13, 16  ;;  %v4900_v21 = vld [vmem:[%s5981_s3 + $0x4b8] sm:$0xff]  }
  0xab   : > { %4568 = vmatprep.mubr.msk.bf16.mxu1 %vm4986_vm0, %v4985_v1 }
  0xac   : > { %4555 = vmatpush3.bf16.msra.mxu1 %v4854_v22  ;;  %v4903_v22 = vld [vmem:[%s5607_s26 + $0x8] ss:$12 sps:$4 sm:$0xff]  }
  0xad   : > { %4331 = vmatpush3.bf16.msra.mxu0 %v4855_v24  ;;  %4556 = vmatprep.subr.bf16.mxu1 %v4985_v1  ;;  %v4904_v24 = vld [vmem:[%s5981_s3 + $0x580] sm:$0xff]  }
  0xae   : > { %4332 = vmatprep.subr.bf16.mxu0 %v4856_v25  ;;  %v2748_v25 = vor.u32 %v2747_v19, %v2743_v18  ;;  %v4933_v18 = vld [vmem:[%s5981_s3 + $0x680] sm:$0xff]  }
  0xb0   : > { %4557 = vmatpush3.bf16.msra.mxu1 %v4857_v26  ;;  %v2752_v26 = vrot.slane %v2750_v20, 1  ;;  %v3060_v20 = vrot.slane %v5730_v13, 1  ;;  %v4936_v13 = vld [vmem:[%s5981_s3 + $0x688] sm:$0xff]  }
  0xb1   : > { %4333 = vmatpush3.bf16.msra.mxu0 %v4858_v27  ;;  %4558 = vmatprep.subr.bf16.mxu1 %v4985_v1  ;;  %v5755_v27 = vcombine.low %v5643_v50, %v5646_v51 }
  0xb2   : > { %4334 = vmatprep.subr.bf16.mxu0 %v4859_v28  ;;  %v4905_v28 = vld [vmem:[%s5981_s3 + $0x5c0] sm:$0xff]  }
  0xb4   : > { %4559 = vmatpush3.bf16.msra.mxu1 %v4860_v29  ;;  %v4906_v29 = vld [vmem:[%s5981_s3 + $0x540] sm:$0xff]  }
  0xb5   : > { %4335 = vmatpush3.bf16.msra.mxu0 %v4861_v30  ;;  %4560 = vmatprep.subr.bf16.mxu1 %v4985_v1  ;;  %v4907_v30 = vld [vmem:[%s5981_s3 + $0x588] sm:$0xff]  }
  0xb6   : > { %4336 = vmatprep.subr.bf16.mxu0 %v4862_v31  ;;  %v2753_v31 = vsel %vm850_vm1, %v2748_v25, %v2752_v26  ;;  %v4937_v26 = vld [vmem:[%s5981_s3 + $0x608] sm:$0xff]  }
  0xb8   : > { %4561 = vmatpush3.bf16.msra.mxu1 %v4863_v32  ;;  %v4908_v32 = vld [vmem:[%s5981_s3 + $0x5c8] sm:$0xff]  }
  0xb9   : > { %4337 = vmatpush3.bf16.msra.mxu0 %v4864_v33  ;;  %4562 = vmatprep.subr.bf16.mxu1 %v4985_v1  ;;  %v4909_v33 = vld [vmem:[%s5981_s3 + $0x548] sm:$0xff]  }
  0xba   : > { %4338 = vmatprep.subr.bf16.mxu0 %v4865_v34  ;;  %v4910_v34 = vld [vmem:[%s5981_s3 + $0x590] sm:$0xff]  }
  0xbc   : > { %4563 = vmatpush3.bf16.msra.mxu1 %v4866_v35  ;;  %v4911_v35 = vld [vmem:[%s5981_s3 + $0x5d0] sm:$0xff]  }
  0xbd   : > { %4339 = vmatpush3.bf16.msra.mxu0 %v4867_v36  ;;  %4564 = vmatprep.subr.bf16.mxu1 %v4985_v1  ;;  %v5785_v36 = vld [vmem:[%s5607_s26] sm:$0xee] }
  0xbe   : > { %4340 = vmatprep.subr.bf16.mxu0 %v4868_v38  ;;  %v4137_v38 = vcombine.low %v5785_v36, %v5646_v51 }
  0xc0   : > { %4565 = vmatpush3.bf16.msra.mxu1 %v4869_v39  ;;  %v4913_v39 = vld [vmem:[%s5981_s3 + $0x598] sm:$0xff]  }
  0xc1   : > { %4341 = vmatpush3.bf16.msra.mxu0 %v4870_v41  ;;  %4566 = vmatprep.subr.bf16.mxu1 %v4985_v1  ;;  %v4915_v41 = vld [vmem:[%s5981_s3 + $0x558] sm:$0xff]  }
  0xc2   : > { %4342 = vmatprep.subr.bf16.mxu0 %v4871_v43  ;;  %v5805_v43 = vld [vmem:[%s5607_s26 + $0x14] sm:$0xf] }
  0xc3   : > { %v4061_v46 = vcombine.low %v2655_v42, %v5805_v43  ;;  %v476_v42 = vld [vmem:[#allocation2] sm:$0xff] }
  0xc4   : > { %4567 = vmatpush3.bf16.msra.mxu1 %v4872_v45  ;;  %v4917_v45 = vld [vmem:[%s5981_s3 + $0x5e0] sm:$0xff]  }
  0xc5   : > { %4343 = vmatpush3.bf16.msra.mxu0 %v4873_v47  ;;  %4572 = vmatprep.subr.bf16.mxu1 %v4985_v1  ;;  %v4918_v47 = vld [vmem:[%s5981_s3 + $0x560] sm:$0xff]   ;;  %v2757_v50 = vshll.u32 %v4061_v46, 16  ;;  %v2755_v58 = vshrl.u32 %v4061_v46, 16  ;;  %v477_v46 = vld [vmem:[#allocation2 + $0x8] sm:$0xff] }
  0xc6   : > { %4359 = vmatprep.subr.bf16.mxu0 %v4877_v49  ;;  %v5825_v49 = vld [vmem:[%s5607_s26 + $0x20] ss:$0 sps:$4 sm:$0x11]  }
  0xc7   : > { %4569 = vmatmul.mubr.bf16.vlgmr.msra.gmra.mrb[0].mxu1 %v2125_v52  ;;  %v4921_v52 = vld [vmem:[%s5981_s3 + $0x568] sm:$0xff]  }
  0xc8   : > { %2306 = vmatmul.mubr.bf16.vlgmr.msra.gmra.mrb[20].mxu0 %v2119_v23  ;;  %4573 = vmatpush3.bf16.msra.mxu1 %v4878_v53  ;;  %v5833_v53 = vcombine.low %v5716_v9, %v5716_v9  ;;  %v2733_v23 = vshll.u32 %v5755_v27, 16 }
  0xc9   : > { %4360 = vmatpush3.bf16.msra.mxu0 %v4879_v54  ;;  %4574 = vmatprep.subr.bf16.mxu1 %v4985_v1  ;;  %v4922_v54 = vld [vmem:[%s5981_s3 + $0x5b0] sm:$0xff]  }
  0xca   : > { %4361 = vmatprep.subr.bf16.mxu0 %v4880_v55  ;;  %2602 = vmatprep.mubr.bf16.mxu0 %v5662_v56 }
  0xcb   : > { %4588 = vmatprep.mubr.msk.bf16.mxu1 %vm4986_vm0, %v4985_v1 }
  0xcc   : > { %4575 = vmatpush3.bf16.msra.mxu1 %v4881_v57  ;;  %v4923_v57 = vld [vmem:[%s5981_s3 + $0x5f0] sm:$0xff]  }
  0xcd   : > { %4362 = vmatpush3.bf16.msra.mxu0 %v4882_v59  ;;  %4576 = vmatprep.subr.bf16.mxu1 %v4985_v1  ;;  %v2759_v59 = vrot.slane %v2757_v50, 1 }
  0xce   : > { %4363 = vmatprep.subr.bf16.mxu0 %v4883_v60  ;;  %v2762_v60 = vshll.u32 %v5825_v49, 16 }
  0xcf   : > { %v2760_v9 = vor.u32 %v2759_v59, %v2755_v58  ;;  %v4954_v59 = vld [vmem:[%s5981_s3 + $0x6b8] sm:$0xff]  }
  0xd0   : > { %4577 = vmatpush3.bf16.msra.mxu1 %v4884_v61 }
  0xd1   : > { %4364 = vmatpush3.bf16.msra.mxu0 %v4885_v62  ;;  %4578 = vmatprep.subr.bf16.mxu1 %v4985_v1 }
  0xd2   : > { %4365 = vmatprep.subr.bf16.mxu0 %v4886_v63  ;;  %v4924_v63 = vld [vmem:[%s5981_s3 + $0x570] sm:$0xff]  }
  0xd4   : > { %4579 = vmatpush3.bf16.msra.mxu1 %v4887_v0  ;;  %v2731_v0 = vshrl.u32 %v5755_v27, 16 }
  0xd5   : > { %4366 = vmatpush3.bf16.msra.mxu0 %v4888_v3  ;;  %4580 = vmatprep.subr.bf16.mxu1 %v4985_v1  ;;  %v2735_v3 = vrot.slane %v2733_v23, 1 }
  0xd6   : > { %4367 = vmatprep.subr.bf16.mxu0 %v4889_v4  ;;  %v2738_v4 = vshll.u32 %v5833_v53, 16 }
  0xd7   : > { %v2736_v14 = vor.u32 %v2735_v3, %v2731_v0  ;;  %v3056_v0 = vrot.slane %v4137_v38, 1  ;;  %v3057_v3 = vrot.slane %v5833_v53, 1 }
  0xd8   : > { %4581 = vmatpush3.bf16.msra.mxu1 %v4890_v5 }
  0xd9   : > { %4368 = vmatpush3.bf16.msra.mxu0 %v4891_v6  ;;  %4582 = vmatprep.subr.bf16.mxu1 %v4985_v1  ;;  %v4925_v6 = vld [vmem:[%s5981_s3 + $0x5b8] sm:$0xff]  }
  0xda   : > { %4369 = vmatprep.subr.bf16.mxu0 %v4892_v7 }
  0xdc   : > { %4583 = vmatpush3.bf16.msra.mxu1 %v4893_v8  ;;  %v4926_v8 = vld [vmem:[%s5981_s3 + $0x5f8] sm:$0xff]  }
  0xdd   : > { %4370 = vmatpush3.bf16.msra.mxu0 %v4894_v10  ;;  %4584 = vmatprep.subr.bf16.mxu1 %v4985_v1  ;;  %v2764_v10 = vrot.slane %v2762_v60, 1 }
  0xde   : > { %4371 = vmatprep.subr.bf16.mxu0 %v4895_v11  ;;  %v4138_v11 = vcombine.high %v5785_v36, %v5646_v51 }
  0xe0   : > { %4585 = vmatpush3.bf16.msra.mxu1 %v4896_v12  ;;  %v4927_v12 = vld [vmem:[%s5981_s3 + $0x578] sm:$0xff]   ;;  %v3059_v19 = vrot.slane %v4138_v11, 1 }
  0xe1   : > { %4372 = vmatpush3.bf16.msra.mxu0 %v4897_v15  ;;  %4586 = vmatprep.subr.bf16.mxu1 %v4985_v1  ;;  %v2740_v15 = vrot.slane %v2738_v4, 1 }
  0xe2   : > { %4373 = vmatprep.subr.bf16.mxu0 %v4898_v16  ;;  %v4932_v16 = vld [vmem:[%s5981_s3 + $0x640] sm:$0xff]   ;;  %v3061_v25 = vsel %vm1177_vm2, %v3059_v19, %v3060_v20 }
  0xe4   : > { %4587 = vmatpush3.bf16.msra.mxu1 %v4899_v17  ;;  %v2765_v17 = vsel %vm850_vm1, %v2760_v9, %v2764_v10 }
  0xe5   : > { %4374 = vmatpush3.bf16.msra.mxu0 %v4900_v21  ;;  %4592 = vmatprep.subr.bf16.mxu1 %v4985_v1  ;;  %v2741_v21 = vsel %vm850_vm1, %v2736_v14, %v2740_v15 }
  0xe6   : > { %4390 = vmatprep.subr.bf16.mxu0 %v4904_v24  ;;  %v4935_v24 = vld [vmem:[%s5981_s3 + $0x648] sm:$0xff]  }
  0xe7   : > { %4589 = vmatmul.mubr.bf16.vlgmr.msra.gmra.mrb[0].mxu1 %v4903_v22  ;;  %v4934_v22 = vld [vmem:[%s5981_s3 + $0x600] sm:$0xff]  }
  0xe8   : > { %2603 = vmatmul.mubr.bf16.vlgmr.msra.gmra.mrb[24].mxu0 %v5755_v27  ;;  %4593 = vmatpush3.bf16.msra.mxu1 %v4905_v28  ;;  %v4938_v27 = vld [vmem:[%s5981_s3 + $0x650] sm:$0xff]  }
  0xe9   : > { %4391 = vmatpush3.bf16.msra.mxu0 %v4906_v29  ;;  %4594 = vmatprep.subr.bf16.mxu1 %v4985_v1  ;;  %v4939_v28 = vld [vmem:[%s5981_s3 + $0x690] sm:$0xff]  }
  0xea   : > { %4392 = vmatprep.subr.bf16.mxu0 %v4907_v30  ;;  %2945 = vmatprep.mubr.bf16.mxu0 %v2753_v31  ;;  %v4940_v29 = vld [vmem:[%s5981_s3 + $0x610] sm:$0xff]   ;;  %v4941_v30 = vld [vmem:[%s5981_s3 + $0x658] sm:$0xff]  }
  0xeb   : > { %4608 = vmatprep.mubr.msk.bf16.mxu1 %vm4986_vm0, %v4985_v1  ;;  %v4942_v31 = vld [vmem:[%s5981_s3 + $0x698] sm:$0xff]  }
  0xec   : > { %4595 = vmatpush3.bf16.msra.mxu1 %v4908_v32  ;;  %v4943_v32 = vld [vmem:[%s5981_s3 + $0x618] sm:$0xff]  }
  0xed   : > { %4393 = vmatpush3.bf16.msra.mxu0 %v4909_v33  ;;  %4596 = vmatprep.subr.bf16.mxu1 %v4985_v1  ;;  %v4944_v33 = vld [vmem:[%s5981_s3 + $0x660] sm:$0xff]  }
  0xee   : > { %4394 = vmatprep.subr.bf16.mxu0 %v4910_v34  ;;  %v4945_v34 = vld [vmem:[%s5981_s3 + $0x6a0] sm:$0xff]  }
  0xf0   : > { %4597 = vmatpush3.bf16.msra.mxu1 %v4911_v35  ;;  %v4946_v35 = vld [vmem:[%s5981_s3 + $0x620] sm:$0xff]  }
  0xf1   : > { %4395 = vmatpush3.bf16.msra.mxu0 %v4912_v37  ;;  %4598 = vmatprep.subr.bf16.mxu1 %v4985_v1  ;;  %v4947_v37 = vld [vmem:[%s5981_s3 + $0x668] sm:$0xff]  }
  0xf2   : > { %4396 = vmatprep.subr.bf16.mxu0 %v4913_v39  ;;  %v4948_v39 = vld [vmem:[%s5981_s3 + $0x6a8] sm:$0xff]  }
  0xf4   : > { %4599 = vmatpush3.bf16.msra.mxu1 %v4914_v40  ;;  %v4949_v40 = vld [vmem:[%s5981_s3 + $0x628] sm:$0xff]  }
  0xf5   : > { %4397 = vmatpush3.bf16.msra.mxu0 %v4915_v41  ;;  %4600 = vmatprep.subr.bf16.mxu1 %v4985_v1  ;;  %v2998_v41 = vld [vmem:[%s5607_s26 + $0x8] sm:$0xe] }
  0xf6   : > { %4398 = vmatprep.subr.bf16.mxu0 %v4916_v44  ;;  %v4950_v44 = vld [vmem:[%s5981_s3 + $0x670] sm:$0xff]  }
  0xf8   : > { %4601 = vmatpush3.bf16.msra.mxu1 %v4917_v45 }
  0xf9   : > { %4399 = vmatpush3.bf16.msra.mxu0 %v4918_v47  ;;  %4602 = vmatprep.subr.bf16.mxu1 %v4985_v1 }
  0xfa   : > { %4400 = vmatprep.subr.bf16.mxu0 %v4919_v48  ;;  %v4951_v48 = vld [vmem:[%s5981_s3 + $0x6b0] sm:$0xff]  }
  0xfb   : > { %v4189_v55 = vpop.f32.mrb[0].mxu0 }
  0xfc   : > { %v4190_v56 = vpop.f32.mrb[1].mxu0  ;;  %4603 = vmatpush3.bf16.msra.mxu1 %v4920_v2  ;;  %v4139_v2 = vcombine.low %v2998_v41, %v5805_v43 }
  0xfd   : > { %v5843_v61 = vadd.f32 %v4190_v56, %v4189_v55  ;;  %v4192_v62 = vpop.f32.mrb[2].mxu0  ;;  %4401 = vmatpush3.bf16.msra.mxu0 %v4921_v52  ;;  %4604 = vmatprep.subr.bf16.mxu1 %v4985_v1  ;;  %v4953_v56 = vld [vmem:[%s5981_s3 + $0x678] sm:$0xff]  }
  0xfe   : > { %v4193_v5 = vpop.f32.mrb[3].mxu0  ;;  %4402 = vmatprep.subr.bf16.mxu0 %v4922_v54  ;;  %v4952_v54 = vld [vmem:[%s5981_s3 + $0x630] sm:$0xff]   ;;  %v3062_v60 = vrot.slane %v4139_v2, 1 }
  0xff   : > { %v5854_v7 = vadd.f32 %v4193_v5, %v4192_v62  ;;  %v4632_v50 = vadd.f32 %v5843_v61, %v476_v42  ;;  %v3063_v61 = vrot.slane %v5825_v49, 1  ;;  %v3058_v49 = vsel %vm1177_vm2, %v3056_v0, %v3057_v3 }
 0x100   : > { %4605 = vmatpush3.bf16.msra.mxu1 %v4923_v57 }
 0x101   : > { %4403 = vmatpush3.bf16.msra.mxu0 %v4924_v63  ;;  %4606 = vmatprep.subr.bf16.mxu1 %v4985_v1  ;;  %v4642_v57 = vadd.f32 %v5854_v7, %v477_v46  ;;  %v4955_v63 = vld [vmem:[%s5981_s3 + $0x638] sm:$0xff]   ;;  %v3064_v4 = vsel %vm1177_vm2, %v3062_v60, %v3063_v61 }
 0x102   : > { %4404 = vmatprep.subr.bf16.mxu0 %v4925_v6 }
 0x104   : > { %4607 = vmatpush3.bf16.msra.mxu1 %v4926_v8 }
 0x105   : > { %4405 = vmatpush3.bf16.msra.mxu0 %v4927_v12  ;;  %4612 = vmatprep.subr.bf16.mxu1 %v4985_v1 }
 0x106   : > { %4421 = vmatprep.subr.bf16.mxu0 %v4932_v16 }
 0x107   : > { %4609 = vmatmul.mubr.bf16.vlgmr.msra.gmra.mrb[0].mxu1 %v2765_v17 }
 0x108   : > { %2946 = vmatmul.mubr.bf16.vlgmr.msra.gmra.mrb[28].mxu0 %v2741_v21  ;;  %4613 = vmatpush3.bf16.msra.mxu1 %v4933_v18 }
 0x109   : > { %4422 = vmatpush3.bf16.msra.mxu0 %v4934_v22  ;;  %4614 = vmatprep.subr.bf16.mxu1 %v4985_v1 }
 0x10a   : > { %4423 = vmatprep.subr.bf16.mxu0 %v4935_v24  ;;  %4628 = vmatprep.mubr.msk.bf16.mxu1 %vm4986_vm0, %v4985_v1 }
 0x10b   : > { %3244 = vmatprep.mubr.bf16.mxu0 %v3061_v25 }
 0x10c   : > { %4615 = vmatpush3.bf16.msra.mxu1 %v4936_v13 }
 0x10d   : > { %4424 = vmatpush3.bf16.msra.mxu0 %v4937_v26  ;;  %4616 = vmatprep.subr.bf16.mxu1 %v4985_v1 }
 0x10e   : > { %4425 = vmatprep.subr.bf16.mxu0 %v4938_v27 }
 0x110   : > { %4617 = vmatpush3.bf16.msra.mxu1 %v4939_v28 }
 0x111   : > { %4426 = vmatpush3.bf16.msra.mxu0 %v4940_v29  ;;  %4618 = vmatprep.subr.bf16.mxu1 %v4985_v1 }
 0x112   : > { %4427 = vmatprep.subr.bf16.mxu0 %v4941_v30 }
 0x114   : > { %4619 = vmatpush3.bf16.msra.mxu1 %v4942_v31 }
 0x115   : > { %4428 = vmatpush3.bf16.msra.mxu0 %v4943_v32  ;;  %4620 = vmatprep.subr.bf16.mxu1 %v4985_v1 }
 0x116   : > { %4429 = vmatprep.subr.bf16.mxu0 %v4944_v33 }
 0x118   : > { %4621 = vmatpush3.bf16.msra.mxu1 %v4945_v34 }
 0x119   : > { %4430 = vmatpush3.bf16.msra.mxu0 %v4946_v35  ;;  %4622 = vmatprep.subr.bf16.mxu1 %v4985_v1 }
 0x11a   : > { %4431 = vmatprep.subr.bf16.mxu0 %v4947_v37 }
 0x11b   : > { %v4220_v45 = vpop.f32.mrb[4].mxu0 }
 0x11c   : > { %v4221_v47 = vpop.f32.mrb[5].mxu0  ;;  %4623 = vmatpush3.bf16.msra.mxu1 %v4948_v39 }
 0x11d   : > { %v4222_v52 = vadd.f32 %v4221_v47, %v4220_v45  ;;  %v4223_v23 = vpop.f32.mrb[6].mxu0  ;;  %4432 = vmatpush3.bf16.msra.mxu0 %v4949_v40  ;;  %4624 = vmatprep.subr.bf16.mxu1 %v4985_v1 }
 0x11e   : > { %v4224_v55 = vpop.f32.mrb[7].mxu0  ;;  %4433 = vmatprep.subr.bf16.mxu0 %v4950_v44 }
 0x11f   : > { %v4633_v43 = vadd.f32 %v4632_v50, %v4222_v52  ;;  %v4225_v58 = vadd.f32 %v4224_v55, %v4223_v23 }
 0x120   : > { %4625 = vmatpush3.bf16.msra.mxu1 %v4951_v48 }
 0x121   : > { %v4643_v62 = vadd.f32 %v4642_v57, %v4225_v58  ;;  %4434 = vmatpush3.bf16.msra.mxu0 %v4952_v54  ;;  %4626 = vmatprep.subr.bf16.mxu1 %v4985_v1 }
 0x122   : > { %4435 = vmatprep.subr.bf16.mxu0 %v4953_v56 }
 0x124   : > { %4627 = vmatpush3.bf16.msra.mxu1 %v4954_v59 }
 0x125   : > { %4436 = vmatpush3.bf16.msra.mxu0 %v4955_v63 }
 0x127   : > { %4629 = vmatmul.mubr.bf16.vlgmr.msra.gmra.mrb[0].mxu1 %v3064_v4 }
 0x128   : > { %3245 = vmatmul.mubr.bf16.vlgmr.msra.gmra.mrb[32].mxu0 %v3058_v49 }
 0x13b   : > { %v4251_v1 = vpop.f32.mrb[8].mxu0 }
 0x13c   : > { %v4252_v5 = vpop.f32.mrb[9].mxu0 }
 0x13d   : > { %v4253_v6 = vadd.f32 %v4252_v5, %v4251_v1  ;;  %v4254_v7 = vpop.f32.mrb[10].mxu0 }
 0x13e   : > { %v4255_v8 = vpop.f32.mrb[11].mxu0 }
 0x13f   : > { %v4634_v9 = vadd.f32 %v4633_v43, %v4253_v6  ;;  %v4256_v10 = vadd.f32 %v4255_v8, %v4254_v7 }
 0x141   : > { %v4644_v51 = vadd.f32 %v4643_v62, %v4256_v10 }
 0x15b   : > { %v4282_v36 = vpop.f32.mrb[12].mxu0 }
 0x15c   : > { %v4283_v38 = vpop.f32.mrb[13].mxu0 }
 0x15d   : > { %v4284_v53 = vadd.f32 %v4283_v38, %v4282_v36  ;;  %v4285_v11 = vpop.f32.mrb[14].mxu0 }
 0x15e   : > { %v4286_v12 = vpop.f32.mrb[15].mxu0 }
 0x15f   : > { %v4635_v14 = vadd.f32 %v4634_v9, %v4284_v53  ;;  %v4287_v15 = vadd.f32 %v4286_v12, %v4285_v11 }
 0x161   : > { %v4645_v16 = vadd.f32 %v4644_v51, %v4287_v15 }
 0x17b   : > { %v4313_v17 = vpop.f32.mrb[16].mxu0 }
 0x17c   : > { %v4314_v18 = vpop.f32.mrb[17].mxu0 }
 0x17d   : > { %v4315_v19 = vadd.f32 %v4314_v18, %v4313_v17  ;;  %v4316_v20 = vpop.f32.mrb[18].mxu0 }
 0x17e   : > { %v4317_v21 = vpop.f32.mrb[19].mxu0 }
 0x17f   : > { %v4636_v22 = vadd.f32 %v4635_v14, %v4315_v19  ;;  %v4318_v24 = vadd.f32 %v4317_v21, %v4316_v20 }
 0x181   : > { %v4646_v13 = vadd.f32 %v4645_v16, %v4318_v24 }
 0x19b   : > { %v4344_v25 = vpop.f32.mrb[20].mxu0 }
 0x19c   : > { %v4345_v26 = vpop.f32.mrb[21].mxu0 }
 0x19d   : > { %v4346_v27 = vadd.f32 %v4345_v26, %v4344_v25  ;;  %v4347_v28 = vpop.f32.mrb[22].mxu0 }
 0x19e   : > { %v4348_v29 = vpop.f32.mrb[23].mxu0 }
 0x19f   : > { %v4637_v30 = vadd.f32 %v4636_v22, %v4346_v27  ;;  %v4349_v31 = vadd.f32 %v4348_v29, %v4347_v28 }
 0x1a1   : > { %v4647_v32 = vadd.f32 %v4646_v13, %v4349_v31 }
 0x1bb   : > { %v4375_v33 = vpop.f32.mrb[24].mxu0 }
 0x1bc   : > { %v4376_v34 = vpop.f32.mrb[25].mxu0 }
 0x1bd   : > { %v4377_v35 = vadd.f32 %v4376_v34, %v4375_v33  ;;  %v4378_v37 = vpop.f32.mrb[26].mxu0 }
 0x1be   : > { %v4379_v39 = vpop.f32.mrb[27].mxu0 }
 0x1bf   : > { %v4638_v40 = vadd.f32 %v4637_v30, %v4377_v35  ;;  %v4380_v41 = vadd.f32 %v4379_v39, %v4378_v37 }
 0x1c1   : > { %v4648_v42 = vadd.f32 %v4647_v32, %v4380_v41 }
 0x1db   : > { %v4406_v44 = vpop.f32.mrb[28].mxu0 }
 0x1dc   : > { %v4407_v45 = vpop.f32.mrb[29].mxu0 }
 0x1dd   : > { %v4408_v46 = vadd.f32 %v4407_v45, %v4406_v44  ;;  %v4409_v47 = vpop.f32.mrb[30].mxu0 }
 0x1de   : > { %v4410_v48 = vpop.f32.mrb[31].mxu0 }
 0x1df   : > { %v4639_v2 = vadd.f32 %v4638_v40, %v4408_v46  ;;  %v4411_v50 = vadd.f32 %v4410_v48, %v4409_v47 }
 0x1e1   : > { %v4649_v52 = vadd.f32 %v4648_v42, %v4411_v50 }
 0x1fa   : > { %v3287_v23 = vpop.f32.mrb[0].mxu1 }
 0x1fb   : > { %v4437_v54 = vpop.f32.mrb[32].mxu0  ;;  %v4630_v55 = vpop.f32.mrb[1].mxu1 }
 0x1fc   : > { %v4438_v56 = vpop.f32.mrb[33].mxu0  ;;  %v3290_v57 = vpop.f32.mrb[2].mxu1 }
 0x1fd   : > { %v4439_v43 = vadd.f32 %v4438_v56, %v4437_v54  ;;  %v4440_v58 = vpop.f32.mrb[34].mxu0  ;;  %v4631_v59 = vpop.f32.mrb[3].mxu1 }
 0x1fe   : > { %v4441_v60 = vpop.f32.mrb[35].mxu0 }
 0x1ff   : > { %v4640_v61 = vadd.f32 %v4639_v2, %v4439_v43  ;;  %v4442_v62 = vadd.f32 %v4441_v60, %v4440_v58 }
 0x201   : > { %v4641_v63 = vadd.f32 %v4640_v61, %v3287_v23  ;;  %v4650_v0 = vadd.f32 %v4649_v52, %v4442_v62 }
 0x203   : > { %3297 = vst.msk [vmem:[#allocation2] sm:$0xff] %vm473_vm3, %v4641_v63  ;;  %v3304_v3 = vmin.f32 %v4641_v63, 0.0  ;;  %v4651_v4 = vadd.f32 %v4650_v0, %v3290_v57  ;;  %vm3302_vm4 = vcmp.gt.f32.partialorder %v4641_v63, 0.0 }
 0x205   : > { %v3306_v49 = vmul.f32 1.442695, %v3304_v3  ;;  %3298 = vst.msk [vmem:[#allocation2 + $0x8] sm:$0xff] %vm473_vm3, %v4651_v4  ;;  %v3305_v1 = vmin.f32 %v4651_v4, 0.0  ;;  %vm3303_vm6 = vcmp.gt.f32.partialorder %v4651_v4, 0.0 }
 0x207   : > { %4957 = vpow2.f32 %v3306_v49  ;;  %v3308_v5 = vmul.f32 1.442695, %v3305_v1 }
 0x209   : > { %4959 = vpow2.f32 %v3308_v5 }
 0x211   : > { %v4958_v6 = vpop.eup %4957 }
 0x212   : > { %v4164_v7 = vadd.f32 -1.0, %v4958_v6 }
 0x213   : > { %v4960_v8 = vpop.eup %4959 }
 0x214   : > { %v3312_v9 = vsel %vm3302_vm4, %v4641_v63, %v4164_v7  ;;  %v4165_v10 = vadd.f32 -1.0, %v4960_v8 }
 0x215   : > { %v4171_v51 = vpack.c.bf16 %v3312_v9, %v3312_v9 }
 0x216   : > { %v3313_v36 = vsel %vm3303_vm6, %v4651_v4, %v4165_v10 }
 0x217   : > { %3323 = vst.msk [vmem:[%s459_s29] sm:$0xf] %vm3322_vm5, %v4171_v51  ;;  %v4172_v38 = vpack.c.bf16 %v3313_v36, %v3313_v36 }
 0x219   : > { %3324 = vst.msk [vmem:[%s459_s29 + $0x4] sm:$0xf] %vm3322_vm5, %v4172_v38 }
 0x21a PF: > { %s15_s20 = sadd.s32 1, %s4983_s20   ;;  %s5984_s18 = smov %s4979_s19 }
 0x21b   : > { %p12_p8 = scmp.ge.s32.totalorder %s15_s20, 18   ;;  %s5985_s19 = smov %s5987_s21 }
 0x21d   :  { %14 = sbr.rel (!%p12_p8) target bundleno = 2 (0x2), region = 98 }

// kernel: dsrnet_forward.24
= control target key start
LH: loop header
LB: loop body
LE: loop exit
PB: predicated region body
PF: predicated region fallthrough
CT: control target
= control target key end

     0   :  { %s2705_s18 = smov 0   ;;  %s2707_s19 = smov 0   ;;  %s3067_s0 = inlined_call_operand.vmem [shape: bf16[1,34,34,128], index: 0, kind: input, shape index: {}, may-alias: {0,1,2}]   ;;  %s3068_s1 = inlined_call_operand.vmem [shape: bf16[1,34,34,128], index: 1, kind: input, shape index: {}, may-alias: {0,1,2}]   ;;  %s3069_s2 = inlined_call_operand.vmem [shape: bf16[1,34,34,128], index: 2, kind: input, shape index: {}, may-alias: {0,1,2}]   ;;  %s3070_s3 = inlined_call_operand.vmem [shape: bf16[9,128,32], index: 3, kind: input, shape index: {}]   ;;  %s3071_s4 = inlined_call_operand.vmem [shape: f32[1,32], index: 4, kind: input, shape index: {}]   ;;  %s3072_s5 = inlined_call_operand.vmem [shape: bf16[1,32,32,32], index: 5, kind: output, shape index: {}]  }
   0x1   :  { %s2709_s20 = smov 0  }
   0x2 LB: > { %s33_s21 = sadd.s32 1, %s2669_s19  ;;  %p1980_p0 = scmp.ge.s32.totalorder %s2673_s20, 1  ;;  %s2673_s20 = sphi %s2709_s20, %s15_s20   ;;  %s2669_s19 = sphi %s2707_s19, %s3074_s19   ;;  %s2665_s18 = sphi %s2705_s18, %s3073_s18  }
   0x3   : > { %p35_p1 = scmp.ge.s32.totalorder %s33_s21, 32  ;;  %p302_p2 = scmp.lt.s32.totalorder %s2673_s20, 33 }
   0x5   : > { %s3076_s21 = smov (%p35_p1, %s33_s21), 0  ;;  %p303_p3 = pnand %p1980_p0, %p302_p2 }
   0x6   : > { %v2553_v0 = vld [vmem:[%s3070_s3] sm:$0xff] (!%p303_p3)   ;;  %p383_p4 = scmp.lt.s32.totalorder (!%p303_p3), %s2665_s18, 33  ;;  %s393_s26 = sadd.s32 (!%p303_p3), 1, %s2665_s18  ;;  %v2555_v2 = vld [vmem:[%s3070_s3 + $0x8] sm:$0xff] (!%p303_p3)   ;;  %v2557_v4 = vld [vmem:[%s3070_s3 + $0x10] sm:$0xff] (!%p303_p3)   ;;  %vm780_vm1 = vcmask (!%p303_p3), 1046528  }
   0x7   : > { %306 = sbr.rel (%p303_p3) target bundleno = 406 (0x196), region = 40  ;;  %v2554_v1 = vld [vmem:[%s3070_s3 + $0x100] sm:$0xff] (!%p303_p3)   ;;  %2310 = vmatprep.subr.bf16.mxu1 (!%p303_p3), %v2553_v0  ;;  %v2556_v3 = vld [vmem:[%s3070_s3 + $0x108] sm:$0xff] (!%p303_p3)   ;;  %p396_p5 = scmp.lt.s32.totalorder (!%p303_p3), %s393_s26, 33  ;;  %v2558_v5 = vld [vmem:[%s3070_s3 + $0x110] sm:$0xff] (!%p303_p3)   ;;  %vm458_vm2 = vcmask (!%p303_p3), 261120  }
   0x8   : > { %2390 = vmatprep.subr.bf16.mxu0 (!%p303_p3), %v2554_v1  ;;  %2311 = vmatpush3.bf16.msra.mxu1 (!%p303_p3), %v2553_v0  ;;  %v2559_v6 = vld [vmem:[%s3070_s3 + $0x18] sm:$0xff] (!%p303_p3)   ;;  %v2561_v8 = vld [vmem:[%s3070_s3 + $0x20] sm:$0xff] (!%p303_p3)   ;;  %v2563_v10 = vld [vmem:[%s3070_s3 + $0x28] sm:$0xff] (!%p303_p3)   ;;  %vm635_vm0 = vsmask.f32 (!%p303_p3), 7424  ;;  %p435_p7 = scmp.lt.s32.totalorder (!%p303_p3), %s2665_s18, 31 }
   0x9   : > { %2391 = vmatpush3.bf16.msra.mxu0 (!%p303_p3), %v2554_v1  ;;  %2312 = vmatprep.subr.bf16.mxu1 (!%p303_p3), %v2555_v2  ;;  %v2560_v7 = vld [vmem:[%s3070_s3 + $0x118] sm:$0xff] (!%p303_p3)   ;;  %v2562_v9 = vld [vmem:[%s3070_s3 + $0x120] sm:$0xff] (!%p303_p3)   ;;  %v2564_v12 = vld [vmem:[%s3070_s3 + $0x128] sm:$0xff] (!%p303_p3)   ;;  %vm1779_vm4 = vcmask (!%p303_p3), 257024  }
   0xa   : > { %2392 = vmatprep.subr.bf16.mxu0 (!%p303_p3), %v2556_v3  ;;  %v2565_v17 = vld [vmem:[%s3070_s3 + $0x30] sm:$0xff] (!%p303_p3)   ;;  %v2567_v22 = vld [vmem:[%s3070_s3 + $0x38] sm:$0xff] (!%p303_p3)   ;;  %v2570_v31 = vld [vmem:[%s3070_s3 + $0x40] sm:$0xff] (!%p303_p3)  }
   0xb   : > { %v2566_v18 = vld [vmem:[%s3070_s3 + $0x130] sm:$0xff] (!%p303_p3)   ;;  %v2568_v27 = vld [vmem:[%s3070_s3 + $0x138] sm:$0xff] (!%p303_p3)   ;;  %v2573_v34 = vld [vmem:[%s3070_s3 + $0x140] sm:$0xff] (!%p303_p3)  }
   0xc   : > { %2313 = vmatpush3.bf16.msra.mxu1 (!%p303_p3), %v2555_v2  ;;  %v2576_v37 = vld [vmem:[%s3070_s3 + $0x48] sm:$0xff] (!%p303_p3)   ;;  %v2578_v39 = vld [vmem:[%s3070_s3 + $0x50] sm:$0xff] (!%p303_p3)   ;;  %v2580_v45 = vld [vmem:[%s3070_s3 + $0x58] sm:$0xff] (!%p303_p3)  }
   0xd   : > { %2393 = vmatpush3.bf16.msra.mxu0 (!%p303_p3), %v2556_v3  ;;  %2314 = vmatprep.subr.bf16.mxu1 (!%p303_p3), %v2557_v4  ;;  %v2577_v38 = vld [vmem:[%s3070_s3 + $0x148] sm:$0xff] (!%p303_p3)   ;;  %v2579_v40 = vld [vmem:[%s3070_s3 + $0x150] sm:$0xff] (!%p303_p3)   ;;  %v2581_v47 = vld [vmem:[%s3070_s3 + $0x158] sm:$0xff] (!%p303_p3)  }
   0xe   : > { %s384_s10 = scalar_select %p383_p4, %s2665_s18, 33  ;;  %2394 = vmatprep.subr.bf16.mxu0 %v2558_v5  ;;  %v2582_v56 = vld [vmem:[%s3070_s3 + $0x60] sm:$0xff]   ;;  %v2584_v61 = vld [vmem:[%s3070_s3 + $0x68] sm:$0xff]   ;;  %v2586_v0 = vld [vmem:[%s3070_s3 + $0x70] sm:$0xff]  }
   0xf   : > { %s3078_s26 = smov (!%p396_p5, %s393_s26), 33  ;;  %v2583_v58 = vld [vmem:[%s3070_s3 + $0x160] sm:$0xff]   ;;  %v2585_v62 = vld [vmem:[%s3070_s3 + $0x168] sm:$0xff]   ;;  %v2587_v1 = vld [vmem:[%s3070_s3 + $0x170] sm:$0xff]  }
  0x10   : > { %s2526_s15 = smul.u32 20, %s384_s10  ;;  %2315 = vmatpush3.bf16.msra.mxu1 %v2557_v4  ;;  %v2588_v2 = vld [vmem:[%s3070_s3 + $0x78] sm:$0xff]  }
  0x11   : > { %s2527_s16 = smul.u32 20, %s3078_s26  ;;  %2395 = vmatpush3.bf16.msra.mxu0 %v2558_v5  ;;  %2316 = vmatprep.subr.bf16.mxu1 %v2559_v6  ;;  %v2589_v5 = vld [vmem:[%s3070_s3 + $0x178] sm:$0xff]  }
  0x12   : > { %2396 = vmatprep.subr.bf16.mxu0 %v2560_v7  ;;  %s2763_s28 = scalar_lea.vmem %s3067_s0, %s2526_s15  ;;  %s407_s15 = sadd.s32 2, %s2665_s18 }
  0x13   : > { %s2771_s7 = scalar_lea.vmem %s3068_s1, %s2527_s16  ;;  %v2569_v11 = vld [vmem:[%s2763_s28] sm:$0xff]   ;;  %v2574_v35 = vld [vmem:[%s2763_s28 + $0x8] sm:$0xff]   ;;  %p410_p6 = scmp.lt.s32.totalorder %s407_s15, 33  ;;  %v2860_v63 = vld [vmem:[%s2763_s28 + $0x10] ss:$0 sps:$4 sm:$0x11]  }
  0x14   : > { %2317 = vmatpush3.bf16.msra.mxu1 %v2559_v6  ;;  %2326 = vmatprep.mubr.bf16.mxu1 %v2569_v11  ;;  %v1023_v13 = vld [vmem:[%s2771_s7] sm:$0xf]  ;;  %v2779_v14 = vld [vmem:[%s2771_s7 + $0x4] sm:$0xf]  ;;  %v2783_v16 = vld [vmem:[%s2771_s7 + $0x8] sm:$0xff]   ;;  %v652_v4 = vshll.u32 %v2860_v63, 16 }
  0x15   : > { %2397 = vmatpush3.bf16.msra.mxu0 %v2560_v7  ;;  %2318 = vmatprep.subr.bf16.mxu1 %v2561_v8  ;;  %v2091_v15 = vcombine.low %v1023_v13, %v2779_v14  ;;  %v1066_v21 = vshll.u32 %v2783_v16, 16  ;;  %v2796_v25 = vld [vmem:[%s2771_s7 + $0x10] ss:$0 sps:$4 sm:$0x11]   ;;  %v1070_v26 = vshrl.u32 %v2783_v16, 16  ;;  %v2830_v44 = vld [vmem:[%s2763_s28 + $0x8] sm:$0xff]  }
  0x16   : > { %2398 = vmatprep.subr.bf16.mxu0 %v2562_v9  ;;  %v1074_v29 = vshll.u32 %v2796_v25, 16  ;;  %v600_v41 = vld [vmem:[%s2763_s28] sm:$0xf]  ;;  %v2826_v42 = vld [vmem:[%s2763_s28 + $0x4] sm:$0xf]  ;;  %v1203_v46 = vrot.slane %v2783_v16, 1 }
  0x17   : > { %v1059_v19 = vshrl.u32 %v2091_v15, 16  ;;  %v1061_v20 = vshll.u32 %v2091_v15, 16  ;;  %v1068_v24 = vrot.slane %v1066_v21, 1  ;;  %v2013_v43 = vcombine.low %v600_v41, %v2826_v42  ;;  %v1181_v51 = vld [vmem:[%s2771_s7] sm:$0xe]  ;;  %s3080_s15 = smov (!%p410_p6, %s407_s15), 33 }
  0x18   : > { %2319 = vmatpush3.bf16.msra.mxu1 %v2561_v8  ;;  %v1076_v33 = vrot.slane %v1074_v29, 1  ;;  %v644_v50 = vshll.u32 %v2830_v44, 16  ;;  %v2118_v52 = vcombine.low %v1181_v51, %v2779_v14  ;;  %s2528_s9 = smul.u32 20, %s3080_s15  ;;  %v648_v3 = vshrl.u32 %v2830_v44, 16  ;;  %v759_v6 = vld [vmem:[%s2763_s28] sm:$0xe] }
  0x19   : > { %2399 = vmatpush3.bf16.msra.mxu0 %v2562_v9  ;;  %2320 = vmatprep.subr.bf16.mxu1 %v2563_v10  ;;  %v1063_v23 = vrot.slane %v1061_v20, 1  ;;  %v1072_v32 = vor.u32 %v1070_v26, %v1068_v24  ;;  %v637_v48 = vshrl.u32 %v2013_v43, 16  ;;  %v639_v49 = vshll.u32 %v2013_v43, 16  ;;  %v2598_v16 = vld [vmem:[%s3070_s3 + $0x90] sm:$0xff]   ;;  %v2603_v26 = vld [vmem:[%s3070_s3 + $0x1a0] sm:$0xff]   ;;  %s3082_s18 = smov (!%p435_p7, %s2665_s18), 31 }
  0x1a   : > { %2400 = vmatprep.subr.bf16.mxu0 %v2564_v12  ;;  %v646_v54 = vrot.slane %v644_v50, 1  ;;  %v1202_v55 = vrot.slane %v2118_v52, 1  ;;  %s2880_s15 = scalar_lea.vmem %s3069_s2, %s2528_s9  ;;  %v2040_v7 = vcombine.low %v759_v6, %v2826_v42  ;;  %v654_v9 = vrot.slane %v652_v4, 1  ;;  %v2607_v41 = vld [vmem:[%s3070_s3 + $0x1b0] sm:$0xff]   ;;  %v2609_v50 = vld [vmem:[%s3070_s3 + $0x1b8] sm:$0xff]   ;;  %v2621_v6 = vld [vmem:[%s3070_s3 + $0xe0] sm:$0xff]  }
  0x1b   : > { %v1064_v28 = vor.u32 %v1063_v23, %v1059_v19  ;;  %v1077_v36 = vsel %vm635_vm0, %v1072_v32, %v1076_v33  ;;  %v641_v53 = vrot.slane %v639_v49, 1  ;;  %v1205_v11 = vrot.slane %v2796_v25, 1  ;;  %v2597_v19 = vld [vmem:[%s3070_s3 + $0x188] sm:$0xff]   ;;  %v2612_v21 = vld [vmem:[%s2880_s15] sm:$0xff]   ;;  %v2600_v23 = vld [vmem:[%s3070_s3 + $0x98] sm:$0xff]   ;;  %s2215_s23 = sshll.u32 %s3082_s18, 4 }
  0x1c   : > { %2321 = vmatpush3.bf16.msra.mxu1 %v2563_v10  ;;  %v1204_v59 = vsel %vm780_vm1, %v1202_v55, %v1203_v46  ;;  %v650_v8 = vor.u32 %v648_v3, %v646_v54  ;;  %v2592_v10 = vld [vmem:[%s3070_s3 + $0x80] sm:$0xff]   ;;  %v781_v13 = vrot.slane %v2040_v7, 1  ;;  %v782_v14 = vrot.slane %v2830_v44, 1  ;;  %v2605_v33 = vld [vmem:[%s3070_s3 + $0x1a8] sm:$0xff]   ;;  %v2618_v3 = vld [vmem:[%s3070_s3 + $0x1d0] sm:$0xff]   ;;  %s444_s25 = scalar_lea.vmem %s3072_s5, %s2215_s23 }
  0x1d   : > { %2401 = vmatpush3.bf16.msra.mxu0 %v2564_v12  ;;  %2322 = vmatprep.subr.bf16.mxu1 %v2565_v17  ;;  %v1069_v30 = vsel %vm635_vm0, %v1064_v28, %v1068_v24  ;;  %v642_v57 = vor.u32 %v641_v53, %v637_v48  ;;  %v2594_v12 = vld [vmem:[%s3070_s3 + $0x180] sm:$0xff]   ;;  %v2601_v24 = vld [vmem:[%s3070_s3 + $0x198] sm:$0xff]   ;;  %v2632_v28 = vld [vmem:[%s2880_s15 + $0x8] sm:$0xff]   ;;  %v784_v53 = vrot.slane %v2860_v63, 1 }
  0x1e   : > { %2402 = vmatprep.subr.bf16.mxu0 %v2566_v18  ;;  %2406 = vmatprep.mubr.bf16.mxu0 %v1069_v30  ;;  %v655_v15 = vsel %vm635_vm0, %v650_v8, %v654_v9  ;;  %v783_v20 = vsel %vm780_vm1, %v781_v13, %v782_v14  ;;  %v2602_v25 = vld [vmem:[%s3070_s3 + $0xa0] sm:$0xff]   ;;  %v1491_v32 = vshrl.u32 %v2632_v28, 16  ;;  %v2615_v63 = vld [vmem:[%s3070_s3 + $0xc8] sm:$0xff]   ;;  %v2619_v4 = vld [vmem:[%s3070_s3 + $0xd8] sm:$0xff]  }
  0x1f   : > { %v647_v60 = vsel %vm635_vm0, %v642_v57, %v646_v54  ;;  %v1444_v29 = vld [vmem:[%s2880_s15] sm:$0xf]  ;;  %v1445_v30 = vld [vmem:[%s2880_s15 + $0x4] sm:$0xf]  ;;  %v2623_v8 = vld [vmem:[%s3070_s3 + $0xe8] sm:$0xff]  }
  0x20   : > { %2323 = vmatpush3.bf16.msra.mxu1 %v2565_v17  ;;  %v1206_v17 = vsel %vm780_vm1, %v1203_v46, %v1205_v11  ;;  %v1602_v48 = vld [vmem:[%s2880_s15] sm:$0xe]  ;;  %v1986_v52 = vld [vmem:[%s3071_s4] ss:$0 sm:$0xff]  ;;  %v2624_v9 = vld [vmem:[%s3070_s3 + $0x1e8] sm:$0xff]  }
  0x21   : > { %2403 = vmatpush3.bf16.msra.mxu0 %v2566_v18  ;;  %2324 = vmatprep.subr.bf16.mxu1 %v2567_v22  ;;  %v2596_v18 = vld [vmem:[%s3070_s3 + $0x88] sm:$0xff]   ;;  %v2196_v51 = vcombine.low %v1602_v48, %v1445_v30  ;;  %461 = vst.msk [vmem:[#allocation2 + $0x10] sm:$0xff] %vm458_vm2, %v1986_v52  ;;  %459 = vst.msk [vmem:[#allocation2] sm:$0xff] %vm458_vm2, %v1986_v52  ;;  %v2611_v57 = vld [vmem:[%s3070_s3 + $0xc0] sm:$0xff]  }
  0x22   : > { %2404 = vmatprep.subr.bf16.mxu0 %v2568_v27  ;;  %460 = vst.msk [vmem:[#allocation2 + $0x8] sm:$0xff] %vm458_vm2, %v1986_v52  ;;  %462 = vst.msk [vmem:[#allocation2 + $0x18] sm:$0xff] %vm458_vm2, %v1986_v52  ;;  %v2622_v7 = vld [vmem:[%s3070_s3 + $0x1e0] sm:$0xff]   ;;  %v2626_v11 = vld [vmem:[%s3070_s3 + $0x1f0] sm:$0xff]  }
  0x23   : > { %v2628_v13 = vld [vmem:[%s3070_s3 + $0x1f8] sm:$0xff]  }
  0x24   : > { %2325 = vmatpush3.bf16.msra.mxu1 %v2567_v22  ;;  %v2599_v22 = vld [vmem:[%s3070_s3 + $0x190] sm:$0xff]  }
  0x25   : > { %2405 = vmatpush3.bf16.msra.mxu0 %v2568_v27  ;;  %2330 = vmatprep.subr.bf16.mxu1 %v2570_v31  ;;  %v2604_v27 = vld [vmem:[%s3070_s3 + $0xa8] sm:$0xff]  }
  0x26   : > { %2410 = vmatprep.subr.bf16.mxu0 %v2573_v34 }
  0x27   : > { %2327 = vmatmul.mubr.bf16.vlgmr.msra.gmra.mrb[0].mxu1 %v2574_v35 }
  0x28   : > { %2331 = vmatpush3.bf16.msra.mxu1 %v2570_v31  ;;  %2407 = vmatmul.mubr.bf16.vlgmr.msra.gmra.mrb[0].mxu0 %v1077_v36  ;;  %v1487_v31 = vshll.u32 %v2632_v28, 16  ;;  %v2169_v36 = vcombine.low %v1444_v29, %v1445_v30 }
  0x29   : > { %2411 = vmatpush3.bf16.msra.mxu0 %v2573_v34  ;;  %2332 = vmatprep.subr.bf16.mxu1 %v2576_v37  ;;  %v2634_v34 = vld [vmem:[%s2880_s15 + $0x10] ss:$0 sps:$4 sm:$0x11]   ;;  %v466_v29 = vld [vmem:[#allocation2 + $0x18] sm:$0xff] }
  0x2a   : > { %2412 = vmatprep.subr.bf16.mxu0 %v2577_v38  ;;  %2426 = vmatprep.mubr.bf16.mxu0 %v1204_v59  ;;  %v1489_v35 = vrot.slane %v1487_v31, 1  ;;  %v1626_v43 = vrot.slane %v2634_v34, 1  ;;  %v1480_v54 = vshrl.u32 %v2169_v36, 16  ;;  %v464_v31 = vld [vmem:[#allocation2 + $0x8] sm:$0xff] }
  0x2b   : > { %2346 = vmatprep.mubr.bf16.mxu1 %v647_v60  ;;  %v785_v60 = vsel %vm780_vm1, %v782_v14, %v784_v53  ;;  %v2633_v14 = vld [vmem:[%s3070_s3 + $0x200] sm:$0xff]  }
  0x2c   : > { %2333 = vmatpush3.bf16.msra.mxu1 %v2576_v37  ;;  %v1495_v37 = vshll.u32 %v2634_v34, 16 }
  0x2d   : > { %2413 = vmatpush3.bf16.msra.mxu0 %v2577_v38  ;;  %2334 = vmatprep.subr.bf16.mxu1 %v2578_v39  ;;  %v2606_v38 = vld [vmem:[%s3070_s3 + $0xb0] sm:$0xff]  }
  0x2e   : > { %2414 = vmatprep.subr.bf16.mxu0 %v2579_v40  ;;  %v1497_v42 = vrot.slane %v1495_v37, 1 }
  0x30   : > { %2335 = vmatpush3.bf16.msra.mxu1 %v2578_v39  ;;  %v1493_v39 = vor.u32 %v1491_v32, %v1489_v35 }
  0x31   : > { %2415 = vmatpush3.bf16.msra.mxu0 %v2579_v40  ;;  %2336 = vmatprep.subr.bf16.mxu1 %v2580_v45  ;;  %v1624_v40 = vrot.slane %v2632_v28, 1  ;;  %v463_v28 = vld [vmem:[#allocation2] sm:$0xff] }
  0x32   : > { %2416 = vmatprep.subr.bf16.mxu0 %v2581_v47  ;;  %v2940_v46 = vsel %vm635_vm0, %v1493_v39, %v1497_v42 }
  0x33   : > { %v2947_v49 = vsel %vm780_vm1, %v1624_v40, %v1626_v43 }
  0x34   : > { %2337 = vmatpush3.bf16.msra.mxu1 %v2580_v45  ;;  %v1482_v45 = vshll.u32 %v2169_v36, 16 }
  0x35   : > { %2417 = vmatpush3.bf16.msra.mxu0 %v2581_v47  ;;  %2338 = vmatprep.subr.bf16.mxu1 %v2582_v56  ;;  %v2608_v47 = vld [vmem:[%s3070_s3 + $0xb8] sm:$0xff]  }
  0x36   : > { %2418 = vmatprep.subr.bf16.mxu0 %v2583_v58  ;;  %v1484_v55 = vrot.slane %v1482_v45, 1 }
  0x38   : > { %2339 = vmatpush3.bf16.msra.mxu1 %v2582_v56  ;;  %v1623_v56 = vrot.slane %v2196_v51, 1 }
  0x39   : > { %2419 = vmatpush3.bf16.msra.mxu0 %v2583_v58  ;;  %2340 = vmatprep.subr.bf16.mxu1 %v2584_v61  ;;  %v2613_v58 = vld [vmem:[%s3070_s3 + $0x1c0] sm:$0xff]  }
  0x3a   : > { %2420 = vmatprep.subr.bf16.mxu0 %v2585_v62  ;;  %v2967_v59 = vsel %vm780_vm1, %v1623_v56, %v1624_v40 }
  0x3c   : > { %2341 = vmatpush3.bf16.msra.mxu1 %v2584_v61  ;;  %v2614_v61 = vld [vmem:[%s2880_s15 + $0x8] sm:$0xff]  }
  0x3d   : > { %2421 = vmatpush3.bf16.msra.mxu0 %v2585_v62  ;;  %2342 = vmatprep.subr.bf16.mxu1 %v2586_v0  ;;  %v1485_v62 = vor.u32 %v1484_v55, %v1480_v54 }
  0x3e   : > { %2422 = vmatprep.subr.bf16.mxu0 %v2587_v1 }
  0x3f   : > { %v1490_v44 = vsel %vm635_vm0, %v1485_v62, %v1489_v35 }
  0x40   : > { %2343 = vmatpush3.bf16.msra.mxu1 %v2586_v0  ;;  %v2616_v0 = vld [vmem:[%s3070_s3 + $0x1c8] sm:$0xff]  }
  0x41   : > { %2423 = vmatpush3.bf16.msra.mxu0 %v2587_v1  ;;  %2344 = vmatprep.subr.bf16.mxu1 %v2588_v2  ;;  %v2629_v1 = vld [vmem:[%s2771_s7] sm:$0xff]  }
  0x42   : > { %2424 = vmatprep.subr.bf16.mxu0 %v2589_v5 }
  0x44   : > { %2345 = vmatpush3.bf16.msra.mxu1 %v2588_v2  ;;  %v2617_v2 = vld [vmem:[%s3070_s3 + $0xd0] sm:$0xff]  }
  0x45   : > { %2425 = vmatpush3.bf16.msra.mxu0 %v2589_v5  ;;  %2350 = vmatprep.subr.bf16.mxu1 %v2592_v10  ;;  %v2620_v5 = vld [vmem:[%s3070_s3 + $0x1d8] sm:$0xff]  }
  0x46   : > { %2430 = vmatprep.subr.bf16.mxu0 %v2594_v12 }
  0x47   : > { %2347 = vmatmul.mubr.bf16.vlgmr.msra.gmra.mrb[0].mxu1 %v655_v15  ;;  %v2630_v15 = vld [vmem:[%s2771_s7 + $0x8] sm:$0xff]  }
  0x48   : > { %2351 = vmatpush3.bf16.msra.mxu1 %v2592_v10  ;;  %2427 = vmatmul.mubr.bf16.vlgmr.msra.gmra.mrb[0].mxu0 %v1206_v17  ;;  %v2625_v10 = vld [vmem:[%s3070_s3 + $0xf0] sm:$0xff]   ;;  %v2635_v17 = vld [vmem:[%s3070_s3 + $0x208] sm:$0xff]  }
  0x49   : > { %2431 = vmatpush3.bf16.msra.mxu0 %v2594_v12  ;;  %2352 = vmatprep.subr.bf16.mxu1 %v2596_v18  ;;  %v2627_v12 = vld [vmem:[%s3070_s3 + $0xf8] sm:$0xff]  }
  0x4a   : > { %2432 = vmatprep.subr.bf16.mxu0 %v2597_v19  ;;  %2366 = vmatprep.mubr.bf16.mxu1 %v783_v20  ;;  %v2638_v20 = vld [vmem:[%s3070_s3 + $0x220] sm:$0xff]  }
  0x4b   : > { %2446 = vmatprep.mubr.bf16.mxu0 %v2612_v21  ;;  %v2639_v21 = vld [vmem:[%s3070_s3 + $0x228] sm:$0xff]  }
  0x4c   : > { %2353 = vmatpush3.bf16.msra.mxu1 %v2596_v18  ;;  %v2636_v18 = vld [vmem:[%s3070_s3 + $0x210] sm:$0xff]  }
  0x4d   : > { %2433 = vmatpush3.bf16.msra.mxu0 %v2597_v19  ;;  %2354 = vmatprep.subr.bf16.mxu1 %v2598_v16  ;;  %v2637_v19 = vld [vmem:[%s3070_s3 + $0x218] sm:$0xff]  }
  0x4e   : > { %2434 = vmatprep.subr.bf16.mxu0 %v2599_v22 }
  0x50   : > { %2355 = vmatpush3.bf16.msra.mxu1 %v2598_v16  ;;  %v2640_v16 = vld [vmem:[%s3070_s3 + $0x230] sm:$0xff]  }
  0x51   : > { %2435 = vmatpush3.bf16.msra.mxu0 %v2599_v22  ;;  %2356 = vmatprep.subr.bf16.mxu1 %v2600_v23  ;;  %v2641_v22 = vld [vmem:[%s3070_s3 + $0x238] sm:$0xff]  }
  0x52   : > { %2436 = vmatprep.subr.bf16.mxu0 %v2601_v24 }
  0x54   : > { %2357 = vmatpush3.bf16.msra.mxu1 %v2600_v23 }
  0x55   : > { %2437 = vmatpush3.bf16.msra.mxu0 %v2601_v24  ;;  %2358 = vmatprep.subr.bf16.mxu1 %v2602_v25 }
  0x56   : > { %2438 = vmatprep.subr.bf16.mxu0 %v2603_v26 }
  0x58   : > { %2359 = vmatpush3.bf16.msra.mxu1 %v2602_v25 }
  0x59   : > { %2439 = vmatpush3.bf16.msra.mxu0 %v2603_v26  ;;  %2360 = vmatprep.subr.bf16.mxu1 %v2604_v27 }
  0x5a   : > { %2440 = vmatprep.subr.bf16.mxu0 %v2605_v33 }
  0x5c   : > { %2361 = vmatpush3.bf16.msra.mxu1 %v2604_v27  ;;  %v465_v27 = vld [vmem:[#allocation2 + $0x10] sm:$0xff] }
  0x5d   : > { %2441 = vmatpush3.bf16.msra.mxu0 %v2605_v33  ;;  %2362 = vmatprep.subr.bf16.mxu1 %v2606_v38 }
  0x5e   : > { %2442 = vmatprep.subr.bf16.mxu0 %v2607_v41 }
  0x60   : > { %2363 = vmatpush3.bf16.msra.mxu1 %v2606_v38 }
  0x61   : > { %2443 = vmatpush3.bf16.msra.mxu0 %v2607_v41  ;;  %2364 = vmatprep.subr.bf16.mxu1 %v2608_v47 }
  0x62   : > { %2444 = vmatprep.subr.bf16.mxu0 %v2609_v50 }
  0x64   : > { %2365 = vmatpush3.bf16.msra.mxu1 %v2608_v47 }
  0x65   : > { %2445 = vmatpush3.bf16.msra.mxu0 %v2609_v50  ;;  %2370 = vmatprep.subr.bf16.mxu1 %v2611_v57 }
  0x66   : > { %2450 = vmatprep.subr.bf16.mxu0 %v2613_v58 }
  0x67   : > { %2367 = vmatmul.mubr.bf16.vlgmr.msra.gmra.mrb[0].mxu1 %v785_v60 }
  0x68   : > { %2371 = vmatpush3.bf16.msra.mxu1 %v2611_v57  ;;  %2447 = vmatmul.mubr.bf16.vlgmr.msra.gmra.mrb[0].mxu0 %v2614_v61 }
  0x69   : > { %2451 = vmatpush3.bf16.msra.mxu0 %v2613_v58  ;;  %2372 = vmatprep.subr.bf16.mxu1 %v2615_v63 }
  0x6a   : > { %2452 = vmatprep.subr.bf16.mxu0 %v2616_v0  ;;  %2386 = vmatprep.mubr.bf16.mxu1 %v2629_v1 }
  0x6b   : > { %2466 = vmatprep.mubr.bf16.mxu0 %v1490_v44 }
  0x6c   : > { %2373 = vmatpush3.bf16.msra.mxu1 %v2615_v63 }
  0x6d   : > { %2453 = vmatpush3.bf16.msra.mxu0 %v2616_v0  ;;  %2374 = vmatprep.subr.bf16.mxu1 %v2617_v2 }
  0x6e   : > { %2454 = vmatprep.subr.bf16.mxu0 %v2618_v3 }
  0x70   : > { %2375 = vmatpush3.bf16.msra.mxu1 %v2617_v2 }
  0x71   : > { %2455 = vmatpush3.bf16.msra.mxu0 %v2618_v3  ;;  %2376 = vmatprep.subr.bf16.mxu1 %v2619_v4 }
  0x72   : > { %2456 = vmatprep.subr.bf16.mxu0 %v2620_v5 }
  0x74   : > { %2377 = vmatpush3.bf16.msra.mxu1 %v2619_v4 }
  0x75   : > { %2457 = vmatpush3.bf16.msra.mxu0 %v2620_v5  ;;  %2378 = vmatprep.subr.bf16.mxu1 %v2621_v6 }
  0x76   : > { %2458 = vmatprep.subr.bf16.mxu0 %v2622_v7 }
  0x78   : > { %2379 = vmatpush3.bf16.msra.mxu1 %v2621_v6 }
  0x79   : > { %2459 = vmatpush3.bf16.msra.mxu0 %v2622_v7  ;;  %2380 = vmatprep.subr.bf16.mxu1 %v2623_v8 }
  0x7a   : > { %2460 = vmatprep.subr.bf16.mxu0 %v2624_v9 }
  0x7c   : > { %2381 = vmatpush3.bf16.msra.mxu1 %v2623_v8 }
  0x7d   : > { %2461 = vmatpush3.bf16.msra.mxu0 %v2624_v9  ;;  %2382 = vmatprep.subr.bf16.mxu1 %v2625_v10 }
  0x7e   : > { %2462 = vmatprep.subr.bf16.mxu0 %v2626_v11 }
  0x80   : > { %2383 = vmatpush3.bf16.msra.mxu1 %v2625_v10 }
  0x81   : > { %2463 = vmatpush3.bf16.msra.mxu0 %v2626_v11  ;;  %2384 = vmatprep.subr.bf16.mxu1 %v2627_v12 }
  0x82   : > { %2464 = vmatprep.subr.bf16.mxu0 %v2628_v13 }
  0x84   : > { %2385 = vmatpush3.bf16.msra.mxu1 %v2627_v12 }
  0x85   : > { %2465 = vmatpush3.bf16.msra.mxu0 %v2628_v13 }
  0x86   : > { %2470 = vmatprep.subr.bf16.mxu0 %v2633_v14 }
  0x87   : > { %2387 = vmatmul.mubr.bf16.vlgmr.msra.gmra.mrb[0].mxu1 %v2630_v15 }
  0x88   : > { %2467 = vmatmul.mubr.bf16.vlgmr.msra.gmra.mrb[0].mxu0 %v2940_v46 }
  0x89   : > { %2471 = vmatpush3.bf16.msra.mxu0 %v2633_v14  ;;  %2486 = vmatprep.mubr.bf16.mxu0 %v2967_v59 }
  0x8a   : > { %2472 = vmatprep.subr.bf16.mxu0 %v2635_v17 }
  0x8d   : > { %2473 = vmatpush3.bf16.msra.mxu0 %v2635_v17 }
  0x8e   : > { %2474 = vmatprep.subr.bf16.mxu0 %v2636_v18 }
  0x91   : > { %2475 = vmatpush3.bf16.msra.mxu0 %v2636_v18 }
  0x92   : > { %2476 = vmatprep.subr.bf16.mxu0 %v2637_v19 }
  0x95   : > { %2477 = vmatpush3.bf16.msra.mxu0 %v2637_v19 }
  0x96   : > { %2478 = vmatprep.subr.bf16.mxu0 %v2638_v20 }
  0x99   : > { %2479 = vmatpush3.bf16.msra.mxu0 %v2638_v20 }
  0x9a   : > { %2480 = vmatprep.subr.bf16.mxu0 %v2639_v21 }
  0x9d   : > { %2481 = vmatpush3.bf16.msra.mxu0 %v2639_v21 }
  0x9e   : > { %2482 = vmatprep.subr.bf16.mxu0 %v2640_v16 }
  0xa1   : > { %2483 = vmatpush3.bf16.msra.mxu0 %v2640_v16 }
  0xa2   : > { %2484 = vmatprep.subr.bf16.mxu0 %v2641_v22 }
  0xa5   : > { %2485 = vmatpush3.bf16.msra.mxu0 %v2641_v22 }
  0xa8   : > { %2487 = vmatmul.mubr.bf16.vlgmr.msra.gmra.mrb[0].mxu0 %v2947_v49 }
 0x15a   : > { %v2388_v23 = vpop.f32.mrb[0].mxu1 }
 0x15b   : > { %v1004_v24 = vpop.f32.mrb[1].mxu1  ;;  %v2490_v30 = vadd.f32 %v2388_v23, %v465_v27 }
 0x15c   : > { %v2389_v25 = vpop.f32.mrb[2].mxu1  ;;  %v2492_v32 = vadd.f32 %v1004_v24, %v463_v28 }
 0x15d   : > { %v1007_v26 = vpop.f32.mrb[3].mxu1  ;;  %v2494_v34 = vadd.f32 %v2389_v25, %v466_v29 }
 0x15e   : > { %v2496_v37 = vadd.f32 %v1007_v26, %v464_v31 }
 0x17b   : > { %v2488_v33 = vpop.f32.mrb[0].mxu0 }
 0x17c   : > { %v2491_v35 = vadd.f32 %v2490_v30, %v2488_v33  ;;  %v1712_v36 = vpop.f32.mrb[1].mxu0 }
 0x17d   : > { %v2493_v38 = vadd.f32 %v2492_v32, %v1712_v36  ;;  %v2489_v39 = vpop.f32.mrb[2].mxu0 }
 0x17e   : > { %1734 = vst.msk [vmem:[#allocation2 + $0x10] sm:$0xff] %vm458_vm2, %v2491_v35  ;;  %v1745_v40 = vmin.f32 %v2491_v35, 0.0  ;;  %v2495_v41 = vadd.f32 %v2494_v34, %v2489_v39  ;;  %v1715_v42 = vpop.f32.mrb[3].mxu0  ;;  %vm1741_vm3 = vcmp.gt.f32.partialorder %v2491_v35, 0.0 }
 0x17f   : > { %1732 = vst.msk [vmem:[#allocation2] sm:$0xff] %vm458_vm2, %v2493_v38  ;;  %v1743_v43 = vmin.f32 %v2493_v38, 0.0  ;;  %v2497_v45 = vadd.f32 %v2496_v37, %v1715_v42  ;;  %vm1739_vm5 = vcmp.gt.f32.partialorder %v2493_v38, 0.0 }
 0x180   : > { %v1751_v46 = vmul.f32 1.442695, %v1745_v40  ;;  %1735 = vst.msk [vmem:[#allocation2 + $0x18] sm:$0xff] %vm458_vm2, %v2495_v41  ;;  %v1746_v47 = vmin.f32 %v2495_v41, 0.0  ;;  %vm1742_vm6 = vcmp.gt.f32.partialorder %v2495_v41, 0.0 }
 0x181   : > { %v1747_v48 = vmul.f32 1.442695, %v1743_v43  ;;  %1733 = vst.msk [vmem:[#allocation2 + $0x8] sm:$0xff] %vm458_vm2, %v2497_v45  ;;  %v1744_v49 = vmin.f32 %v2497_v45, 0.0  ;;  %vm1740_vm7 = vcmp.gt.f32.partialorder %v2497_v45, 0.0 }
 0x182   : > { %2643 = vpow2.f32 %v1751_v46  ;;  %v1753_v50 = vmul.f32 1.442695, %v1746_v47 }
 0x183   : > { %2645 = vpow2.f32 %v1747_v48  ;;  %v1749_v51 = vmul.f32 1.442695, %v1744_v49 }
 0x184   : > { %2647 = vpow2.f32 %v1753_v50 }
 0x185   : > { %2649 = vpow2.f32 %v1749_v51 }
 0x18c   : > { %v2644_v52 = vpop.eup %2643 }
 0x18d   : > { %v2646_v53 = vpop.eup %2645  ;;  %v2207_v54 = vadd.f32 -1.0, %v2644_v52 }
 0x18e   : > { %v2648_v55 = vpop.eup %2647  ;;  %v2205_v56 = vadd.f32 -1.0, %v2646_v53 }
 0x18f   : > { %v2650_v57 = vpop.eup %2649  ;;  %v1761_v58 = vsel %vm1741_vm3, %v2491_v35, %v2207_v54  ;;  %v2208_v59 = vadd.f32 -1.0, %v2648_v55 }
 0x190   : > { %v2218_v60 = vpack.c.bf16 %v1761_v58, %v1761_v58  ;;  %v1759_v61 = vsel %vm1739_vm5, %v2493_v38, %v2205_v56  ;;  %v2206_v62 = vadd.f32 -1.0, %v2650_v57 }
 0x191   : > { %v2216_v63 = vpack.c.bf16 %v1759_v61, %v1759_v61  ;;  %v1762_v0 = vsel %vm1742_vm6, %v2495_v41, %v2208_v59 }
 0x192   : > { %1782 = vst.msk [vmem:[%s444_s25 + $0x8] sm:$0xf] %vm1779_vm4, %v2218_v60  ;;  %v2219_v1 = vpack.c.bf16 %v1762_v0, %v1762_v0  ;;  %v1760_v44 = vsel %vm1740_vm7, %v2497_v45, %v2206_v62 }
 0x193   : > { %1780 = vst.msk [vmem:[%s444_s25] sm:$0xf] %vm1779_vm4, %v2216_v63  ;;  %v2217_v2 = vpack.c.bf16 %v1760_v44, %v1760_v44 }
 0x194   : > { %1783 = vst.msk [vmem:[%s444_s25 + $0xc] sm:$0xf] %vm1779_vm4, %v2219_v1 }
 0x195   : > { %1781 = vst.msk [vmem:[%s444_s25 + $0x4] sm:$0xf] %vm1779_vm4, %v2217_v2 }
 0x196 PF: > { %s15_s20 = sadd.s32 1, %s2673_s20   ;;  %s3073_s18 = smov %s2669_s19 }
 0x197   : > { %p12_p8 = scmp.ge.s32.totalorder %s15_s20, 34   ;;  %s3074_s19 = smov %s3076_s21 }
 0x199   :  { %14 = sbr.rel (!%p12_p8) target bundleno = 2 (0x2), region = 98 }

// kernel: dsrnet_forward.25
= control target key start
LH: loop header
LB: loop body
LE: loop exit
PB: predicated region body
PF: predicated region fallthrough
CT: control target
= control target key end

     0   :  { %s3092_s18 = smov 0   ;;  %s3094_s19 = smov 0   ;;  %s3549_s0 = inlined_call_operand.vmem [shape: bf16[1,66,66,96], index: 0, kind: input, shape index: {}, may-alias: {0,1,2}]   ;;  %s3550_s1 = inlined_call_operand.vmem [shape: bf16[1,66,66,96], index: 1, kind: input, shape index: {}, may-alias: {0,1,2}]   ;;  %s3551_s2 = inlined_call_operand.vmem [shape: bf16[1,66,66,96], index: 2, kind: input, shape index: {}, may-alias: {0,1,2}]   ;;  %s3552_s3 = inlined_call_operand.vmem [shape: bf16[9,96,32], index: 3, kind: input, shape index: {}]   ;;  %s3553_s4 = inlined_call_operand.vmem [shape: f32[1,32], index: 4, kind: input, shape index: {}]   ;;  %s3554_s5 = inlined_call_operand.vmem [shape: bf16[1,64,64,32], index: 5, kind: output, shape index: {}]  }
   0x1   :  { %s3096_s20 = smov 0  }
   0x2 LB: > { %s33_s21 = sadd.s32 1, %s3056_s19  ;;  %p2307_p0 = scmp.ge.s32.totalorder %s3060_s20, 1  ;;  %s3060_s20 = sphi %s3096_s20, %s15_s20   ;;  %s3056_s19 = sphi %s3094_s19, %s3557_s19   ;;  %s3052_s18 = sphi %s3092_s18, %s3556_s18  }
   0x3   : > { %p35_p1 = scmp.ge.s32.totalorder %s33_s21, 64  ;;  %p302_p2 = scmp.lt.s32.totalorder %s3060_s20, 65 }
   0x5   : > { %s3559_s21 = smov (%p35_p1, %s33_s21), 0  ;;  %p303_p3 = pnand %p2307_p0, %p302_p2 }
   0x6   : > { %v2938_v0 = vld [vmem:[%s3552_s3] sm:$0xff] (!%p303_p3)   ;;  %p383_p4 = scmp.lt.s32.totalorder (!%p303_p3), %s3052_s18, 65  ;;  %v2940_v2 = vld [vmem:[%s3552_s3 + $0x8] sm:$0xff] (!%p303_p3)   ;;  %s393_s6 = sadd.s32 (!%p303_p3), 1, %s3052_s18  ;;  %v2942_v4 = vld [vmem:[%s3552_s3 + $0x10] sm:$0xff] (!%p303_p3)   ;;  %vm551_vm0 = vcmask (!%p303_p3), 785408  }
   0x7   : > { %306 = sbr.rel (%p303_p3) target bundleno = 369 (0x171), region = 40  ;;  %v2939_v1 = vld [vmem:[%s3552_s3 + $0xc0] sm:$0xff] (!%p303_p3)   ;;  %2647 = vmatprep.subr.bf16.mxu1 (!%p303_p3), %v2938_v0  ;;  %v2941_v3 = vld [vmem:[%s3552_s3 + $0xc8] sm:$0xff] (!%p303_p3)   ;;  %v2943_v5 = vld [vmem:[%s3552_s3 + $0xd0] sm:$0xff] (!%p303_p3)   ;;  %p396_p5 = scmp.lt.s32.totalorder (!%p303_p3), %s393_s6, 65  ;;  %vm857_vm2 = vcmask (!%p303_p3), 1046528  }
   0x8   : > { %2727 = vmatprep.subr.bf16.mxu0 (!%p303_p3), %v2939_v1  ;;  %2648 = vmatpush3.bf16.msra.mxu1 (!%p303_p3), %v2938_v0  ;;  %v2944_v6 = vld [vmem:[%s3552_s3 + $0x18] sm:$0xff] (!%p303_p3)   ;;  %v2946_v8 = vld [vmem:[%s3552_s3 + $0x20] sm:$0xff] (!%p303_p3)   ;;  %v2948_v11 = vld [vmem:[%s3552_s3 + $0x28] sm:$0xff] (!%p303_p3)   ;;  %vm682_vm1 = vsmask.f32 (!%p303_p3), 7424  ;;  %vm458_vm3 = vcmask (!%p303_p3), 261120  }
   0x9   : > { %2728 = vmatpush3.bf16.msra.mxu0 (!%p303_p3), %v2939_v1  ;;  %2649 = vmatprep.subr.bf16.mxu1 (!%p303_p3), %v2940_v2  ;;  %v2945_v7 = vld [vmem:[%s3552_s3 + $0xd8] sm:$0xff] (!%p303_p3)   ;;  %v2947_v10 = vld [vmem:[%s3552_s3 + $0xe0] sm:$0xff] (!%p303_p3)   ;;  %v2949_v16 = vld [vmem:[%s3552_s3 + $0xe8] sm:$0xff] (!%p303_p3)   ;;  %p435_p7 = scmp.lt.s32.totalorder (!%p303_p3), %s3052_s18, 63  ;;  %vm2102_vm6 = vcmask (!%p303_p3), 257024  }
   0xa   : > { %2729 = vmatprep.subr.bf16.mxu0 (!%p303_p3), %v2941_v3  ;;  %v2951_v21 = vld [vmem:[%s3552_s3 + $0x30] sm:$0xff] (!%p303_p3)   ;;  %v2957_v32 = vld [vmem:[%s3552_s3 + $0x38] sm:$0xff] (!%p303_p3)   ;;  %v2959_v37 = vld [vmem:[%s3552_s3 + $0x40] sm:$0xff] (!%p303_p3)  }
   0xb   : > { %v2954_v27 = vld [vmem:[%s3552_s3 + $0xf0] sm:$0xff] (!%p303_p3)   ;;  %v2958_v34 = vld [vmem:[%s3552_s3 + $0xf8] sm:$0xff] (!%p303_p3)   ;;  %v2960_v39 = vld [vmem:[%s3552_s3 + $0x100] sm:$0xff] (!%p303_p3)  }
   0xc   : > { %2650 = vmatpush3.bf16.msra.mxu1 (!%p303_p3), %v2940_v2  ;;  %v2961_v45 = vld [vmem:[%s3552_s3 + $0x48] sm:$0xff] (!%p303_p3)   ;;  %v2964_v56 = vld [vmem:[%s3552_s3 + $0x50] sm:$0xff] (!%p303_p3)  }
   0xd   : > { %2730 = vmatpush3.bf16.msra.mxu0 (!%p303_p3), %v2941_v3  ;;  %2651 = vmatprep.subr.bf16.mxu1 (!%p303_p3), %v2942_v4  ;;  %v2962_v47 = vld [vmem:[%s3552_s3 + $0x108] sm:$0xff] (!%p303_p3)   ;;  %v2966_v59 = vld [vmem:[%s3552_s3 + $0x110] sm:$0xff] (!%p303_p3)  }
   0xe   : > { %s384_s28 = scalar_select %p383_p4, %s3052_s18, 65  ;;  %2731 = vmatprep.subr.bf16.mxu0 %v2943_v5 }
   0xf   : > { %s3561_s6 = smov (!%p396_p5, %s393_s6), 65 }
  0x10   : > { %s2911_s9 = smul.u32 36, %s384_s28  ;;  %2652 = vmatpush3.bf16.msra.mxu1 %v2942_v4 }
  0x11   : > { %s2912_s23 = smul.u32 36, %s3561_s6  ;;  %2732 = vmatpush3.bf16.msra.mxu0 %v2943_v5  ;;  %2653 = vmatprep.subr.bf16.mxu1 %v2944_v6  ;;  %v2969_v5 = vld [vmem:[%s3552_s3 + $0x58] sm:$0xff]  }
  0x12   : > { %s3142_s22 = scalar_lea.vmem %s3549_s0, %s2911_s9  ;;  %2733 = vmatprep.subr.bf16.mxu0 %v2945_v7 }
  0x13   : > { %s3150_s28 = scalar_lea.vmem %s3550_s1, %s2912_s23  ;;  %v2950_v9 = vld [vmem:[%s3142_s22] sm:$0xff]   ;;  %v2955_v29 = vld [vmem:[%s3142_s22 + $0x8] sm:$0xff]   ;;  %s407_s23 = sadd.s32 2, %s3052_s18  ;;  %v2963_v35 = vld [vmem:[%s3142_s22 + $0x10] sm:$0xff]  }
  0x14   : > { %2659 = vmatprep.mubr.msk.bf16.mxu1 %vm551_vm0, %v2950_v9  ;;  %v1150_v12 = vld [vmem:[%s3150_s28] sm:$0xf]  ;;  %v3162_v13 = vld [vmem:[%s3150_s28 + $0x4] sm:$0xf]  ;;  %2654 = vmatpush3.bf16.msra.mxu1 %v2944_v6  ;;  %v3166_v15 = vld [vmem:[%s3150_s28 + $0x8] sm:$0xff]   ;;  %p3210_p6 = scmp.lt.s32.totalorder %s407_s23, 65 }
  0x15   : > { %v2416_v14 = vcombine.low %v1150_v12, %v3162_v13  ;;  %2734 = vmatpush3.bf16.msra.mxu0 %v2945_v7  ;;  %2655 = vmatprep.subr.bf16.mxu1 %v2946_v8  ;;  %v1203_v19 = vshll.u32 %v3166_v15, 16  ;;  %v1207_v20 = vshrl.u32 %v3166_v15, 16  ;;  %v3177_v24 = vld [vmem:[%s3150_s28 + $0x10] sm:$0xff]   ;;  %v3202_v38 = vld [vmem:[%s3150_s28 + $0x18] sm:$0xff]   ;;  %v637_v49 = vld [vmem:[%s3142_s22] sm:$0xf] }
  0x16   : > { %2735 = vmatprep.subr.bf16.mxu0 %v2947_v10  ;;  %v1211_v28 = vshll.u32 %v3177_v24, 16  ;;  %v1215_v36 = vshrl.u32 %v3177_v24, 16  ;;  %v1219_v41 = vshll.u32 %v3202_v38, 16  ;;  %v2967_v42 = vld [vmem:[%s3142_s22 + $0x18] sm:$0xff]   ;;  %v1223_v44 = vshrl.u32 %v3202_v38, 16  ;;  %v3236_v55 = vld [vmem:[%s3142_s22 + $0x8] sm:$0xff]  }
  0x17   : > { %v1196_v17 = vshrl.u32 %v2416_v14, 16  ;;  %v1198_v18 = vshll.u32 %v2416_v14, 16  ;;  %v1205_v23 = vrot.slane %v1203_v19, 1  ;;  %v3217_v43 = vld [vmem:[%s3150_s28 + $0x20] ss:$0 sps:$4 sm:$0x11]  }
  0x18   : > { %2656 = vmatpush3.bf16.msra.mxu1 %v2946_v8  ;;  %v1213_v31 = vrot.slane %v1211_v28, 1  ;;  %v1221_v46 = vrot.slane %v1219_v41, 1  ;;  %v1227_v48 = vshll.u32 %v3217_v43, 16  ;;  %v3231_v52 = vld [vmem:[%s3142_s22 + $0x4] sm:$0xf]  ;;  %v1370_v58 = vrot.slane %v3166_v15, 1 }
  0x19   : > { %v1200_v22 = vrot.slane %v1198_v18, 1  ;;  %2736 = vmatpush3.bf16.msra.mxu0 %v2947_v10  ;;  %2657 = vmatprep.subr.bf16.mxu1 %v2948_v11  ;;  %v1209_v26 = vor.u32 %v1207_v20, %v1205_v23  ;;  %v2340_v54 = vcombine.low %v637_v49, %v3231_v52  ;;  %v1352_v57 = vld [vmem:[%s3150_s28] sm:$0xe]  ;;  %v691_v63 = vshll.u32 %v3236_v55, 16  ;;  %v3252_v2 = vld [vmem:[%s3142_s22 + $0x10] sm:$0xff]   ;;  %v2970_v6 = vld [vmem:[%s3552_s3 + $0x118] sm:$0xff]  }
  0x1a   : > { %2737 = vmatprep.subr.bf16.mxu0 %v2949_v16  ;;  %v1217_v40 = vor.u32 %v1215_v36, %v1213_v31  ;;  %v1225_v51 = vor.u32 %v1223_v44, %v1221_v46  ;;  %v1229_v53 = vrot.slane %v1227_v48, 1  ;;  %v695_v0 = vshrl.u32 %v3236_v55, 16  ;;  %s3563_s23 = smov (!%p3210_p6, %s407_s23), 65  ;;  %v2973_v15 = vld [vmem:[%s3552_s3 + $0x60] sm:$0xff]   ;;  %v3280_v18 = vld [vmem:[%s3142_s22 + $0x18] sm:$0xff]   ;;  %v2979_v28 = vld [vmem:[%s3552_s3 + $0x70] sm:$0xff]  }
  0x1b   : > { %v1201_v25 = vor.u32 %v1200_v22, %v1196_v17  ;;  %v1214_v33 = vsel %vm682_vm1, %v1209_v26, %v1213_v31  ;;  %v684_v61 = vshrl.u32 %v2340_v54, 16  ;;  %v686_v62 = vshll.u32 %v2340_v54, 16  ;;  %v2975_v17 = vld [vmem:[%s3552_s3 + $0x120] sm:$0xff]   ;;  %s2913_s27 = smul.u32 36, %s3563_s23  ;;  %v2977_v22 = vld [vmem:[%s3552_s3 + $0x68] sm:$0xff]   ;;  %v2982_v44 = vld [vmem:[%s3552_s3 + $0x138] sm:$0xff]  }
  0x1c   : > { %2658 = vmatpush3.bf16.msra.mxu1 %v2948_v11  ;;  %v1222_v50 = vsel %vm682_vm1, %v1217_v40, %v1221_v46  ;;  %v1230_v60 = vsel %vm682_vm1, %v1225_v51, %v1229_v53  ;;  %v2443_v1 = vcombine.low %v1352_v57, %v3162_v13  ;;  %v693_v4 = vrot.slane %v691_v63, 1  ;;  %v2978_v26 = vld [vmem:[%s3552_s3 + $0x128] sm:$0xff]   ;;  %v2985_v48 = vld [vmem:[%s3552_s3 + $0x140] sm:$0xff]   ;;  %v2995_v63 = vld [vmem:[%s3552_s3 + $0x158] sm:$0xff]   ;;  %s3565_s18 = smov (!%p435_p7, %s3052_s18), 63 }
  0x1d   : > { %v1206_v30 = vsel %vm682_vm1, %v1201_v25, %v1205_v23  ;;  %2738 = vmatpush3.bf16.msra.mxu0 %v2949_v16  ;;  %2667 = vmatprep.subr.bf16.mxu1 %v2951_v21  ;;  %v688_v3 = vrot.slane %v686_v62, 1  ;;  %v699_v8 = vshll.u32 %v3252_v2, 16  ;;  %v1372_v14 = vrot.slane %v3177_v24, 1  ;;  %s3309_s11 = scalar_lea.vmem %s3551_s2, %s2913_s27  ;;  %v2987_v49 = vld [vmem:[%s3552_s3 + $0x88] sm:$0xff]   ;;  %v2994_v62 = vld [vmem:[%s3552_s3 + $0x98] sm:$0xff]   ;;  %s2548_s30 = sshll.u32 %s3565_s18, 5 }
  0x1e   : > { %2739 = vmatprep.mubr.msk.bf16.mxu0 %vm551_vm0, %v1206_v30  ;;  %2747 = vmatprep.subr.bf16.mxu0 %v2954_v27  ;;  %v1369_v7 = vrot.slane %v2443_v1, 1  ;;  %v697_v12 = vor.u32 %v695_v0, %v693_v4  ;;  %v703_v16 = vshrl.u32 %v3252_v2, 16  ;;  %v1374_v20 = vrot.slane %v3202_v38, 1  ;;  %v2991_v46 = vld [vmem:[%s3309_s11] sm:$0xff]   ;;  %v3000_v0 = vld [vmem:[%s3309_s11 + $0x10] sm:$0xff]   ;;  %s3513_s23 = scalar_lea.vmem %s3554_s5, %s2548_s30 }
  0x1f   : > { %2660 = vmatmul.mubr.msk.bf16.vlgmr.msra.gmra.mrb[0].mxu1 %vm551_vm0, %v2955_v29  ;;  %v689_v9 = vor.u32 %v688_v3, %v684_v61  ;;  %v701_v13 = vrot.slane %v699_v8, 1  ;;  %v707_v24 = vshll.u32 %v3280_v18, 16  ;;  %v711_v25 = vshrl.u32 %v3280_v18, 16  ;;  %v1661_v53 = vld [vmem:[%s3309_s11] sm:$0xf]  ;;  %v3002_v8 = vld [vmem:[%s3309_s11 + $0x18] sm:$0xff]  }
  0x20   : > { %2668 = vmatpush3.bf16.msra.mxu1 %v2951_v21  ;;  %2740 = vmatmul.mubr.msk.bf16.vlgmr.msra.gmra.mrb[0].mxu0 %vm551_vm0, %v1214_v33  ;;  %v1371_v10 = vsel %vm857_vm2, %v1369_v7, %v1370_v58  ;;  %v1373_v21 = vsel %vm857_vm2, %v1370_v58, %v1372_v14  ;;  %v1375_v30 = vsel %vm857_vm2, %v1372_v14, %v1374_v20  ;;  %v840_v33 = vld [vmem:[%s3142_s22] sm:$0xe]  ;;  %v859_v40 = vrot.slane %v3236_v55, 1  ;;  %v3351_v54 = vld [vmem:[%s3309_s11 + $0x4] sm:$0xf]  ;;  %v2992_v55 = vld [vmem:[%s3552_s3 + $0x150] sm:$0xff]  }
  0x21   : > { %2748 = vmatpush3.bf16.msra.mxu0 %v2954_v27  ;;  %2669 = vmatprep.subr.bf16.mxu1 %v2957_v32  ;;  %v694_v11 = vsel %vm682_vm1, %v689_v9, %v693_v4  ;;  %v702_v19 = vsel %vm682_vm1, %v697_v12, %v701_v13  ;;  %v705_v23 = vor.u32 %v703_v16, %v701_v13  ;;  %v3295_v27 = vld [vmem:[%s3142_s22 + $0x20] ss:$0 sps:$4 sm:$0x11]   ;;  %v709_v29 = vrot.slane %v707_v24, 1  ;;  %v3359_v58 = vld [vmem:[%s3309_s11 + $0x8] sm:$0xff]   ;;  %v3005_v24 = vld [vmem:[%s3552_s3 + $0x178] sm:$0xff]  }
  0x22   : > { %2749 = vmatprep.subr.bf16.mxu0 %v2958_v34  ;;  %2663 = vmatprep.mubr.msk.bf16.mxu1 %vm551_vm0, %v2963_v35  ;;  %v715_v31 = vshll.u32 %v3295_v27, 16  ;;  %v2367_v36 = vcombine.low %v840_v33, %v3231_v52  ;;  %v861_v51 = vrot.slane %v3252_v2, 1  ;;  %v2990_v52 = vld [vmem:[%s3552_s3 + $0x90] sm:$0xff]   ;;  %v863_v57 = vrot.slane %v3280_v18, 1  ;;  %v2997_v7 = vld [vmem:[%s3552_s3 + $0x160] sm:$0xff]   ;;  %v2998_v12 = vld [vmem:[%s3552_s3 + $0xa8] sm:$0xff]  }
  0x23   : > { %2743 = vmatprep.mubr.msk.bf16.mxu0 %vm551_vm0, %v1222_v50  ;;  %v713_v35 = vor.u32 %v711_v25, %v709_v29  ;;  %v2988_v50 = vld [vmem:[%s3552_s3 + $0x148] sm:$0xff]   ;;  %v865_v1 = vrot.slane %v3295_v27, 1  ;;  %v3006_v14 = vld [vmem:[%s3150_s28] sm:$0xff]   ;;  %v3402_v18 = vld [vmem:[%s3309_s11 + $0x10] sm:$0xff]  }
  0x24   : > { %2670 = vmatpush3.bf16.msra.mxu1 %v2957_v32  ;;  %v1376_v32 = vrot.slane %v3217_v43, 1  ;;  %v717_v38 = vrot.slane %v715_v31, 1  ;;  %v864_v3 = vsel %vm857_vm2, %v861_v51, %v863_v57  ;;  %v2999_v13 = vld [vmem:[%s3552_s3 + $0x168] sm:$0xff]   ;;  %v2313_v16 = vld [vmem:[%s3553_s4] ss:$0 sm:$0xff]  ;;  %v1726_v25 = vshrl.u32 %v3402_v18, 16 }
  0x25   : > { %2750 = vmatpush3.bf16.msra.mxu0 %v2958_v34  ;;  %2671 = vmatprep.subr.bf16.mxu1 %v2959_v37  ;;  %v710_v34 = vsel %vm682_vm1, %v705_v23, %v709_v29  ;;  %461 = vst.msk [vmem:[#allocation2 + $0x10] sm:$0xff] %vm458_vm3, %v2313_v16  ;;  %459 = vst.msk [vmem:[#allocation2] sm:$0xff] %vm458_vm3, %v2313_v16  ;;  %v1722_v23 = vshll.u32 %v3402_v18, 16  ;;  %v3011_v29 = vld [vmem:[%s3552_s3 + $0x180] sm:$0xff]   ;;  %v3009_v31 = vld [vmem:[%s3150_s28 + $0x8] sm:$0xff]  }
  0x26   : > { %2751 = vmatprep.subr.bf16.mxu0 %v2960_v39  ;;  %v718_v41 = vsel %vm682_vm1, %v713_v35, %v717_v38  ;;  %v1377_v43 = vsel %vm857_vm2, %v1374_v20, %v1376_v32  ;;  %460 = vst.msk [vmem:[#allocation2 + $0x8] sm:$0xff] %vm458_vm3, %v2313_v16  ;;  %462 = vst.msk [vmem:[#allocation2 + $0x18] sm:$0xff] %vm458_vm3, %v2313_v16  ;;  %v3418_v20 = vld [vmem:[%s3309_s11 + $0x18] sm:$0xff]  }
  0x27   : > { %2664 = vmatmul.mubr.msk.bf16.gmra.mrb[4].mxu1 %vm551_vm0, %v2967_v42  ;;  %v2981_v42 = vld [vmem:[%s3552_s3 + $0x78] sm:$0xff]   ;;  %463 = vst.msk [vmem:[#allocation2 + $0x20] sm:$0xff] %vm458_vm3, %v2313_v16  ;;  %464 = vst.msk [vmem:[#allocation2 + $0x28] sm:$0xff] %vm458_vm3, %v2313_v16 }
  0x28   : > { %2672 = vmatpush3.bf16.msra.mxu1 %v2959_v37  ;;  %2744 = vmatmul.mubr.msk.bf16.gmra.mrb[4].mxu0 %vm551_vm0, %v1230_v60  ;;  %v2980_v37 = vld [vmem:[%s3552_s3 + $0x130] sm:$0xff]   ;;  %v2993_v60 = vld [vmem:[%s3309_s11 + $0x8] sm:$0xff]   ;;  %465 = vst.msk [vmem:[#allocation2 + $0x30] sm:$0xff] %vm458_vm3, %v2313_v16  ;;  %466 = vst.msk [vmem:[#allocation2 + $0x38] sm:$0xff] %vm458_vm3, %v2313_v16 }
  0x29   : > { %2752 = vmatpush3.bf16.msra.mxu0 %v2960_v39  ;;  %2673 = vmatprep.subr.bf16.mxu1 %v2961_v45  ;;  %v858_v39 = vrot.slane %v2367_v36, 1  ;;  %v3012_v36 = vld [vmem:[%s3552_s3 + $0x188] sm:$0xff]  }
  0x2a   : > { %2753 = vmatprep.subr.bf16.mxu0 %v2962_v47  ;;  %2759 = vmatprep.mubr.msk.bf16.mxu0 %vm551_vm0, %v1371_v10  ;;  %v866_v10 = vsel %vm857_vm2, %v863_v57, %v865_v1 }
  0x2b   : > { %2679 = vmatprep.mubr.msk.bf16.mxu1 %vm551_vm0, %v694_v11 }
  0x2c   : > { %2674 = vmatpush3.bf16.msra.mxu1 %v2961_v45  ;;  %v860_v45 = vsel %vm857_vm2, %v858_v39, %v859_v40  ;;  %v3013_v39 = vld [vmem:[%s3150_s28 + $0x10] sm:$0xff]  }
  0x2d   : > { %2754 = vmatpush3.bf16.msra.mxu0 %v2962_v47  ;;  %2675 = vmatprep.subr.bf16.mxu1 %v2964_v56  ;;  %v2984_v47 = vld [vmem:[%s3552_s3 + $0x80] sm:$0xff]  }
  0x2e   : > { %2755 = vmatprep.subr.bf16.mxu0 %v2966_v59 }
  0x30   : > { %2676 = vmatpush3.bf16.msra.mxu1 %v2964_v56  ;;  %v2492_v56 = vcombine.low %v1661_v53, %v3351_v54 }
  0x31   : > { %2756 = vmatpush3.bf16.msra.mxu0 %v2966_v59  ;;  %2677 = vmatprep.subr.bf16.mxu1 %v2969_v5  ;;  %v862_v59 = vsel %vm857_vm2, %v859_v40, %v861_v51  ;;  %v3018_v51 = vld [vmem:[%s3552_s3 + $0x198] sm:$0xff]  }
  0x32   : > { %2757 = vmatprep.subr.bf16.mxu0 %v2970_v6  ;;  %v1709_v61 = vshll.u32 %v2492_v56, 16  ;;  %v1707_v2 = vshrl.u32 %v2492_v56, 16 }
  0x34   : > { %2678 = vmatpush3.bf16.msra.mxu1 %v2969_v5  ;;  %v1711_v4 = vrot.slane %v1709_v61, 1  ;;  %v1714_v5 = vshll.u32 %v3359_v58, 16 }
  0x35   : > { %2758 = vmatpush3.bf16.msra.mxu0 %v2970_v6  ;;  %2687 = vmatprep.subr.bf16.mxu1 %v2973_v15  ;;  %v2996_v6 = vld [vmem:[%s3552_s3 + $0xa0] sm:$0xff]  }
  0x36   : > { %2767 = vmatprep.subr.bf16.mxu0 %v2975_v17  ;;  %v1716_v9 = vrot.slane %v1714_v5, 1  ;;  %v1712_v11 = vor.u32 %v1711_v4, %v1707_v2  ;;  %v474_v2 = vld [vmem:[#allocation2 + $0x38] sm:$0xff] }
  0x37   : > { %2680 = vmatmul.mubr.msk.bf16.vlgmr.msra.gmra.mrb[0].mxu1 %vm551_vm0, %v702_v19  ;;  %v3003_v19 = vld [vmem:[%s3552_s3 + $0x170] sm:$0xff]  }
  0x38   : > { %2688 = vmatpush3.bf16.msra.mxu1 %v2973_v15  ;;  %2760 = vmatmul.mubr.msk.bf16.vlgmr.msra.gmra.mrb[0].mxu0 %vm551_vm0, %v1373_v21  ;;  %v1717_v15 = vsel %vm682_vm1, %v1712_v11, %v1716_v9  ;;  %v3004_v21 = vld [vmem:[%s3552_s3 + $0xb8] sm:$0xff]  }
  0x39   : > { %2768 = vmatpush3.bf16.msra.mxu0 %v2975_v17  ;;  %2689 = vmatprep.subr.bf16.mxu1 %v2977_v22  ;;  %v3001_v17 = vld [vmem:[%s3552_s3 + $0xb0] sm:$0xff]  }
  0x3a   : > { %2769 = vmatprep.subr.bf16.mxu0 %v2978_v26  ;;  %2683 = vmatprep.mubr.msk.bf16.mxu1 %vm551_vm0, %v710_v34  ;;  %v1863_v34 = vld [vmem:[%s3309_s11] sm:$0xe] }
  0x3b   : > { %2763 = vmatprep.mubr.msk.bf16.mxu0 %vm551_vm0, %v1375_v30  ;;  %v3434_v30 = vld [vmem:[%s3309_s11 + $0x20] ss:$0 sps:$4 sm:$0x11]   ;;  %v2519_v40 = vcombine.low %v1863_v34, %v3351_v54 }
  0x3c   : > { %2690 = vmatpush3.bf16.msra.mxu1 %v2977_v22  ;;  %v1718_v22 = vshrl.u32 %v3359_v58, 16  ;;  %v1738_v38 = vshll.u32 %v3434_v30, 16  ;;  %v3019_v54 = vld [vmem:[%s3552_s3 + $0x1a0] sm:$0xff]   ;;  %v1887_v56 = vrot.slane %v3434_v30, 1 }
  0x3d   : > { %2770 = vmatpush3.bf16.msra.mxu0 %v2978_v26  ;;  %2691 = vmatprep.subr.bf16.mxu1 %v2979_v28  ;;  %v1730_v26 = vshll.u32 %v3418_v20, 16 }
  0x3e   : > { %2771 = vmatprep.subr.bf16.mxu0 %v2980_v37  ;;  %v1720_v27 = vor.u32 %v1718_v22, %v1716_v9  ;;  %v470_v22 = vld [vmem:[#allocation2 + $0x18] sm:$0xff] }
  0x3f   : > { %2684 = vmatmul.mubr.msk.bf16.gmra.mrb[4].mxu1 %vm551_vm0, %v718_v41  ;;  %v1732_v33 = vrot.slane %v1730_v26, 1 }
  0x40   : > { %2692 = vmatpush3.bf16.msra.mxu1 %v2979_v28  ;;  %2764 = vmatmul.mubr.msk.bf16.gmra.mrb[4].mxu0 %vm551_vm0, %v1377_v43  ;;  %v1724_v28 = vrot.slane %v1722_v23, 1  ;;  %v1740_v43 = vrot.slane %v1738_v38, 1 }
  0x41   : > { %2772 = vmatpush3.bf16.msra.mxu0 %v2980_v37  ;;  %2693 = vmatprep.subr.bf16.mxu1 %v2981_v42  ;;  %v1734_v37 = vshrl.u32 %v3418_v20, 16 }
  0x42   : > { %2773 = vmatprep.subr.bf16.mxu0 %v2982_v44  ;;  %2699 = vmatprep.mubr.msk.bf16.mxu1 %vm551_vm0, %v860_v45  ;;  %v1728_v32 = vor.u32 %v1726_v25, %v1724_v28  ;;  %v1725_v35 = vsel %vm682_vm1, %v1720_v27, %v1724_v28  ;;  %v3015_v45 = vld [vmem:[%s3150_s28 + $0x18] sm:$0xff]  }
  0x43   : > { %2779 = vmatprep.mubr.msk.bf16.mxu0 %vm551_vm0, %v2991_v46  ;;  %v1880_v46 = vrot.slane %v2519_v40, 1 }
  0x44   : > { %2694 = vmatpush3.bf16.msra.mxu1 %v2981_v42  ;;  %v1733_v41 = vsel %vm682_vm1, %v1728_v32, %v1732_v33  ;;  %v1736_v42 = vor.u32 %v1734_v37, %v1732_v33  ;;  %v468_v33 = vld [vmem:[#allocation2 + $0x8] sm:$0xff] }
  0x45   : > { %2774 = vmatpush3.bf16.msra.mxu0 %v2982_v44  ;;  %2695 = vmatprep.subr.bf16.mxu1 %v2984_v47  ;;  %v3017_v44 = vld [vmem:[%s3552_s3 + $0x190] sm:$0xff]  }
  0x46   : > { %2775 = vmatprep.subr.bf16.mxu0 %v2985_v48 }
  0x48   : > { %2696 = vmatpush3.bf16.msra.mxu1 %v2984_v47  ;;  %v1881_v47 = vrot.slane %v3359_v58, 1 }
  0x49   : > { %2776 = vmatpush3.bf16.msra.mxu0 %v2985_v48  ;;  %2697 = vmatprep.subr.bf16.mxu1 %v2987_v49  ;;  %v1883_v48 = vrot.slane %v3402_v18, 1 }
  0x4a   : > { %2777 = vmatprep.subr.bf16.mxu0 %v2988_v50 }
  0x4b   : > { %v1884_v58 = vsel %vm857_vm2, %v1881_v47, %v1883_v48 }
  0x4c   : > { %2698 = vmatpush3.bf16.msra.mxu1 %v2987_v49  ;;  %v1885_v49 = vrot.slane %v3418_v20, 1  ;;  %v467_v20 = vld [vmem:[#allocation2] sm:$0xff] }
  0x4d   : > { %2778 = vmatpush3.bf16.msra.mxu0 %v2988_v50  ;;  %2707 = vmatprep.subr.bf16.mxu1 %v2990_v52  ;;  %v1741_v50 = vsel %vm682_vm1, %v1736_v42, %v1740_v43 }
  0x4e   : > { %2787 = vmatprep.subr.bf16.mxu0 %v2992_v55  ;;  %v1886_v53 = vsel %vm857_vm2, %v1883_v48, %v1885_v49  ;;  %v1888_v57 = vsel %vm857_vm2, %v1885_v49, %v1887_v56 }
  0x4f   : > { %2700 = vmatmul.mubr.msk.bf16.vlgmr.msra.gmra.mrb[0].mxu1 %vm551_vm0, %v862_v59 }
  0x50   : > { %2708 = vmatpush3.bf16.msra.mxu1 %v2990_v52  ;;  %2780 = vmatmul.mubr.msk.bf16.vlgmr.msra.gmra.mrb[0].mxu0 %vm551_vm0, %v2993_v60  ;;  %v1882_v52 = vsel %vm857_vm2, %v1880_v46, %v1881_v47 }
  0x51   : > { %2788 = vmatpush3.bf16.msra.mxu0 %v2992_v55  ;;  %2709 = vmatprep.subr.bf16.mxu1 %v2994_v62  ;;  %v3020_v55 = vld [vmem:[%s3552_s3 + $0x1a8] sm:$0xff]  }
  0x52   : > { %2789 = vmatprep.subr.bf16.mxu0 %v2995_v63  ;;  %2703 = vmatprep.mubr.msk.bf16.mxu1 %vm551_vm0, %v864_v3 }
  0x53   : > { %2783 = vmatprep.mubr.msk.bf16.mxu0 %vm551_vm0, %v3000_v0  ;;  %v471_v0 = vld [vmem:[#allocation2 + $0x20] sm:$0xff] }
  0x54   : > { %2710 = vmatpush3.bf16.msra.mxu1 %v2994_v62 }
  0x55   : > { %2790 = vmatpush3.bf16.msra.mxu0 %v2995_v63  ;;  %2711 = vmatprep.subr.bf16.mxu1 %v2996_v6  ;;  %v473_v63 = vld [vmem:[#allocation2 + $0x30] sm:$0xff] }
  0x56   : > { %2791 = vmatprep.subr.bf16.mxu0 %v2997_v7 }
  0x57   : > { %2704 = vmatmul.mubr.msk.bf16.gmra.mrb[4].mxu1 %vm551_vm0, %v866_v10 }
  0x58   : > { %2712 = vmatpush3.bf16.msra.mxu1 %v2996_v6  ;;  %2784 = vmatmul.mubr.msk.bf16.gmra.mrb[4].mxu0 %vm551_vm0, %v3002_v8  ;;  %v472_v6 = vld [vmem:[#allocation2 + $0x28] sm:$0xff] }
  0x59   : > { %2792 = vmatpush3.bf16.msra.mxu0 %v2997_v7  ;;  %2713 = vmatprep.subr.bf16.mxu1 %v2998_v12 }
  0x5a   : > { %2793 = vmatprep.subr.bf16.mxu0 %v2999_v13  ;;  %2719 = vmatprep.mubr.msk.bf16.mxu1 %vm551_vm0, %v3006_v14 }
  0x5b   : > { %2799 = vmatprep.mubr.msk.bf16.mxu0 %vm551_vm0, %v1717_v15 }
  0x5c   : > { %2714 = vmatpush3.bf16.msra.mxu1 %v2998_v12 }
  0x5d   : > { %2794 = vmatpush3.bf16.msra.mxu0 %v2999_v13  ;;  %2715 = vmatprep.subr.bf16.mxu1 %v3001_v17 }
  0x5e   : > { %2795 = vmatprep.subr.bf16.mxu0 %v3003_v19 }
  0x60   : > { %2716 = vmatpush3.bf16.msra.mxu1 %v3001_v17 }
  0x61   : > { %2796 = vmatpush3.bf16.msra.mxu0 %v3003_v19  ;;  %2717 = vmatprep.subr.bf16.mxu1 %v3004_v21  ;;  %v469_v19 = vld [vmem:[#allocation2 + $0x10] sm:$0xff] }
  0x62   : > { %2797 = vmatprep.subr.bf16.mxu0 %v3005_v24 }
  0x64   : > { %2718 = vmatpush3.bf16.msra.mxu1 %v3004_v21 }
  0x65   : > { %2798 = vmatpush3.bf16.msra.mxu0 %v3005_v24  ;;  %2827 = vmatprep.subr.bf16.mxu1 %v3011_v29 }
  0x66   : > { %2807 = vmatprep.subr.bf16.mxu0 %v3011_v29 }
  0x67   : > { %2720 = vmatmul.mubr.msk.bf16.vlgmr.msra.gmra.mrb[0].mxu1 %vm551_vm0, %v3009_v31 }
  0x68   : > { %2800 = vmatmul.mubr.msk.bf16.vlgmr.msra.gmra.mrb[0].mxu0 %vm551_vm0, %v1725_v35  ;;  %2833 = vmatpush3.bf16.msra.mxu1 %v3011_v29 }
  0x69   : > { %2808 = vmatpush3.bf16.msra.mxu0 %v3011_v29  ;;  %2828 = vmatprep.subr.bf16.mxu1 %v3012_v36 }
  0x6a   : > { %2809 = vmatprep.subr.bf16.mxu0 %v3012_v36  ;;  %2723 = vmatprep.mubr.msk.bf16.mxu1 %vm551_vm0, %v3013_v39 }
  0x6b   : > { %2803 = vmatprep.mubr.msk.bf16.mxu0 %vm551_vm0, %v1733_v41 }
  0x6c   : > { %2834 = vmatpush3.bf16.msra.mxu1 %v3012_v36 }
  0x6d   : > { %2810 = vmatpush3.bf16.msra.mxu0 %v3012_v36  ;;  %2829 = vmatprep.subr.bf16.mxu1 %v3017_v44 }
  0x6e   : > { %2811 = vmatprep.subr.bf16.mxu0 %v3017_v44 }
  0x6f   : > { %2724 = vmatmul.mubr.msk.bf16.gmra.mrb[4].mxu1 %vm551_vm0, %v3015_v45 }
  0x70   : > { %2804 = vmatmul.mubr.msk.bf16.gmra.mrb[4].mxu0 %vm551_vm0, %v1741_v50  ;;  %2835 = vmatpush3.bf16.msra.mxu1 %v3017_v44 }
  0x71   : > { %2812 = vmatpush3.bf16.msra.mxu0 %v3017_v44  ;;  %2830 = vmatprep.subr.bf16.mxu1 %v3018_v51 }
  0x72   : > { %2813 = vmatprep.subr.bf16.mxu0 %v3018_v51  ;;  %2819 = vmatprep.mubr.msk.bf16.mxu0 %vm551_vm0, %v1882_v52 }
  0x73   : > { %2823 = vmatprep.mubr.msk.bf16.mxu1 %vm551_vm0, %v1886_v53 }
  0x74   : > { %2836 = vmatpush3.bf16.msra.mxu1 %v3018_v51 }
  0x75   : > { %2814 = vmatpush3.bf16.msra.mxu0 %v3018_v51  ;;  %2831 = vmatprep.subr.bf16.mxu1 %v3019_v54 }
  0x76   : > { %2815 = vmatprep.subr.bf16.mxu0 %v3019_v54 }
  0x78   : > { %2837 = vmatpush3.bf16.msra.mxu1 %v3019_v54 }
  0x79   : > { %2816 = vmatpush3.bf16.msra.mxu0 %v3019_v54  ;;  %2832 = vmatprep.subr.bf16.mxu1 %v3020_v55 }
  0x7a   : > { %2817 = vmatprep.subr.bf16.mxu0 %v3020_v55 }
  0x7c   : > { %2838 = vmatpush3.bf16.msra.mxu1 %v3020_v55 }
  0x7d   : > { %2818 = vmatpush3.bf16.msra.mxu0 %v3020_v55 }
  0x7f   : > { %2824 = vmatmul.mubr.msk.bf16.vlgmr.msra.gmra.mrb[8].mxu1 %vm551_vm0, %v1888_v57 }
  0x80   : > { %2820 = vmatmul.mubr.msk.bf16.vlgmr.msra.gmra.mrb[0].mxu0 %vm551_vm0, %v1884_v58 }
 0x13a   : > { %v2721_v59 = vpop.f32.mrb[0].mxu1 }
 0x13b   : > { %v1111_v60 = vpop.f32.mrb[1].mxu1  ;;  %v2839_v21 = vadd.f32 %v2721_v59, %v469_v19 }
 0x13c   : > { %v2722_v61 = vpop.f32.mrb[2].mxu1  ;;  %v2841_v24 = vadd.f32 %v1111_v60, %v467_v20 }
 0x13d   : > { %v1114_v62 = vpop.f32.mrb[3].mxu1  ;;  %v2843_v32 = vadd.f32 %v2722_v61, %v470_v22 }
 0x13e   : > { %v2845_v45 = vadd.f32 %v1114_v62, %v468_v33 }
 0x142   : > { %v2725_v1 = vpop.f32.mrb[4].mxu1 }
 0x143   : > { %v2847_v3 = vadd.f32 %v2725_v1, %v473_v63  ;;  %v2805_v4 = vpop.f32.mrb[4].mxu0  ;;  %v1127_v5 = vpop.f32.mrb[5].mxu1 }
 0x144   : > { %v2850_v7 = vadd.f32 %v1127_v5, %v471_v0  ;;  %v1840_v8 = vpop.f32.mrb[5].mxu0  ;;  %v2726_v9 = vpop.f32.mrb[6].mxu1 }
 0x145   : > { %v2848_v10 = vadd.f32 %v2847_v3, %v2805_v4  ;;  %v2853_v11 = vadd.f32 %v2726_v9, %v474_v2  ;;  %v2806_v12 = vpop.f32.mrb[6].mxu0  ;;  %v1130_v13 = vpop.f32.mrb[7].mxu1 }
 0x146   : > { %v2851_v14 = vadd.f32 %v2850_v7, %v1840_v8  ;;  %v2856_v15 = vadd.f32 %v1130_v13, %v472_v6  ;;  %v1843_v16 = vpop.f32.mrb[7].mxu0 }
 0x147   : > { %v2854_v17 = vadd.f32 %v2853_v11, %v2806_v12 }
 0x148   : > { %v2857_v18 = vadd.f32 %v2856_v15, %v1843_v16 }
 0x152   : > { %v2825_v23 = vpop.f32.mrb[8].mxu1 }
 0x153   : > { %v2821_v25 = vpop.f32.mrb[0].mxu0  ;;  %v3479_v26 = vadd.f32 %v2848_v10, %v2825_v23  ;;  %v1987_v27 = vpop.f32.mrb[9].mxu1 }
 0x154   : > { %v3481_v28 = vadd.f32 %v2839_v21, %v2821_v25  ;;  %v1971_v29 = vpop.f32.mrb[1].mxu0  ;;  %v3483_v30 = vadd.f32 %v2851_v14, %v1987_v27  ;;  %v2826_v31 = vpop.f32.mrb[10].mxu1 }
 0x155   : > { %2017 = vst.msk [vmem:[#allocation2 + $0x30] sm:$0xff] %vm458_vm3, %v3479_v26  ;;  %v2036_v34 = vmin.f32 %v3479_v26, 0.0  ;;  %v2842_v35 = vadd.f32 %v2841_v24, %v1971_v29  ;;  %v2822_v36 = vpop.f32.mrb[2].mxu0  ;;  %v3488_v37 = vadd.f32 %v2854_v17, %v2826_v31  ;;  %v1990_v38 = vpop.f32.mrb[11].mxu1  ;;  %vm2028_vm4 = vcmp.gt.f32.partialorder %v3479_v26, 0.0 }
 0x156   : > { %2013 = vst.msk [vmem:[#allocation2 + $0x10] sm:$0xff] %vm458_vm3, %v3481_v28  ;;  %v2032_v39 = vmin.f32 %v3481_v28, 0.0  ;;  %2015 = vst.msk [vmem:[#allocation2 + $0x20] sm:$0xff] %vm458_vm3, %v3483_v30  ;;  %v2034_v40 = vmin.f32 %v3483_v30, 0.0  ;;  %v1974_v41 = vpop.f32.mrb[3].mxu0  ;;  %v2844_v44 = vadd.f32 %v2843_v32, %v2822_v36  ;;  %v3501_v53 = vadd.f32 %v2857_v18, %v1990_v38 }
 0x157   : > { %v2050_v42 = vmul.f32 1.442695, %v2036_v34  ;;  %2011 = vst.msk [vmem:[#allocation2] sm:$0xff] %vm458_vm3, %v2842_v35  ;;  %v2030_v43 = vmin.f32 %v2842_v35, 0.0  ;;  %2018 = vst.msk [vmem:[#allocation2 + $0x38] sm:$0xff] %vm458_vm3, %v3488_v37  ;;  %v2037_v48 = vmin.f32 %v3488_v37, 0.0  ;;  %v2846_v52 = vadd.f32 %v2845_v45, %v1974_v41 }
 0x158   : > { %v2042_v46 = vmul.f32 1.442695, %v2032_v39  ;;  %v2046_v47 = vmul.f32 1.442695, %v2034_v40  ;;  %2014 = vst.msk [vmem:[#allocation2 + $0x18] sm:$0xff] %vm458_vm3, %v2844_v44  ;;  %v2033_v50 = vmin.f32 %v2844_v44, 0.0 }
 0x159   : > { %3022 = vpow2.f32 %v2050_v42  ;;  %v2038_v49 = vmul.f32 1.442695, %v2030_v43  ;;  %v2052_v51 = vmul.f32 1.442695, %v2037_v48  ;;  %2012 = vst.msk [vmem:[#allocation2 + $0x8] sm:$0xff] %vm458_vm3, %v2846_v52  ;;  %v2031_v55 = vmin.f32 %v2846_v52, 0.0 }
 0x15a   : > { %3024 = vpow2.f32 %v2042_v46  ;;  %v2044_v54 = vmul.f32 1.442695, %v2033_v50  ;;  %2016 = vst.msk [vmem:[#allocation2 + $0x28] sm:$0xff] %vm458_vm3, %v3501_v53  ;;  %v2035_v56 = vmin.f32 %v3501_v53, 0.0  ;;  %vm2024_vm5 = vcmp.gt.f32.partialorder %v3481_v28, 0.0 }
 0x15b   : > { %3026 = vpow2.f32 %v2038_v49  ;;  %v2040_v57 = vmul.f32 1.442695, %v2031_v55  ;;  %vm2022_vm7 = vcmp.gt.f32.partialorder %v2842_v35, 0.0  ;;  %vm2026_vm8 = vcmp.gt.f32.partialorder %v3483_v30, 0.0 }
 0x15c   : > { %3028 = vpow2.f32 %v2046_v47  ;;  %v2048_v58 = vmul.f32 1.442695, %v2035_v56  ;;  %vm2025_vm9 = vcmp.gt.f32.partialorder %v2844_v44, 0.0  ;;  %vm2029_vm10 = vcmp.gt.f32.partialorder %v3488_v37, 0.0 }
 0x15d   : > { %3030 = vpow2.f32 %v2044_v54  ;;  %vm2023_vm11 = vcmp.gt.f32.partialorder %v2846_v52, 0.0  ;;  %vm2027_vm12 = vcmp.gt.f32.partialorder %v3501_v53, 0.0 }
 0x15e   : > { %3032 = vpow2.f32 %v2052_v51 }
 0x15f   : > { %3034 = vpow2.f32 %v2040_v57 }
 0x160   : > { %3036 = vpow2.f32 %v2048_v58 }
 0x163   : > { %v3023_v59 = vpop.eup %3022 }
 0x164   : > { %v3025_v60 = vpop.eup %3024  ;;  %v2536_v61 = vadd.f32 -1.0, %v3023_v59 }
 0x165   : > { %v3027_v62 = vpop.eup %3026  ;;  %v2532_v63 = vadd.f32 -1.0, %v3025_v60 }
 0x166   : > { %v3029_v0 = vpop.eup %3028  ;;  %v2068_v1 = vsel %vm2028_vm4, %v3479_v26, %v2536_v61  ;;  %v2530_v2 = vadd.f32 -1.0, %v3027_v62 }
 0x167   : > { %v3031_v3 = vpop.eup %3030  ;;  %v2064_v4 = vsel %vm2024_vm5, %v3481_v28, %v2532_v63  ;;  %v2555_v5 = vpack.c.bf16 %v2068_v1, %v2068_v1  ;;  %v2534_v6 = vadd.f32 -1.0, %v3029_v0 }
 0x168   : > { %v3033_v7 = vpop.eup %3032  ;;  %v2551_v8 = vpack.c.bf16 %v2064_v4, %v2064_v4  ;;  %v2062_v9 = vsel %vm2022_vm7, %v2842_v35, %v2530_v2  ;;  %v2533_v10 = vadd.f32 -1.0, %v3031_v3 }
 0x169   : > { %2109 = vst.msk [vmem:[%s3513_s23 + $0x18] sm:$0xf] %vm2102_vm6, %v2555_v5  ;;  %v2549_v11 = vpack.c.bf16 %v2062_v9, %v2062_v9  ;;  %v2066_v12 = vsel %vm2026_vm8, %v3483_v30, %v2534_v6  ;;  %v2537_v13 = vadd.f32 -1.0, %v3033_v7  ;;  %v3035_v14 = vpop.eup %3034 }
 0x16a   : > { %2105 = vst.msk [vmem:[%s3513_s23 + $0x8] sm:$0xf] %vm2102_vm6, %v2551_v8  ;;  %v2553_v15 = vpack.c.bf16 %v2066_v12, %v2066_v12  ;;  %v2065_v16 = vsel %vm2025_vm9, %v2844_v44, %v2533_v10  ;;  %v3037_v17 = vpop.eup %3036  ;;  %v2531_v20 = vadd.f32 -1.0, %v3035_v14 }
 0x16b   : > { %2103 = vst.msk [vmem:[%s3513_s23] sm:$0xf] %vm2102_vm6, %v2549_v11  ;;  %v2552_v18 = vpack.c.bf16 %v2065_v16, %v2065_v16  ;;  %v2069_v19 = vsel %vm2029_vm10, %v3488_v37, %v2537_v13  ;;  %v2535_v22 = vadd.f32 -1.0, %v3037_v17 }
 0x16c   : > { %2107 = vst.msk [vmem:[%s3513_s23 + $0x10] sm:$0xf] %vm2102_vm6, %v2553_v15  ;;  %v2556_v21 = vpack.c.bf16 %v2069_v19, %v2069_v19  ;;  %v2063_v23 = vsel %vm2023_vm11, %v2846_v52, %v2531_v20 }
 0x16d   : > { %2106 = vst.msk [vmem:[%s3513_s23 + $0xc] sm:$0xf] %vm2102_vm6, %v2552_v18  ;;  %v2550_v24 = vpack.c.bf16 %v2063_v23, %v2063_v23  ;;  %v2067_v25 = vsel %vm2027_vm12, %v3501_v53, %v2535_v22 }
 0x16e   : > { %2110 = vst.msk [vmem:[%s3513_s23 + $0x1c] sm:$0xf] %vm2102_vm6, %v2556_v21  ;;  %v2554_v26 = vpack.c.bf16 %v2067_v25, %v2067_v25 }
 0x16f   : > { %2104 = vst.msk [vmem:[%s3513_s23 + $0x4] sm:$0xf] %vm2102_vm6, %v2550_v24 }
 0x170   : > { %2108 = vst.msk [vmem:[%s3513_s23 + $0x14] sm:$0xf] %vm2102_vm6, %v2554_v26 }
 0x171 PF: > { %s15_s20 = sadd.s32 1, %s3060_s20   ;;  %s3556_s18 = smov %s3056_s19 }
 0x172   : > { %p12_p8 = scmp.ge.s32.totalorder %s15_s20, 66   ;;  %s3557_s19 = smov %s3559_s21 }
 0x174   :  { %14 = sbr.rel (!%p12_p8) target bundleno = 2 (0x2), region = 98 }

</bundles_post_ra>
